<compile_context>
chip_gen: v5e
topology: v5e:2x2
jax: 0.10.0
libtpu: 0.0.40
codegen_flags: <defaults>
</compile_context>

<pallas_src>
import functools

import jax
import jax.numpy as jnp
from jax.experimental import pallas as pl
from jax.experimental.pallas import tpu as pltpu


_BN_EPS = 1e-5


def _round_up(x, m):
    return ((x + m - 1) // m) * m


# ----------------------------------------------------------------------------
# Per-generation tiling / VMEM-limit selection (with safe fallbacks)
# ----------------------------------------------------------------------------
def _vmem_capacity_bytes():
    try:
        return int(pltpu.get_tpu_info().vmem_capacity_bytes)
    except Exception:
        return 64 * 1024 * 1024          # conservative: v7x per-core size


def _choose_tile_n(embed_dim):
    """Output-column stripe width.  Small models use full width (nj == 1)."""
    if embed_dim % 128 != 0 or embed_dim <= 1024:
        return embed_dim
    # Wide stripes on 128 MiB parts (v5e/v6e), 1024 on 64 MiB parts (v7x).
    cap = 2048 if _vmem_capacity_bytes() >= (96 << 20) else 1024
    tile = min(cap, embed_dim)
    while embed_dim % tile:
        tile //= 2
    return max(tile, 128)


def _choose_vmem_limit():
    cap = _vmem_capacity_bytes()
    return int(max(32 << 20, min(cap - (16 << 20), 100 << 20)))


# ----------------------------------------------------------------------------
# Fused kernel: first LinearBlock -> hidden LinearBlocks -> head, one launch.
# ----------------------------------------------------------------------------
def _make_fused_kernel(*, num_blocks, num_hidden, nj, tile_n):
    """num_blocks = total LinearBlocks; num_hidden = E x E blocks (>= 1)."""

    def kernel(x0_ref, w0_ref, whid_ref, wh_ref, b_ref, g_ref, be_ref, bh_ref,
               o_ref, act0_ref, act1_ref):
        # x0_ref:   (B, Kp)          bf16   padded one-hot input (resident)
        # w0_ref:   (Kp, tile_n)     bf16   contiguous stripe j of W0
        # whid_ref: (E, tile_n)      bf16   contiguous stripe j of hidden W[l-1]
        # wh_ref:   (nj, tile_n, Np) bf16   head weight, K-striped (resident)
        # b/g/be:   (1, tile_n)      f32    bias / gamma / beta tile of block l
        # bh_ref:   (1, Np)          f32    head bias (resident)
        # o_ref:    (B, Np)          f32    padded logits (written once)
        # act0/1:   (nj, B, tile_n)  bf16   ping-pong activations (VMEM scratch)
        l = pl.program_id(0)
        j = pl.program_id(1)

        def bn_epilogue(y_pre):
            # Linear bias -> ReLU -> BatchNorm1d (training mode, biased var).
            y = jnp.maximum(y_pre + b_ref[...], 0.0)
            mean = jnp.mean(y, axis=0, keepdims=True)
            d = y - mean
            var = jnp.mean(d * d, axis=0, keepdims=True)
            scale = g_ref[...] * jax.lax.rsqrt(var + _BN_EPS)
            return d * scale + be_ref[...]

        # ---- Phase 0: first LinearBlock (one-hot -> embed), writes ping. ----
        @pl.when(l == 0)
        def _():
            y = jnp.dot(x0_ref[...], w0_ref[...],
                        preferred_element_type=jnp.float32)
            act0_ref[j] = bn_epilogue(y).astype(jnp.bfloat16)

        # ---- Phases 1..num_hidden: hidden LinearBlocks (ping-pong). ----
        def hidden_step(src_ref, dst_ref):
            acc = jnp.dot(src_ref[0], whid_ref[0:tile_n, :],
                          preferred_element_type=jnp.float32)
            for k in range(1, nj):                       # static, unrolled
                acc = acc + jnp.dot(
                    src_ref[k], whid_ref[k * tile_n:(k + 1) * tile_n, :],
                    preferred_element_type=jnp.float32)
            dst_ref[j] = bn_epilogue(acc).astype(jnp.bfloat16)

        is_hidden = jnp.logical_and(l >= 1, l <= num_hidden)

        @pl.when(jnp.logical_and(is_hidden, l % 2 == 1))
        def _():
            hidden_step(act0_ref, act1_ref)

        @pl.when(jnp.logical_and(is_hidden, l % 2 == 0))
        def _():
            hidden_step(act1_ref, act0_ref)

        # ---- Final phase: head Linear; single write on the last grid step. ----
        head_src = act0_ref if (num_blocks % 2 == 1) else act1_ref

        @pl.when(jnp.logical_and(l == num_blocks, j == nj - 1))
        def _():
            acc = jnp.dot(head_src[0], wh_ref[0],
                          preferred_element_type=jnp.float32)
            for k in range(1, nj):                       # static, unrolled
                acc = acc + jnp.dot(head_src[k], wh_ref[k],
                                    preferred_element_type=jnp.float32)
            o_ref[...] = acc + bh_ref[...]

    return kernel


def fused_forward(x0, w0_t, whid_t, wh_t, bn_b, bn_g, bn_be, bh,
                  *, tile_n, vmem_limit):
    """Single pallas_call for the entire network.

    x0:     (B, Kp)            bf16  padded one-hot input
    w0_t:   (nj, Kp, tile_n)   bf16  column-stripe-major first-block weight
    whid_t: (NL, nj, E, tile_n)bf16  column-stripe-major hidden weights
    wh_t:   (nj, tile_n, Np)   bf16  K-striped head weight
    bn_*:   (num_blocks, 1, E) f32   bias / gamma / beta for every LinearBlock
    bh:     (1, Np)            f32   head bias
    """
    nj, Kp, tn = w0_t.shape
    assert tn == tile_n
    NL = whid_t.shape[0]
    num_blocks = NL + 1
    E = nj * tile_n
    B = x0.shape[0]
    Np = wh_t.shape[-1]

    # --- index maps (all clamped so no redundant stripe DMAs occur) ---
    def x0_map(l, j):
        return (0, 0)

    def w0_map(l, j):
        return (jnp.where(l == 0, j, nj - 1), 0, 0)

    def whid_map(l, j):
        lb = jnp.clip(l - 1, 0, NL - 1)
        jj = jnp.where(l == 0, 0, jnp.where(l > NL, nj - 1, j))
        return (lb, jj, 0, 0)

    def wh_map(l, j):
        return (0, 0, 0)

    def bn_map(l, j):
        lb = jnp.minimum(l, num_blocks - 1)
        jj = jnp.where(l < num_blocks, j, nj - 1)
        return (lb, 0, jj)

    def bh_map(l, j):
        return (0, 0)

    def out_map(l, j):
        return (0, 0)

    kernel = _make_fused_kernel(
        num_blocks=num_blocks, num_hidden=NL, nj=nj, tile_n=tile_n)

    return pl.pallas_call(
        kernel,
        out_shape=jax.ShapeDtypeStruct((B, Np), jnp.float32),
        grid_spec=pltpu.PrefetchScalarGridSpec(
            num_scalar_prefetch=0,
            grid=(num_blocks + 1, nj),
            in_specs=[
                pl.BlockSpec((B, Kp), x0_map),                    # input (resident)
                pl.BlockSpec((None, Kp, tile_n), w0_map),         # W0 stripe
                pl.BlockSpec((None, None, E, tile_n), whid_map),  # hidden W stripe
                pl.BlockSpec((nj, tile_n, Np), wh_map),           # head W (resident)
                pl.BlockSpec((None, 1, tile_n), bn_map),          # bias tile
                pl.BlockSpec((None, 1, tile_n), bn_map),          # gamma tile
                pl.BlockSpec((None, 1, tile_n), bn_map),          # beta tile
                pl.BlockSpec((1, Np), bh_map),                    # head bias (resident)
            ],
            out_specs=pl.BlockSpec((B, Np), out_map),             # written once
            scratch_shapes=[
                pltpu.VMEM((nj, B, tile_n), jnp.bfloat16),        # ping activations
                pltpu.VMEM((nj, B, tile_n), jnp.bfloat16),        # pong activations
            ],
        ),
        compiler_params=pltpu.CompilerParams(
            # Sequential single-core iteration is REQUIRED for the layer carry.
            dimension_semantics=("arbitrary", "arbitrary"),
            vmem_limit_bytes=vmem_limit,
        ),
    )(x0, w0_t, whid_t, wh_t, bn_b, bn_g, bn_be, bh)


# ----------------------------------------------------------------------------
# Parameters
# ----------------------------------------------------------------------------
def init_params(key, *, embed_dim, num_hidden_layers, input_dim, output_dim):
    """f32 params mimicking torch.nn.Linear default U(-1/sqrt(fan_in), ...)."""
    dims = [input_dim] + [embed_dim] * num_hidden_layers + [output_dim]
    params = []
    for i in range(len(dims) - 1):
        fan_in, fan_out = dims[i], dims[i + 1]
        key, kw, kb = jax.random.split(key, 3)
        bound = 1.0 / jnp.sqrt(jnp.float32(fan_in))
        w = jax.random.uniform(kw, (fan_in, fan_out), jnp.float32, -bound, bound)
        b = jax.random.uniform(kb, (fan_out,), jnp.float32, -bound, bound)
        if i < len(dims) - 2:  # LinearBlock -> has BN affine params
            gamma = jnp.ones((fan_out,), jnp.float32)
            beta = jnp.zeros((fan_out,), jnp.float32)
            params.append((w, b, gamma, beta))
        else:                  # final plain Linear
            params.append((w, b))
    return params


def prepare_params(params, *, tile_n):
    """Pad, cast to bf16, and pre-transpose weights to contiguous-stripe layouts."""
    w0, _, _, _ = params[0]
    K0, E = w0.shape
    assert E % tile_n == 0
    nj = E // tile_n
    Kp = _round_up(K0, 128)                         # 324 -> 384

    # First-block weight: (Kp, E) -> (nj, Kp, tile_n), each stripe contiguous.
    w0p = jnp.zeros((Kp, E), jnp.float32).at[:K0].set(w0).astype(jnp.bfloat16)
    w0_t = w0p.reshape(Kp, nj, tile_n).transpose(1, 0, 2)

    hidden = params[1:-1]
    assert len(hidden) >= 1, "fused kernel expects num_hidden_layers >= 2"
    ws = jnp.stack([p[0] for p in hidden]).astype(jnp.bfloat16)       # (NL, E, E)
    whid_t = ws.reshape(-1, E, nj, tile_n).transpose(0, 2, 1, 3)      # (NL, nj, E, tile_n)

    blocks = [params[0]] + list(hidden)
    bn_b = jnp.stack([p[1].reshape(1, E) for p in blocks])            # (num_blocks, 1, E)
    bn_g = jnp.stack([p[2].reshape(1, E) for p in blocks])
    bn_be = jnp.stack([p[3].reshape(1, E) for p in blocks])

    wh, bh = params[-1]
    N = wh.shape[1]
    Np = _round_up(N, 128)                          # 18 -> 128
    whp = jnp.zeros((E, Np), jnp.float32).at[:, :N].set(wh).astype(jnp.bfloat16)
    wh_t = whp.reshape(nj, tile_n, Np)              # K-striped head weight
    bhp = jnp.zeros((1, Np), jnp.float32).at[0, :N].set(bh)

    return dict(w0=w0_t, whid=whid_t, wh=wh_t,
                bn_b=bn_b, bn_g=bn_g, bn_be=bn_be, bh=bhp)


# ----------------------------------------------------------------------------
# Model forward (Pallas) and references
# ----------------------------------------------------------------------------
@functools.partial(jax.jit, static_argnames=("output_dim", "tile_n", "vmem_limit"))
def model_v1_forward(inputs, prepared, *, output_dim, tile_n, vmem_limit):
    """inputs: int32 (B, 54) in [0, 6). Returns (B, output_dim) f32 logits."""
    Kp = prepared["w0"].shape[1]
    x = jax.nn.one_hot(inputs, 6, dtype=jnp.float32).reshape(inputs.shape[0], -1)
    x = jnp.pad(x, ((0, 0), (0, Kp - x.shape[1]))).astype(jnp.bfloat16)
    logits = fused_forward(
        x, prepared["w0"], prepared["whid"], prepared["wh"],
        prepared["bn_b"], prepared["bn_g"], prepared["bn_be"], prepared["bh"],
        tile_n=tile_n, vmem_limit=vmem_limit)
    return logits[:, :output_dim]


def model_v1_reference_bf16(inputs, params):
    """Pure-JAX reference mirroring the kernel's bf16 weight / activation casts."""
    x = jax.nn.one_hot(inputs, 6, dtype=jnp.float32).reshape(inputs.shape[0], -1)
    for (w, b, g, be) in params[:-1]:
        y = jnp.dot(x.astype(jnp.bfloat16), w.astype(jnp.bfloat16),
                    preferred_element_type=jnp.float32) + b
        y = jnp.maximum(y, 0.0)
        mean = jnp.mean(y, axis=0, keepdims=True)
        var = jnp.mean((y - mean) ** 2, axis=0, keepdims=True)
        x = (y - mean) * (g * jax.lax.rsqrt(var + _BN_EPS)) + be
    w, b = params[-1]
    return jnp.dot(x.astype(jnp.bfloat16), w.astype(jnp.bfloat16),
                   preferred_element_type=jnp.float32) + b


def model_v1_reference_f32(inputs, params):
    """Full-precision reference matching the PyTorch module exactly (info only)."""
    x = jax.nn.one_hot(inputs, 6, dtype=jnp.float32).reshape(inputs.shape[0], -1)
    for (w, b, g, be) in params[:-1]:
        y = jnp.maximum(x @ w + b, 0.0)
        mean = jnp.mean(y, axis=0, keepdims=True)
        var = jnp.mean((y - mean) ** 2, axis=0, keepdims=True)
        x = (y - mean) * jax.lax.rsqrt(var + _BN_EPS) * g + be
    w, b = params[-1]
    return x @ w + b


# ----------------------------------------------------------------------------
if __name__ == "__main__":
    # Small shapes consistent with the module: inputs (B, 54) sticker colors in
    # [0, 6); one-hot flattens to 324.  Scaled-down embed_dim / depth vs paper.
    # NOTE: weight streaming cost is flat in B, so larger batches are nearly
    # free per sample -- B=8 is used here only to keep the demo small.
    BATCH = 8
    EMBED_DIM = 512          # (4096 in the paper config)
    NUM_HIDDEN_LAYERS = 3    # (8 in the paper config)
    INPUT_DIM = 324
    OUTPUT_DIM = 18

    TILE_N = _choose_tile_n(EMBED_DIM)
    VMEM_LIMIT = _choose_vmem_limit()

    key = jax.random.PRNGKey(0)
    k_in, k_par = jax.random.split(key)
    inputs = jax.random.randint(k_in, (BATCH, 54), 0, 6, dtype=jnp.int32)
    params = init_params(
        k_par,
        embed_dim=EMBED_DIM,
        num_hidden_layers=NUM_HIDDEN_LAYERS,
        input_dim=INPUT_DIM,
        output_dim=OUTPUT_DIM,
    )
    prepared = prepare_params(params, tile_n=TILE_N)

    logits = model_v1_forward(
        inputs, prepared, output_dim=OUTPUT_DIM, tile_n=TILE_N,
        vmem_limit=VMEM_LIMIT)
    logits = jax.block_until_ready(logits)
    assert logits.shape == (BATCH, OUTPUT_DIM)

    ref = model_v1_reference_bf16(inputs, params)
    max_diff = float(jnp.max(jnp.abs(logits - ref)))
    assert max_diff < 2e-2, (
        f"Pallas output mismatch vs bf16-mirrored reference: max abs diff = {max_diff}")

    # Informational only: distance to exact f32 (PyTorch-equivalent) math.
    ref_f32 = model_v1_reference_f32(inputs, params)
    _ = float(jnp.max(jnp.abs(logits - ref_f32)))

    print("KERNEL_OK")
</pallas_src>

<mosaic_0001>
module attributes {stable_mosaic.version = 11 : i64} {
  func.func @kernel(%arg0: i32, %arg1: i32, %arg2: memref<8x384xbf16, #tpu.memory_space<vmem>>, %arg3: memref<1x384x512xbf16, #tpu.memory_space<vmem>>, %arg4: memref<1x1x512x512xbf16, #tpu.memory_space<vmem>>, %arg5: memref<1x512x128xbf16, #tpu.memory_space<vmem>>, %arg6: memref<1x1x512xf32, #tpu.memory_space<vmem>>, %arg7: memref<1x1x512xf32, #tpu.memory_space<vmem>>, %arg8: memref<1x1x512xf32, #tpu.memory_space<vmem>>, %arg9: memref<1x128xf32, #tpu.memory_space<vmem>>, %arg10: memref<8x128xf32, #tpu.memory_space<vmem>>, %arg11: memref<1x8x512xbf16, #tpu.memory_space<vmem>>, %arg12: memref<1x8x512xbf16, #tpu.memory_space<vmem>>) attributes {dimension_semantics = [#tpu.dimension_semantics<arbitrary>, #tpu.dimension_semantics<arbitrary>], iteration_bounds = array<i64: 4, 1>, scalar_prefetch = 0 : i64, scratch_operands = 2 : i64, tpu.core_type = #tpu.core_type<tc>, window_params = [{pipeline_mode = #tpu.pipeline_mode<synchronous>, transform_indices = @transform_0, window_bounds = array<i64: 8, 384>}, {transform_indices = @transform_1, window_bounds = array<i64: 1, 384, 512>}, {transform_indices = @transform_2, window_bounds = array<i64: 1, 1, 512, 512>}, {pipeline_mode = #tpu.pipeline_mode<synchronous>, transform_indices = @transform_3, window_bounds = array<i64: 1, 512, 128>}, {transform_indices = @transform_4, window_bounds = array<i64: 1, 1, 512>}, {transform_indices = @transform_5, window_bounds = array<i64: 1, 1, 512>}, {transform_indices = @transform_6, window_bounds = array<i64: 1, 1, 512>}, {pipeline_mode = #tpu.pipeline_mode<synchronous>, transform_indices = @transform_7, window_bounds = array<i64: 1, 128>}, {pipeline_mode = #tpu.pipeline_mode<synchronous>, transform_indices = @transform_8, window_bounds = array<i64: 8, 128>}]} {
    %c0_i32 = arith.constant 0 : i32
    %0 = arith.cmpi eq, %arg0, %c0_i32 : i32
    %1 = arith.extui %0 : i1 to i32
    %c0_i32_0 = arith.constant 0 : i32
    %2 = arith.cmpi ne, %1, %c0_i32_0 : i32
    scf.if %2 {
      %c0 = arith.constant 0 : index
      %c0_19 = arith.constant 0 : index
      %39 = vector.load %arg2[%c0, %c0_19] : memref<8x384xbf16, #tpu.memory_space<vmem>>, vector<8x384xbf16>
      %c0_20 = arith.constant 0 : index
      %c0_21 = arith.constant 0 : index
      %c0_22 = arith.constant 0 : index
      %40 = vector.load %arg3[%c0_20, %c0_21, %c0_22] : memref<1x384x512xbf16, #tpu.memory_space<vmem>>, vector<1x384x512xbf16>
      %41 = vector.shape_cast %40 : vector<1x384x512xbf16> to vector<384x512xbf16>
      %cst = arith.constant dense<0.000000e+00> : vector<8x512xf32>
      %42 = tpu.matmul %39, %41, %cst {dimension_numbers = #tpu.dot_dimension_numbers<[1], [0], [0], [1], [0, 0, 1, 1], [], []>} : vector<8x384xbf16>, vector<384x512xbf16>, vector<8x512xf32> -> vector<8x512xf32>
      %c0_23 = arith.constant 0 : index
      %c0_24 = arith.constant 0 : index
      %c0_25 = arith.constant 0 : index
      %43 = vector.load %arg6[%c0_23, %c0_24, %c0_25] : memref<1x1x512xf32, #tpu.memory_space<vmem>>, vector<1x1x512xf32>
      %44 = vector.shape_cast %43 : vector<1x1x512xf32> to vector<1x512xf32>
      %45 = vector.broadcast %44 : vector<1x512xf32> to vector<8x512xf32>
      %46 = arith.addf %42, %45 : vector<8x512xf32>
      %cst_26 = arith.constant 0.000000e+00 : f32
      %47 = vector.broadcast %cst_26 : f32 to vector<8x512xf32>
      %48 = arith.maximumf %46, %47 : vector<8x512xf32>
      %cst_27 = arith.constant dense<0.000000e+00> : vector<512xf32>
      %49 = vector.multi_reduction <add>, %48, %cst_27 [0] : vector<8x512xf32> to vector<512xf32>
      %50 = vector.shape_cast %49 : vector<512xf32> to vector<1x512xf32>
      %cst_28 = arith.constant 8.000000e+00 : f32
      %51 = vector.broadcast %cst_28 : f32 to vector<1x512xf32>
      %52 = arith.divf %50, %51 : vector<1x512xf32>
      %53 = vector.broadcast %52 : vector<1x512xf32> to vector<8x512xf32>
      %54 = arith.subf %48, %53 : vector<8x512xf32>
      %55 = arith.mulf %54, %54 : vector<8x512xf32>
      %cst_29 = arith.constant dense<0.000000e+00> : vector<512xf32>
      %56 = vector.multi_reduction <add>, %55, %cst_29 [0] : vector<8x512xf32> to vector<512xf32>
      %57 = vector.shape_cast %56 : vector<512xf32> to vector<1x512xf32>
      %cst_30 = arith.constant 8.000000e+00 : f32
      %58 = vector.broadcast %cst_30 : f32 to vector<1x512xf32>
      %59 = arith.divf %57, %58 : vector<1x512xf32>
      %c0_31 = arith.constant 0 : index
      %c0_32 = arith.constant 0 : index
      %c0_33 = arith.constant 0 : index
      %60 = vector.load %arg7[%c0_31, %c0_32, %c0_33] : memref<1x1x512xf32, #tpu.memory_space<vmem>>, vector<1x1x512xf32>
      %61 = vector.shape_cast %60 : vector<1x1x512xf32> to vector<1x512xf32>
      %cst_34 = arith.constant 9.99999974E-6 : f32
      %62 = vector.broadcast %cst_34 : f32 to vector<1x512xf32>
      %63 = arith.addf %59, %62 : vector<1x512xf32>
      %64 = math.rsqrt %63 : vector<1x512xf32>
      %65 = arith.mulf %61, %64 : vector<1x512xf32>
      %66 = vector.broadcast %65 : vector<1x512xf32> to vector<8x512xf32>
      %67 = arith.mulf %54, %66 : vector<8x512xf32>
      %c0_35 = arith.constant 0 : index
      %c0_36 = arith.constant 0 : index
      %c0_37 = arith.constant 0 : index
      %68 = vector.load %arg8[%c0_35, %c0_36, %c0_37] : memref<1x1x512xf32, #tpu.memory_space<vmem>>, vector<1x1x512xf32>
      %69 = vector.shape_cast %68 : vector<1x1x512xf32> to vector<1x512xf32>
      %70 = vector.broadcast %69 : vector<1x512xf32> to vector<8x512xf32>
      %71 = arith.addf %67, %70 : vector<8x512xf32>
      %72 = arith.truncf %71 : vector<8x512xf32> to vector<8x512xbf16>
      %73 = arith.index_cast %arg1 : i32 to index
      %c0_38 = arith.constant 0 : index
      %c0_39 = arith.constant 0 : index
      %74 = vector.load %arg11[%73, %c0_38, %c0_39] : memref<1x8x512xbf16, #tpu.memory_space<vmem>>, vector<1x8x512xbf16>
      %75 = vector.shape_cast %74 : vector<1x8x512xbf16> to vector<8x512xbf16>
      %76 = vector.shape_cast %72 : vector<8x512xbf16> to vector<1x8x512xbf16>
      tpu.vector_store %arg11[%73, %c0_38, %c0_39], %76 {strides = array<i32>} : memref<1x8x512xbf16, #tpu.memory_space<vmem>>, vector<1x8x512xbf16>,
    } else {
    }
    %c1_i32 = arith.constant 1 : i32
    %3 = arith.cmpi sge, %arg0, %c1_i32 : i32
    %c2_i32 = arith.constant 2 : i32
    %4 = arith.cmpi sle, %arg0, %c2_i32 : i32
    %5 = arith.andi %3, %4 : i1
    %c2_i32_1 = arith.constant 2 : i32
    %c0_i32_2 = arith.constant 0 : i32
    %6 = arith.cmpi eq, %c2_i32_1, %c0_i32_2 : i32
    %c1_i32_3 = arith.constant 1 : i32
    %7 = arith.select %6, %c1_i32_3, %c2_i32_1 : i32
    %8 = arith.remsi %arg0, %7 : i32
    %c0_i32_4 = arith.constant 0 : i32
    %9 = arith.cmpi ne, %8, %c0_i32_4 : i32
    %c0_i32_5 = arith.constant 0 : i32
    %10 = arith.cmpi slt, %8, %c0_i32_5 : i32
    %c0_i32_6 = arith.constant 0 : i32
    %11 = arith.cmpi slt, %7, %c0_i32_6 : i32
    %12 = arith.xori %10, %11 : i1
    %13 = arith.andi %12, %9 : i1
    %14 = arith.addi %8, %7 : i32
    %15 = arith.select %13, %14, %8 : i32
    %c1_i32_7 = arith.constant 1 : i32
    %16 = arith.cmpi eq, %15, %c1_i32_7 : i32
    %17 = arith.andi %5, %16 : i1
    %18 = arith.extui %17 : i1 to i32
    %c0_i32_8 = arith.constant 0 : i32
    %19 = arith.cmpi ne, %18, %c0_i32_8 : i32
    scf.if %19 {
      %c0 = arith.constant 0 : index
      %c0_19 = arith.constant 0 : index
      %c0_20 = arith.constant 0 : index
      %39 = vector.load %arg11[%c0, %c0_19, %c0_20] : memref<1x8x512xbf16, #tpu.memory_space<vmem>>, vector<1x8x512xbf16>
      %40 = vector.shape_cast %39 : vector<1x8x512xbf16> to vector<8x512xbf16>
      %c0_21 = arith.constant 0 : index
      %c0_22 = arith.constant 0 : index
      %c0_23 = arith.constant 0 : index
      %c0_24 = arith.constant 0 : index
      %41 = vector.load %arg4[%c0_21, %c0_22, %c0_23, %c0_24] : memref<1x1x512x512xbf16, #tpu.memory_space<vmem>>, vector<1x1x512x512xbf16>
      %42 = vector.shape_cast %41 : vector<1x1x512x512xbf16> to vector<512x512xbf16>
      %cst = arith.constant dense<0.000000e+00> : vector<8x512xf32>
      %43 = tpu.matmul %40, %42, %cst {dimension_numbers = #tpu.dot_dimension_numbers<[1], [0], [0], [1], [0, 0, 1, 1], [], []>} : vector<8x512xbf16>, vector<512x512xbf16>, vector<8x512xf32> -> vector<8x512xf32>
      %c0_25 = arith.constant 0 : index
      %c0_26 = arith.constant 0 : index
      %c0_27 = arith.constant 0 : index
      %44 = vector.load %arg6[%c0_25, %c0_26, %c0_27] : memref<1x1x512xf32, #tpu.memory_space<vmem>>, vector<1x1x512xf32>
      %45 = vector.shape_cast %44 : vector<1x1x512xf32> to vector<1x512xf32>
      %46 = vector.broadcast %45 : vector<1x512xf32> to vector<8x512xf32>
      %47 = arith.addf %43, %46 : vector<8x512xf32>
      %cst_28 = arith.constant 0.000000e+00 : f32
      %48 = vector.broadcast %cst_28 : f32 to vector<8x512xf32>
      %49 = arith.maximumf %47, %48 : vector<8x512xf32>
      %cst_29 = arith.constant dense<0.000000e+00> : vector<512xf32>
      %50 = vector.multi_reduction <add>, %49, %cst_29 [0] : vector<8x512xf32> to vector<512xf32>
      %51 = vector.shape_cast %50 : vector<512xf32> to vector<1x512xf32>
      %cst_30 = arith.constant 8.000000e+00 : f32
      %52 = vector.broadcast %cst_30 : f32 to vector<1x512xf32>
      %53 = arith.divf %51, %52 : vector<1x512xf32>
      %54 = vector.broadcast %53 : vector<1x512xf32> to vector<8x512xf32>
      %55 = arith.subf %49, %54 : vector<8x512xf32>
      %56 = arith.mulf %55, %55 : vector<8x512xf32>
      %cst_31 = arith.constant dense<0.000000e+00> : vector<512xf32>
      %57 = vector.multi_reduction <add>, %56, %cst_31 [0] : vector<8x512xf32> to vector<512xf32>
      %58 = vector.shape_cast %57 : vector<512xf32> to vector<1x512xf32>
      %cst_32 = arith.constant 8.000000e+00 : f32
      %59 = vector.broadcast %cst_32 : f32 to vector<1x512xf32>
      %60 = arith.divf %58, %59 : vector<1x512xf32>
      %c0_33 = arith.constant 0 : index
      %c0_34 = arith.constant 0 : index
      %c0_35 = arith.constant 0 : index
      %61 = vector.load %arg7[%c0_33, %c0_34, %c0_35] : memref<1x1x512xf32, #tpu.memory_space<vmem>>, vector<1x1x512xf32>
      %62 = vector.shape_cast %61 : vector<1x1x512xf32> to vector<1x512xf32>
      %cst_36 = arith.constant 9.99999974E-6 : f32
      %63 = vector.broadcast %cst_36 : f32 to vector<1x512xf32>
      %64 = arith.addf %60, %63 : vector<1x512xf32>
      %65 = math.rsqrt %64 : vector<1x512xf32>
      %66 = arith.mulf %62, %65 : vector<1x512xf32>
      %67 = vector.broadcast %66 : vector<1x512xf32> to vector<8x512xf32>
      %68 = arith.mulf %55, %67 : vector<8x512xf32>
      %c0_37 = arith.constant 0 : index
      %c0_38 = arith.constant 0 : index
      %c0_39 = arith.constant 0 : index
      %69 = vector.load %arg8[%c0_37, %c0_38, %c0_39] : memref<1x1x512xf32, #tpu.memory_space<vmem>>, vector<1x1x512xf32>
      %70 = vector.shape_cast %69 : vector<1x1x512xf32> to vector<1x512xf32>
      %71 = vector.broadcast %70 : vector<1x512xf32> to vector<8x512xf32>
      %72 = arith.addf %68, %71 : vector<8x512xf32>
      %73 = arith.truncf %72 : vector<8x512xf32> to vector<8x512xbf16>
      %74 = arith.index_cast %arg1 : i32 to index
      %c0_40 = arith.constant 0 : index
      %c0_41 = arith.constant 0 : index
      %75 = vector.load %arg12[%74, %c0_40, %c0_41] : memref<1x8x512xbf16, #tpu.memory_space<vmem>>, vector<1x8x512xbf16>
      %76 = vector.shape_cast %75 : vector<1x8x512xbf16> to vector<8x512xbf16>
      %77 = vector.shape_cast %73 : vector<8x512xbf16> to vector<1x8x512xbf16>
      tpu.vector_store %arg12[%74, %c0_40, %c0_41], %77 {strides = array<i32>} : memref<1x8x512xbf16, #tpu.memory_space<vmem>>, vector<1x8x512xbf16>,
    } else {
    }
    %c2_i32_9 = arith.constant 2 : i32
    %c0_i32_10 = arith.constant 0 : i32
    %20 = arith.cmpi eq, %c2_i32_9, %c0_i32_10 : i32
    %c1_i32_11 = arith.constant 1 : i32
    %21 = arith.select %20, %c1_i32_11, %c2_i32_9 : i32
    %22 = arith.remsi %arg0, %21 : i32
    %c0_i32_12 = arith.constant 0 : i32
    %23 = arith.cmpi ne, %22, %c0_i32_12 : i32
    %c0_i32_13 = arith.constant 0 : i32
    %24 = arith.cmpi slt, %22, %c0_i32_13 : i32
    %c0_i32_14 = arith.constant 0 : i32
    %25 = arith.cmpi slt, %21, %c0_i32_14 : i32
    %26 = arith.xori %24, %25 : i1
    %27 = arith.andi %26, %23 : i1
    %28 = arith.addi %22, %21 : i32
    %29 = arith.select %27, %28, %22 : i32
    %c0_i32_15 = arith.constant 0 : i32
    %30 = arith.cmpi eq, %29, %c0_i32_15 : i32
    %31 = arith.andi %5, %30 : i1
    %32 = arith.extui %31 : i1 to i32
    %c0_i32_16 = arith.constant 0 : i32
    %33 = arith.cmpi ne, %32, %c0_i32_16 : i32
    scf.if %33 {
      %c0 = arith.constant 0 : index
      %c0_19 = arith.constant 0 : index
      %c0_20 = arith.constant 0 : index
      %39 = vector.load %arg12[%c0, %c0_19, %c0_20] : memref<1x8x512xbf16, #tpu.memory_space<vmem>>, vector<1x8x512xbf16>
      %40 = vector.shape_cast %39 : vector<1x8x512xbf16> to vector<8x512xbf16>
      %c0_21 = arith.constant 0 : index
      %c0_22 = arith.constant 0 : index
      %c0_23 = arith.constant 0 : index
      %c0_24 = arith.constant 0 : index
      %41 = vector.load %arg4[%c0_21, %c0_22, %c0_23, %c0_24] : memref<1x1x512x512xbf16, #tpu.memory_space<vmem>>, vector<1x1x512x512xbf16>
      %42 = vector.shape_cast %41 : vector<1x1x512x512xbf16> to vector<512x512xbf16>
      %cst = arith.constant dense<0.000000e+00> : vector<8x512xf32>
      %43 = tpu.matmul %40, %42, %cst {dimension_numbers = #tpu.dot_dimension_numbers<[1], [0], [0], [1], [0, 0, 1, 1], [], []>} : vector<8x512xbf16>, vector<512x512xbf16>, vector<8x512xf32> -> vector<8x512xf32>
      %c0_25 = arith.constant 0 : index
      %c0_26 = arith.constant 0 : index
      %c0_27 = arith.constant 0 : index
      %44 = vector.load %arg6[%c0_25, %c0_26, %c0_27] : memref<1x1x512xf32, #tpu.memory_space<vmem>>, vector<1x1x512xf32>
      %45 = vector.shape_cast %44 : vector<1x1x512xf32> to vector<1x512xf32>
      %46 = vector.broadcast %45 : vector<1x512xf32> to vector<8x512xf32>
      %47 = arith.addf %43, %46 : vector<8x512xf32>
      %cst_28 = arith.constant 0.000000e+00 : f32
      %48 = vector.broadcast %cst_28 : f32 to vector<8x512xf32>
      %49 = arith.maximumf %47, %48 : vector<8x512xf32>
      %cst_29 = arith.constant dense<0.000000e+00> : vector<512xf32>
      %50 = vector.multi_reduction <add>, %49, %cst_29 [0] : vector<8x512xf32> to vector<512xf32>
      %51 = vector.shape_cast %50 : vector<512xf32> to vector<1x512xf32>
      %cst_30 = arith.constant 8.000000e+00 : f32
      %52 = vector.broadcast %cst_30 : f32 to vector<1x512xf32>
      %53 = arith.divf %51, %52 : vector<1x512xf32>
      %54 = vector.broadcast %53 : vector<1x512xf32> to vector<8x512xf32>
      %55 = arith.subf %49, %54 : vector<8x512xf32>
      %56 = arith.mulf %55, %55 : vector<8x512xf32>
      %cst_31 = arith.constant dense<0.000000e+00> : vector<512xf32>
      %57 = vector.multi_reduction <add>, %56, %cst_31 [0] : vector<8x512xf32> to vector<512xf32>
      %58 = vector.shape_cast %57 : vector<512xf32> to vector<1x512xf32>
      %cst_32 = arith.constant 8.000000e+00 : f32
      %59 = vector.broadcast %cst_32 : f32 to vector<1x512xf32>
      %60 = arith.divf %58, %59 : vector<1x512xf32>
      %c0_33 = arith.constant 0 : index
      %c0_34 = arith.constant 0 : index
      %c0_35 = arith.constant 0 : index
      %61 = vector.load %arg7[%c0_33, %c0_34, %c0_35] : memref<1x1x512xf32, #tpu.memory_space<vmem>>, vector<1x1x512xf32>
      %62 = vector.shape_cast %61 : vector<1x1x512xf32> to vector<1x512xf32>
      %cst_36 = arith.constant 9.99999974E-6 : f32
      %63 = vector.broadcast %cst_36 : f32 to vector<1x512xf32>
      %64 = arith.addf %60, %63 : vector<1x512xf32>
      %65 = math.rsqrt %64 : vector<1x512xf32>
      %66 = arith.mulf %62, %65 : vector<1x512xf32>
      %67 = vector.broadcast %66 : vector<1x512xf32> to vector<8x512xf32>
      %68 = arith.mulf %55, %67 : vector<8x512xf32>
      %c0_37 = arith.constant 0 : index
      %c0_38 = arith.constant 0 : index
      %c0_39 = arith.constant 0 : index
      %69 = vector.load %arg8[%c0_37, %c0_38, %c0_39] : memref<1x1x512xf32, #tpu.memory_space<vmem>>, vector<1x1x512xf32>
      %70 = vector.shape_cast %69 : vector<1x1x512xf32> to vector<1x512xf32>
      %71 = vector.broadcast %70 : vector<1x512xf32> to vector<8x512xf32>
      %72 = arith.addf %68, %71 : vector<8x512xf32>
      %73 = arith.truncf %72 : vector<8x512xf32> to vector<8x512xbf16>
      %74 = arith.index_cast %arg1 : i32 to index
      %c0_40 = arith.constant 0 : index
      %c0_41 = arith.constant 0 : index
      %75 = vector.load %arg11[%74, %c0_40, %c0_41] : memref<1x8x512xbf16, #tpu.memory_space<vmem>>, vector<1x8x512xbf16>
      %76 = vector.shape_cast %75 : vector<1x8x512xbf16> to vector<8x512xbf16>
      %77 = vector.shape_cast %73 : vector<8x512xbf16> to vector<1x8x512xbf16>
      tpu.vector_store %arg11[%74, %c0_40, %c0_41], %77 {strides = array<i32>} : memref<1x8x512xbf16, #tpu.memory_space<vmem>>, vector<1x8x512xbf16>,
    } else {
    }
    %c3_i32 = arith.constant 3 : i32
    %34 = arith.cmpi eq, %arg0, %c3_i32 : i32
    %c0_i32_17 = arith.constant 0 : i32
    %35 = arith.cmpi eq, %arg1, %c0_i32_17 : i32
    %36 = arith.andi %34, %35 : i1
    %37 = arith.extui %36 : i1 to i32
    %c0_i32_18 = arith.constant 0 : i32
    %38 = arith.cmpi ne, %37, %c0_i32_18 : i32
    scf.if %38 {
      %c0 = arith.constant 0 : index
      %c0_19 = arith.constant 0 : index
      %c0_20 = arith.constant 0 : index
      %39 = vector.load %arg11[%c0, %c0_19, %c0_20] : memref<1x8x512xbf16, #tpu.memory_space<vmem>>, vector<1x8x512xbf16>
      %40 = vector.shape_cast %39 : vector<1x8x512xbf16> to vector<8x512xbf16>
      %c0_21 = arith.constant 0 : index
      %c0_22 = arith.constant 0 : index
      %c0_23 = arith.constant 0 : index
      %41 = vector.load %arg5[%c0_21, %c0_22, %c0_23] : memref<1x512x128xbf16, #tpu.memory_space<vmem>>, vector<1x512x128xbf16>
      %42 = vector.shape_cast %41 : vector<1x512x128xbf16> to vector<512x128xbf16>
      %cst = arith.constant dense<0.000000e+00> : vector<8x128xf32>
      %43 = tpu.matmul %40, %42, %cst {dimension_numbers = #tpu.dot_dimension_numbers<[1], [0], [0], [1], [0, 0, 1, 1], [], []>} : vector<8x512xbf16>, vector<512x128xbf16>, vector<8x128xf32> -> vector<8x128xf32>
      %c0_24 = arith.constant 0 : index
      %c0_25 = arith.constant 0 : index
      %44 = vector.load %arg9[%c0_24, %c0_25] : memref<1x128xf32, #tpu.memory_space<vmem>>, vector<1x128xf32>
      %45 = vector.broadcast %44 : vector<1x128xf32> to vector<8x128xf32>
      %46 = arith.addf %43, %45 : vector<8x128xf32>
      %c0_26 = arith.constant 0 : index
      %c0_27 = arith.constant 0 : index
      %47 = vector.load %arg10[%c0_26, %c0_27] : memref<8x128xf32, #tpu.memory_space<vmem>>, vector<8x128xf32>
      tpu.vector_store %arg10[%c0_26, %c0_27], %46 {strides = array<i32>} : memref<8x128xf32, #tpu.memory_space<vmem>>, vector<8x128xf32>,
    } else {
    }
    return
  }
  func.func @transform_0(%arg0: i32, %arg1: i32) -> (i32, i32) {
    %c0_i32 = arith.constant 0 : i32
    %c0_i32_0 = arith.constant 0 : i32
    %c0_i32_1 = arith.constant 0 : i32
    return %c0_i32, %c0_i32_0 : i32, i32
  }
  func.func @transform_1(%arg0: i32, %arg1: i32) -> (i32, i32, i32) {
    %c0_i32 = arith.constant 0 : i32
    %0 = arith.cmpi eq, %arg0, %c0_i32 : i32
    %c0_i32_0 = arith.constant 0 : i32
    %1 = arith.select %0, %arg1, %c0_i32_0 : i32
    %c0_i32_1 = arith.constant 0 : i32
    %c0_i32_2 = arith.constant 0 : i32
    %c0_i32_3 = arith.constant 0 : i32
    return %1, %c0_i32_1, %c0_i32_2 : i32, i32, i32
  }
  func.func @transform_2(%arg0: i32, %arg1: i32) -> (i32, i32, i32, i32) {
    %c1_i32 = arith.constant 1 : i32
    %0 = arith.subi %arg0, %c1_i32 : i32
    %c0_i32 = arith.constant 0 : i32
    %c1_i32_0 = arith.constant 1 : i32
    %1 = arith.maxsi %c0_i32, %0 : i32
    %2 = arith.minsi %c1_i32_0, %1 : i32
    %c0_i32_1 = arith.constant 0 : i32
    %3 = arith.cmpi eq, %arg0, %c0_i32_1 : i32
    %c2_i32 = arith.constant 2 : i32
    %4 = arith.cmpi sgt, %arg0, %c2_i32 : i32
    %c0_i32_2 = arith.constant 0 : i32
    %5 = arith.select %4, %c0_i32_2, %arg1 : i32
    %c0_i32_3 = arith.constant 0 : i32
    %6 = arith.select %3, %c0_i32_3, %5 : i32
    %c0_i32_4 = arith.constant 0 : i32
    %c0_i32_5 = arith.constant 0 : i32
    %c0_i32_6 = arith.constant 0 : i32
    return %2, %6, %c0_i32_4, %c0_i32_5 : i32, i32, i32, i32
  }
  func.func @transform_3(%arg0: i32, %arg1: i32) -> (i32, i32, i32) {
    %c0_i32 = arith.constant 0 : i32
    %c0_i32_0 = arith.constant 0 : i32
    %c0_i32_1 = arith.constant 0 : i32
    %c0_i32_2 = arith.constant 0 : i32
    return %c0_i32, %c0_i32_0, %c0_i32_1 : i32, i32, i32
  }
  func.func @transform_4(%arg0: i32, %arg1: i32) -> (i32, i32, i32) {
    %c2_i32 = arith.constant 2 : i32
    %0 = arith.minsi %arg0, %c2_i32 : i32
    %c3_i32 = arith.constant 3 : i32
    %1 = arith.cmpi slt, %arg0, %c3_i32 : i32
    %c0_i32 = arith.constant 0 : i32
    %2 = arith.select %1, %arg1, %c0_i32 : i32
    %c0_i32_0 = arith.constant 0 : i32
    %c0_i32_1 = arith.constant 0 : i32
    return %0, %c0_i32_0, %2 : i32, i32, i32
  }
  func.func @transform_5(%arg0: i32, %arg1: i32) -> (i32, i32, i32) {
    %c2_i32 = arith.constant 2 : i32
    %0 = arith.minsi %arg0, %c2_i32 : i32
    %c3_i32 = arith.constant 3 : i32
    %1 = arith.cmpi slt, %arg0, %c3_i32 : i32
    %c0_i32 = arith.constant 0 : i32
    %2 = arith.select %1, %arg1, %c0_i32 : i32
    %c0_i32_0 = arith.constant 0 : i32
    %c0_i32_1 = arith.constant 0 : i32
    return %0, %c0_i32_0, %2 : i32, i32, i32
  }
  func.func @transform_6(%arg0: i32, %arg1: i32) -> (i32, i32, i32) {
    %c2_i32 = arith.constant 2 : i32
    %0 = arith.minsi %arg0, %c2_i32 : i32
    %c3_i32 = arith.constant 3 : i32
    %1 = arith.cmpi slt, %arg0, %c3_i32 : i32
    %c0_i32 = arith.constant 0 : i32
    %2 = arith.select %1, %arg1, %c0_i32 : i32
    %c0_i32_0 = arith.constant 0 : i32
    %c0_i32_1 = arith.constant 0 : i32
    return %0, %c0_i32_0, %2 : i32, i32, i32
  }
  func.func @transform_7(%arg0: i32, %arg1: i32) -> (i32, i32) {
    %c0_i32 = arith.constant 0 : i32
    %c0_i32_0 = arith.constant 0 : i32
    %c0_i32_1 = arith.constant 0 : i32
    return %c0_i32, %c0_i32_0 : i32, i32
  }
  func.func @transform_8(%arg0: i32, %arg1: i32) -> (i32, i32) {
    %c0_i32 = arith.constant 0 : i32
    %c0_i32_0 = arith.constant 0 : i32
    %c0_i32_1 = arith.constant 0 : i32
    return %c0_i32, %c0_i32_0 : i32, i32
  }
}

</mosaic_0001>

<bundles_post_ra>
// kernel: model_v1_forward.1
= control target key start
LH: loop header
LB: loop body
LE: loop exit
PB: predicated region body
PF: predicated region fallthrough
CT: control target
= control target key end

     0   :  { %s8111_s0 = inlined_call_operand.vmem [shape: bf16[8,384], index: 0, kind: input, shape index: {}]   ;;  %s8112_s1 = inlined_call_operand.vmem [shape: bf16[1,384,512], index: 1, kind: input, shape index: {}]   ;;  %s8113_s2 = inlined_call_operand.hbm [shape: bf16[2,1,512,512], index: 2, kind: input, shape index: {}]   ;;  %s8114_s3 = inlined_call_operand.vmem [shape: bf16[1,512,128], index: 3, kind: input, shape index: {}]   ;;  %s8115_s4 = inlined_call_operand.vmem [shape: f32[3,1,512], index: 4, kind: input, shape index: {}]   ;;  %s8116_s5 = inlined_call_operand.vmem [shape: f32[3,1,512], index: 5, kind: input, shape index: {}]   ;;  %s8117_s6 = inlined_call_operand.vmem [shape: f32[3,1,512], index: 6, kind: input, shape index: {}]   ;;  %s8118_s7 = inlined_call_operand.vmem [shape: f32[1,128], index: 7, kind: input, shape index: {}]   ;;  %s8119_s8 = inlined_call_operand.hbm [shape: f32[8,128], index: 8, kind: output, shape index: {}]  }
   0x1   :  { %8121 = sst [smem:[#allocation10_spill]] %s8113_s2 }
   0x2   :  { %13 = vsyncpa [#allocation5], 0 }
   0x3   :  { %15 = vsyncpa [#allocation5 + $0x1], 0 }
   0x4   :  { %16 = vsyncpa [#allocation6], 0  ;;  %s6587_s27 = smov 0   ;;  %s6589_s28 = smov 0  }
   0x5   :  { %s6591_s29 = smov 0   ;;  %s6593_s30 = smov 0  }
   0x6   :  { %s6595_s9 = smov 0   ;;  %s6597_s10 = smov 0  }
   0x7 LB: > { %s8120_s11 = sadd.s32 4294967295, %s6534_s10   ;;  %s34_s12 = sadd.s32 1, %s6530_s9  ;;  %s6534_s10 = sphi %s6597_s10, %s22_s10   ;;  %s6530_s9 = sphi %s6595_s9, %s8132_s9   ;;  %s6526_s30 = sphi %s6593_s30, %s8131_s30   ;;  %s6522_s29 = sphi %s6591_s29, %s8130_s29   ;;  %s6518_s28 = sphi %s6589_s28, %s8129_s28   ;;  %s6514_s27 = sphi %s6587_s27, %s8128_s27  }
   0x8   : > { %p36_p0 = scmp.ge.s32.totalorder %s34_s12, 4  ;;  %s4349_s13 = sadd.s32 4294967295, %s6530_s9 }
   0x9   : > { %p90_p1 = scmp.gt.s32.totalorder %s4349_s13, 0  ;;  %p4350_p2 = scmp.lt.s32.totalorder %s4349_s13, 1 }
   0xa   : > { %s8134_s12 = smov (%p36_p0, %s34_s12), 0  ;;  %s112_s15 = sadd.s32 1, %s6522_s29 }
   0xb   : > { %s8136_s13 = smov (!%p90_p1, %s4349_s13), 0  ;;  %s4355_s14 = sadd.s32 4294967295, %s8134_s12 }
   0xc   : > { %s8138_s13 = smov (!%p4350_p2, %s8136_s13), 1  ;;  %p99_p3 = scmp.gt.s32.totalorder %s4355_s14, 0 }
   0xd   : > { %p4356_p4 = scmp.lt.s32.totalorder %s4355_s14, 1  ;;  %p119_p5 = scmp.ne.s32.totalorder %s6522_s29, %s6518_s28 }
   0xe   : > { %p120_p6 = scmp.eq.s32.totalorder %s6534_s10, 0  ;;  %s8140_s14 = smov (!%p99_p3, %s4355_s14), 0 }
   0xf   : > { %p125_p8 = scmp.ne.s32.totalorder %s6518_s28, %s6514_s27  ;;  %s8142_s14 = smov (!%p4356_p4, %s8140_s14), 1 }
  0x10   : > { %p6625_p7 = por %p120_p6, %p119_p5  ;;  %p126_p9 = scmp.eq.s32.totalorder %s8120_s11, 0 }
  0x11   : > { %s107_s17 = ssub.s32 %s8138_s13, %s8142_s14  ;;  %p6334_p10 = scmp.lt.s32.totalorder %s6534_s10, 4 }
  0x12   : > { %p110_p11 = scmp.eq.s32.totalorder %s107_s17, 0  ;;  %p6633_p12 = por %p126_p9, %p125_p8 }
  0x13   : > { %s341_s19 = sand.u32 1, %s6522_s29   ;;  %s5938_s20 = sshll.u32 %s8138_s13, 10 }
  0x14   : > { %s6639_s21 = scalar_select %p110_p11, %s6522_s29, %s112_s15  }
  0x15   : > { %s4364_s22 = sshll.u32 %s341_s19, 10  ;;  %s8124_s2 = sld [smem:[#allocation10_spill]] }
  0x16   : > { %s345_s27 = scalar_lea.vmem [#allocation4], %s4364_s22  ;;  %p6648_p13 = pnand %p6334_p10, %p6625_p7 }
  0x17   : > { %s364_s11 = sshll.u32 %s345_s27, 4  ;;  %p4373_p0 = scmp.ge.s32.totalorder %s6534_s10, 1  ;;  %s365_s11 = int_to_ptr.vmem [resolvable:$true] %s364_s11 }
  0x18   : > { %p432_p1 = scmp.lt.s32.totalorder %s6534_s10, 5  ;;  %s342_s13 = scalar_lea.sflag [#allocation5], %s341_s19 }
  0x19   : > { %p6426_p3 = pneg %p6648_p13 }
  0x1b   : > { %s361_s25 = scalar_lea.hbm %s8124_s2, %s5938_s20  ;;  %s6429_s16 = scalar_lea.hbm %s8124_s2, 2048 }
  0x1c   : > { %s362_s26 = sshll.u32 %s361_s25, 4  ;;  %s363_s26 = int_to_ptr.hbm [resolvable:$true] %s362_s26 }
  0x1d   : > { %s6422_s15 = sshra.s32 %s363_s26, 4  ;;  %s6423_s15 = int_to_ptr.hbm [resolvable:$true] %s6422_s15 }
  0x1e   : > { %s6424_s17 = scalar_lea.hbm %s6423_s15, 1024 }
  0x1f   : > { %p6425_p2 = scmp.ne.s32.totalorder %s6423_s15, %s6424_s17  ;;  %p6431_p6 = scmp.lt.s32.totalorder %s6429_s16, %s6424_s17 }
  0x21   : > { %p6427_p4 = pnand %p6426_p3, %p6425_p2 }
  0x23   : > { %p6428_p5 = pneg %p6427_p4 }
  0x25   : > { %p6433_p7 = pnand %p6431_p6, %p6428_p5 }
  0x27   : > { %6436 = shalt.err (!%p6433_p7)
}
  0x28   : > { %s6536_s23 = smov 256   ;;  %s6537_s19 = smov 16  }
  0x29   : > { %6333 = dma.hbm_to_vmem [thread:$0]  (!%p6648_p13), %s363_s26, 16384, %s365_s11, %s342_s13, %s6536_s23, %s6536_s23, %s6537_s19  }
  0x2a   : > { %p433_p8 = pnand %p4373_p0, %p432_p1 }
  0x2b   : > { %s438_s24 = sand.u32 (!%p433_p8), 1, %s6518_s28  }
  0x2c   : > { %436 = sbr.rel (%p433_p8) target bundleno = 1249 (0x4e1), region = 52  ;;  %s4374_s25 = sshll.u32 (!%p433_p8), %s438_s24, 10 }
  0x2d   : > { %s439_s27 = scalar_lea.sflag (!%p433_p8), [#allocation5], %s438_s24  ;;  %s6666_s15 = scalar_lea.vmem (!%p433_p8), [#allocation4], %s4374_s25 }
  0x31   : > { %6505 = dma.done.wait (%p6633_p12), %s439_s27, 16384  }
  0x32   : > { %6507 = vsyncadd (%p6633_p12), %s439_s27, 4294950912  ;;  %p532_p9 = scmp.lt.s32.totalorder %s6526_s30, 2  ;;  %p4387_p10 = scmp.ne.s32.totalorder %s6526_s30, 0 }
  0x34   : > { %s533_s11 = scalar_select %p532_p9, %s6526_s30, 2 }
  0x35   : > { %586 = sbr.rel (%p4387_p10) target bundleno = 364 (0x16c), region = 60 }
  0x36   : > { %s8144_s11 = smov (!%p532_p9, %s533_s11), 2 }
  0x37   : > { %s4378_s26 = sshll.u32 %s8144_s11, 2 }
  0x38   : > { %s6677_s17 = scalar_lea.vmem %s8115_s4, %s4378_s26  ;;  %s6682_s16 = scalar_lea.vmem %s8116_s5, %s4378_s26 }
  0x39   : > { %s6687_s18 = scalar_lea.vmem %s8117_s6, %s4378_s26 }
  0x3a   : > { %v4502_v0 = vld [vmem:[%s8112_s1 + $0xe0] sm:$0xf]  ;;  %v5969_v1 = vld [vmem:[%s8112_s1 + $0xec] sm:$0xf0]  ;;  %v5967_v9 = vld [vmem:[%s8112_s1 + $0xe4] sm:$0xf] }
  0x3b   : > { %v4630_v2 = vld [vmem:[%s8112_s1 + $0x1e0] sm:$0xf]  ;;  %v4503_v3 = vor.u32 %v5969_v1, %v4502_v0  ;;  %v6001_v4 = vld [vmem:[%s8112_s1 + $0x1ec] sm:$0xf0]  ;;  %v4504_v10 = vld [vmem:[%s8112_s1 + $0xf0] sm:$0xf0] }
  0x3c   : > { %v4758_v5 = vld [vmem:[%s8112_s1 + $0x2e0] sm:$0xf]  ;;  %v6033_v6 = vld [vmem:[%s8112_s1 + $0x2ec] sm:$0xf0]  ;;  %v4631_v7 = vor.u32 %v6001_v4, %v4630_v2  ;;  %v4507_v12 = vor.u32 %v5967_v9, %v4504_v10  ;;  %v5963_v20 = vld [vmem:[%s8112_s1 + $0xc4] sm:$0xf] }
  0x3d   : > { %v4759_v8 = vor.u32 %v6033_v6, %v4758_v5  ;;  %v4486_v11 = vld [vmem:[%s8112_s1 + $0xc0] sm:$0xf]  ;;  %1186 = vmatpush.bf16.msra.mxu0 %v4503_v3  ;;  %v5965_v13 = vld [vmem:[%s8112_s1 + $0xcc] sm:$0xf0]  ;;  %v4488_v22 = vld [vmem:[%s8112_s1 + $0xd0] sm:$0xf0] }
  0x3e   : > { %v4614_v14 = vld [vmem:[%s8112_s1 + $0x1c0] sm:$0xf]  ;;  %v5997_v15 = vld [vmem:[%s8112_s1 + $0x1cc] sm:$0xf0]  ;;  %1199 = vmatpush.bf16.msra.mxu1 %v4631_v7  ;;  %v4487_v16 = vor.u32 %v5965_v13, %v4486_v11  ;;  %1225 = vmatpush.bf16.msra.mxu3 %v4507_v12  ;;  %v4491_v25 = vor.u32 %v5963_v20, %v4488_v22  ;;  %v5959_v31 = vld [vmem:[%s8112_s1 + $0xa4] sm:$0xf] }
  0x3f   : > { %1212 = vmatpush.bf16.msra.mxu2 %v4759_v8  ;;  %v4615_v17 = vor.u32 %v5997_v15, %v4614_v14  ;;  %v4742_v18 = vld [vmem:[%s8112_s1 + $0x2c0] sm:$0xf]  ;;  %v6029_v19 = vld [vmem:[%s8112_s1 + $0x2cc] sm:$0xf0]  ;;  %v4472_v32 = vld [vmem:[%s8112_s1 + $0xb0] sm:$0xf0] }
  0x40   : > { %v4743_v21 = vor.u32 %v6029_v19, %v4742_v18  ;;  %v4470_v23 = vld [vmem:[%s8112_s1 + $0xa0] sm:$0xf]  ;;  %v5961_v24 = vld [vmem:[%s8112_s1 + $0xac] sm:$0xf0]  ;;  %v4475_v38 = vor.u32 %v5959_v31, %v4472_v32  ;;  %v5955_v42 = vld [vmem:[%s8112_s1 + $0x84] sm:$0xf] }
  0x41   : > { %v4598_v26 = vld [vmem:[%s8112_s1 + $0x1a0] sm:$0xf]  ;;  %v5993_v27 = vld [vmem:[%s8112_s1 + $0x1ac] sm:$0xf0]  ;;  %1187 = vmatpush.bf16.msra.mxu0 %v4487_v16  ;;  %v4471_v29 = vor.u32 %v5961_v24, %v4470_v23  ;;  %v4456_v43 = vld [vmem:[%s8112_s1 + $0x90] sm:$0xf0] }
  0x42   : > { %v4726_v28 = vld [vmem:[%s8112_s1 + $0x2a0] sm:$0xf]  ;;  %v6025_v30 = vld [vmem:[%s8112_s1 + $0x2ac] sm:$0xf0]  ;;  %1200 = vmatpush.bf16.msra.mxu1 %v4615_v17  ;;  %v4599_v33 = vor.u32 %v5993_v27, %v4598_v26  ;;  %1226 = vmatpush.bf16.msra.mxu3 %v4491_v25  ;;  %v4459_v50 = vor.u32 %v5955_v42, %v4456_v43  ;;  %v5951_v54 = vld [vmem:[%s8112_s1 + $0x64] sm:$0xf] }
  0x43   : > { %1213 = vmatpush.bf16.msra.mxu2 %v4743_v21  ;;  %v4727_v34 = vor.u32 %v6025_v30, %v4726_v28  ;;  %v4454_v35 = vld [vmem:[%s8112_s1 + $0x80] sm:$0xf]  ;;  %v5957_v36 = vld [vmem:[%s8112_s1 + $0x8c] sm:$0xf0]  ;;  %v4440_v55 = vld [vmem:[%s8112_s1 + $0x70] sm:$0xf0] }
  0x44   : > { %v4582_v37 = vld [vmem:[%s8112_s1 + $0x180] sm:$0xf]  ;;  %v5989_v39 = vld [vmem:[%s8112_s1 + $0x18c] sm:$0xf0]  ;;  %v4455_v44 = vor.u32 %v5957_v36, %v4454_v35  ;;  %v4443_v62 = vor.u32 %v5951_v54, %v4440_v55  ;;  %v5947_v2 = vld [vmem:[%s8112_s1 + $0x44] sm:$0xf] }
  0x45   : > { %v4710_v40 = vld [vmem:[%s8112_s1 + $0x280] sm:$0xf]  ;;  %v6021_v41 = vld [vmem:[%s8112_s1 + $0x28c] sm:$0xf0]  ;;  %1188 = vmatpush.bf16.msra.mxu0 %v4471_v29  ;;  %v4583_v45 = vor.u32 %v5989_v39, %v4582_v37  ;;  %v4424_v3 = vld [vmem:[%s8112_s1 + $0x50] sm:$0xf0] }
  0x46   : > { %1201 = vmatpush.bf16.msra.mxu1 %v4599_v33  ;;  %v4711_v46 = vor.u32 %v6021_v41, %v4710_v40  ;;  %v4438_v47 = vld [vmem:[%s8112_s1 + $0x60] sm:$0xf]  ;;  %v5953_v48 = vld [vmem:[%s8112_s1 + $0x6c] sm:$0xf0]  ;;  %1227 = vmatpush.bf16.msra.mxu3 %v4475_v38  ;;  %v4427_v10 = vor.u32 %v5947_v2, %v4424_v3  ;;  %v5943_v14 = vld [vmem:[%s8112_s1 + $0x24] sm:$0xf] }
  0x47   : > { %1214 = vmatpush.bf16.msra.mxu2 %v4727_v34  ;;  %v4566_v49 = vld [vmem:[%s8112_s1 + $0x160] sm:$0xf]  ;;  %v5985_v51 = vld [vmem:[%s8112_s1 + $0x16c] sm:$0xf0]  ;;  %v4439_v56 = vor.u32 %v5953_v48, %v4438_v47  ;;  %v4408_v15 = vld [vmem:[%s8112_s1 + $0x30] sm:$0xf0] }
  0x48   : > { %v4694_v52 = vld [vmem:[%s8112_s1 + $0x260] sm:$0xf]  ;;  %v6017_v53 = vld [vmem:[%s8112_s1 + $0x26c] sm:$0xf0]  ;;  %v4567_v57 = vor.u32 %v5985_v51, %v4566_v49  ;;  %v588_v25 = vld [vmem:[%s8111_s0 + $0x8] sm:$0xf]  ;;  %v4411_v26 = vor.u32 %v5943_v14, %v4408_v15 }
  0x49   : > { %1189 = vmatpush.bf16.msra.mxu0 %v4455_v44  ;;  %v4695_v58 = vor.u32 %v6017_v53, %v4694_v52  ;;  %v4422_v59 = vld [vmem:[%s8112_s1 + $0x40] sm:$0xf]  ;;  %v5949_v60 = vld [vmem:[%s8112_s1 + $0x4c] sm:$0xf0]  ;;  %v5939_v27 = vld [vmem:[%s8112_s1 + $0x4] sm:$0xf]  ;;  %v699_v37 = vunpack.c.l.b16 %v588_v25 }
  0x4a   : > { %1202 = vmatpush.bf16.msra.mxu1 %v4583_v45  ;;  %v4550_v61 = vld [vmem:[%s8112_s1 + $0x140] sm:$0xf]  ;;  %1228 = vmatpush.bf16.msra.mxu3 %v4459_v50  ;;  %v5981_v63 = vld [vmem:[%s8112_s1 + $0x14c] sm:$0xf0]  ;;  %v4423_v4 = vor.u32 %v5949_v60, %v4422_v59  ;;  %v4392_v28 = vld [vmem:[%s8112_s1 + $0x10] sm:$0xf0] }
  0x4b   : > { %1215 = vmatpush.bf16.msra.mxu2 %v4711_v46  ;;  %v4678_v0 = vld [vmem:[%s8112_s1 + $0x240] sm:$0xf]  ;;  %v6013_v1 = vld [vmem:[%s8112_s1 + $0x24c] sm:$0xf0]  ;;  %v4551_v5 = vor.u32 %v5981_v63, %v4550_v61  ;;  %v5999_v30 = vld [vmem:[%s8112_s1 + $0x1e4] sm:$0xf]  ;;  %v4395_v44 = vor.u32 %v5939_v27, %v4392_v28  ;;  %v6921_v52 = vpack.c.b16 %v699_v37, %v699_v37 }
  0x4c   : > { %v4679_v6 = vor.u32 %v6013_v1, %v4678_v0  ;;  %v4406_v7 = vld [vmem:[%s8112_s1 + $0x20] sm:$0xf]  ;;  %v5945_v8 = vld [vmem:[%s8112_s1 + $0x2c] sm:$0xf0]  ;;  %v4632_v31 = vld [vmem:[%s8112_s1 + $0x1f0] sm:$0xf0] }
  0x4d   : > { %1190 = vmatpush.bf16.msra.mxu0 %v4439_v56  ;;  %v4534_v9 = vld [vmem:[%s8112_s1 + $0x120] sm:$0xf]  ;;  %v5977_v11 = vld [vmem:[%s8112_s1 + $0x12c] sm:$0xf0]  ;;  %v4407_v17 = vor.u32 %v5945_v8, %v4406_v7  ;;  %v6031_v32 = vld [vmem:[%s8112_s1 + $0x2e4] sm:$0xf]  ;;  %v4635_v45 = vor.u32 %v5999_v30, %v4632_v31 }
  0x4e   : > { %1203 = vmatpush.bf16.msra.mxu1 %v4567_v57  ;;  %1229 = vmatpush.bf16.msra.mxu3 %v4443_v62  ;;  %v4662_v12 = vld [vmem:[%s8112_s1 + $0x220] sm:$0xf]  ;;  %v6009_v13 = vld [vmem:[%s8112_s1 + $0x22c] sm:$0xf0]  ;;  %v4535_v21 = vor.u32 %v5977_v11, %v4534_v9  ;;  %v4760_v34 = vld [vmem:[%s8112_s1 + $0x2f0] sm:$0xf0] }
  0x4f   : > { %1216 = vmatpush.bf16.msra.mxu2 %v4695_v58  ;;  %v4390_v16 = vld [vmem:[%s8112_s1] sm:$0xf]  ;;  %v5941_v18 = vld [vmem:[%s8112_s1 + $0xc] sm:$0xf0]  ;;  %v4663_v22 = vor.u32 %v6009_v13, %v4662_v12  ;;  %v4510_v35 = vld [vmem:[%s8112_s1 + $0xe8] sm:$0xf]  ;;  %v4763_v46 = vor.u32 %v6031_v32, %v4760_v34 }
  0x50   : > { %v4518_v19 = vld [vmem:[%s8112_s1 + $0x100] sm:$0xf]  ;;  %v5973_v20 = vld [vmem:[%s8112_s1 + $0x10c] sm:$0xf0]  ;;  %v4391_v33 = vor.u32 %v5941_v18, %v4390_v16  ;;  %v5970_v36 = vld [vmem:[%s8112_s1 + $0xf4] sm:$0xf0] }
  0x51   : > { %1191 = vmatpush.bf16.msra.mxu0 %v4423_v4  ;;  %v4646_v23 = vld [vmem:[%s8112_s1 + $0x200] sm:$0xf]  ;;  %v6005_v24 = vld [vmem:[%s8112_s1 + $0x20c] sm:$0xf0]  ;;  %v4519_v38 = vor.u32 %v5973_v20, %v4518_v19  ;;  %v4638_v40 = vld [vmem:[%s8112_s1 + $0x1e8] sm:$0xf]  ;;  %v4511_v47 = vor.u32 %v5970_v36, %v4510_v35 }
  0x52   : > { %1204 = vmatpush.bf16.msra.mxu1 %v4551_v5  ;;  %1230 = vmatpush.bf16.msra.mxu3 %v4427_v10  ;;  %v587_v29 = vld [vmem:[%s8111_s0] sm:$0xff]  ;;  %v4647_v39 = vor.u32 %v6005_v24, %v4646_v23  ;;  %v6002_v41 = vld [vmem:[%s8112_s1 + $0x1f4] sm:$0xf0]  ;;  %v4616_v49 = vld [vmem:[%s8112_s1 + $0x1d0] sm:$0xf0]  ;;  %vm1469_vm12 = vcmask 1040384  }
  0x53   : > { %1217 = vmatpush.bf16.msra.mxu2 %v4679_v6  ;;  %v697_v42 = vunpack.c.l.b16 %v587_v29  ;;  %v698_v43 = vunpack.c.h.b16 %v587_v29  ;;  %v5995_v48 = vld [vmem:[%s8112_s1 + $0x1c4] sm:$0xf]  ;;  %v4639_v51 = vor.u32 %v6002_v41, %v4638_v40  ;;  %v4744_v53 = vld [vmem:[%s8112_s1 + $0x2d0] sm:$0xf0]  ;;  %v4494_v54 = vld [vmem:[%s8112_s1 + $0xc8] sm:$0xf] }
  0x54   : > { %v6027_v50 = vld [vmem:[%s8112_s1 + $0x2c4] sm:$0xf]  ;;  %v5966_v55 = vld [vmem:[%s8112_s1 + $0xd4] sm:$0xf0]  ;;  %v4622_v57 = vld [vmem:[%s8112_s1 + $0x1c8] sm:$0xf]  ;;  %v4619_v60 = vor.u32 %v5995_v48, %v4616_v49 }
  0x55   : > { %1192 = vmatpush.bf16.msra.mxu0 %v4407_v17  ;;  %v6932_v56 = vpack.c.b16 %v697_v42, %v697_v42  ;;  %v5998_v58 = vld [vmem:[%s8112_s1 + $0x1d4] sm:$0xf0]  ;;  %v6940_v59 = vpack.c.b16 %v698_v43, %v698_v43  ;;  %v4747_v61 = vor.u32 %v6027_v50, %v4744_v53  ;;  %v4495_v62 = vor.u32 %v5966_v55, %v4494_v54  ;;  %v5991_v63 = vld [vmem:[%s8112_s1 + $0x1a4] sm:$0xf]  ;;  %v4600_v0 = vld [vmem:[%s8112_s1 + $0x1b0] sm:$0xf0] }
  0x56   : > { %1205 = vmatpush.bf16.msra.mxu1 %v4535_v21  ;;  %1231 = vmatpush.bf16.msra.mxu3 %v4411_v26  ;;  %v6023_v1 = vld [vmem:[%s8112_s1 + $0x2a4] sm:$0xf]  ;;  %v4623_v2 = vor.u32 %v5998_v58, %v4622_v57  ;;  %v4728_v3 = vld [vmem:[%s8112_s1 + $0x2b0] sm:$0xf0]  ;;  %v4478_v4 = vld [vmem:[%s8112_s1 + $0xa8] sm:$0xf]  ;;  %v4603_v8 = vor.u32 %v5991_v63, %v4600_v0 }
  0x57   : > { %1218 = vmatpush.bf16.msra.mxu2 %v4663_v22  ;;  %v5962_v5 = vld [vmem:[%s8112_s1 + $0xb4] sm:$0xf0]  ;;  %v4606_v6 = vld [vmem:[%s8112_s1 + $0x1a8] sm:$0xf]  ;;  %v4731_v9 = vor.u32 %v6023_v1, %v4728_v3  ;;  %v5987_v11 = vld [vmem:[%s8112_s1 + $0x184] sm:$0xf] }
  0x58   : > { %v5994_v7 = vld [vmem:[%s8112_s1 + $0x1b4] sm:$0xf0]  ;;  %v4479_v10 = vor.u32 %v5962_v5, %v4478_v4  ;;  %v4584_v12 = vld [vmem:[%s8112_s1 + $0x190] sm:$0xf0]  ;;  %v6019_v13 = vld [vmem:[%s8112_s1 + $0x284] sm:$0xf] }
  0x59   : > { %1193 = vmatpush.bf16.msra.mxu0 %v4391_v33  ;;  %v4607_v14 = vor.u32 %v5994_v7, %v4606_v6  ;;  %v4712_v15 = vld [vmem:[%s8112_s1 + $0x290] sm:$0xf0]  ;;  %v4462_v16 = vld [vmem:[%s8112_s1 + $0x88] sm:$0xf]  ;;  %v5958_v17 = vld [vmem:[%s8112_s1 + $0x94] sm:$0xf0]  ;;  %v4587_v20 = vor.u32 %v5987_v11, %v4584_v12 }
  0x5a   : > { %1206 = vmatpush.bf16.msra.mxu1 %v4519_v38  ;;  %1232 = vmatpush.bf16.msra.mxu3 %v4395_v44  ;;  %v4590_v18 = vld [vmem:[%s8112_s1 + $0x188] sm:$0xf]  ;;  %v5990_v19 = vld [vmem:[%s8112_s1 + $0x194] sm:$0xf0]  ;;  %v4715_v21 = vor.u32 %v6019_v13, %v4712_v15  ;;  %v4463_v22 = vor.u32 %v5958_v17, %v4462_v16  ;;  %v5983_v23 = vld [vmem:[%s8112_s1 + $0x164] sm:$0xf] }
  0x5b   : > { %1219 = vmatpush.bf16.msra.mxu2 %v4647_v39  ;;  %v4568_v24 = vld [vmem:[%s8112_s1 + $0x170] sm:$0xf0]  ;;  %v6015_v25 = vld [vmem:[%s8112_s1 + $0x264] sm:$0xf]  ;;  %v4591_v26 = vor.u32 %v5990_v19, %v4590_v18  ;;  %v4446_v28 = vld [vmem:[%s8112_s1 + $0x68] sm:$0xf] }
  0x5c   : > { %1194 = vmatmul.bf16.vlgmr.msra.gmra.mxu0 %v6932_v56  ;;  %v4696_v27 = vld [vmem:[%s8112_s1 + $0x270] sm:$0xf0]  ;;  %v5954_v29 = vld [vmem:[%s8112_s1 + $0x74] sm:$0xf0]  ;;  %v4574_v30 = vld [vmem:[%s8112_s1 + $0x168] sm:$0xf]  ;;  %v4571_v32 = vor.u32 %v5983_v23, %v4568_v24 }
  0x5d   : > { %1238 = vmatpush.bf16.msrb.mxu0 %v4635_v45  ;;  %1207 = vmatmul.bf16.vlgmr.msra.gmra.mxu1 %v6940_v59  ;;  %v5986_v31 = vld [vmem:[%s8112_s1 + $0x174] sm:$0xf0]  ;;  %v4699_v33 = vor.u32 %v6015_v25, %v4696_v27  ;;  %v4447_v34 = vor.u32 %v5954_v29, %v4446_v28  ;;  %v5979_v35 = vld [vmem:[%s8112_s1 + $0x144] sm:$0xf]  ;;  %v4552_v36 = vld [vmem:[%s8112_s1 + $0x150] sm:$0xf0] }
  0x5e   : > { %1251 = vmatpush.bf16.msrb.mxu1 %v4763_v46  ;;  %1277 = vmatpush.bf16.msrb.mxu3 %v4639_v51  ;;  %v6011_v37 = vld [vmem:[%s8112_s1 + $0x244] sm:$0xf]  ;;  %v4575_v38 = vor.u32 %v5986_v31, %v4574_v30  ;;  %v4680_v39 = vld [vmem:[%s8112_s1 + $0x250] sm:$0xf0]  ;;  %v4430_v40 = vld [vmem:[%s8112_s1 + $0x48] sm:$0xf]  ;;  %v4555_v44 = vor.u32 %v5979_v35, %v4552_v36 }
  0x5f   : > { %1264 = vmatpush.bf16.msrb.mxu2 %v4511_v47  ;;  %1233 = vmatmul.bf16.vlgmr.msra.gmra.mxu3 %v6932_v56  ;;  %v5950_v41 = vld [vmem:[%s8112_s1 + $0x54] sm:$0xf0]  ;;  %v4558_v42 = vld [vmem:[%s8112_s1 + $0x148] sm:$0xf]  ;;  %v4683_v45 = vor.u32 %v6011_v37, %v4680_v39  ;;  %v5975_v47 = vld [vmem:[%s8112_s1 + $0x124] sm:$0xf] }
  0x60   : > { %1220 = vmatmul.bf16.vlgmr.msra.gmra.mxu2 %v6921_v52  ;;  %v5982_v43 = vld [vmem:[%s8112_s1 + $0x154] sm:$0xf0]  ;;  %v4431_v46 = vor.u32 %v5950_v41, %v4430_v40  ;;  %v4536_v48 = vld [vmem:[%s8112_s1 + $0x130] sm:$0xf0]  ;;  %v6007_v49 = vld [vmem:[%s8112_s1 + $0x224] sm:$0xf] }
  0x61   : > { %1239 = vmatpush.bf16.msrb.mxu0 %v4619_v60  ;;  %v4559_v50 = vor.u32 %v5982_v43, %v4558_v42  ;;  %v4664_v51 = vld [vmem:[%s8112_s1 + $0x230] sm:$0xf0]  ;;  %v4414_v53 = vld [vmem:[%s8112_s1 + $0x28] sm:$0xf]  ;;  %v5946_v54 = vld [vmem:[%s8112_s1 + $0x34] sm:$0xf0]  ;;  %v4539_v58 = vor.u32 %v5975_v47, %v4536_v48 }
  0x62   : > { %1252 = vmatpush.bf16.msrb.mxu1 %v4747_v61  ;;  %1278 = vmatpush.bf16.msrb.mxu3 %v4623_v2  ;;  %v4542_v55 = vld [vmem:[%s8112_s1 + $0x128] sm:$0xf]  ;;  %v5978_v57 = vld [vmem:[%s8112_s1 + $0x134] sm:$0xf0]  ;;  %v5971_v60 = vld [vmem:[%s8112_s1 + $0x104] sm:$0xf]  ;;  %v4415_v63 = vor.u32 %v5946_v54, %v4414_v53 }
  0x63   : > { %1265 = vmatpush.bf16.msrb.mxu2 %v4495_v62  ;;  %v4520_v61 = vld [vmem:[%s8112_s1 + $0x110] sm:$0xf0]  ;;  %v4667_v62 = vor.u32 %v6007_v49, %v4664_v51  ;;  %v6003_v0 = vld [vmem:[%s8112_s1 + $0x204] sm:$0xf]  ;;  %v4398_v2 = vld [vmem:[%s8112_s1 + $0x8] sm:$0xf]  ;;  %v4543_v3 = vor.u32 %v5978_v57, %v4542_v55 }
  0x64   : > { %v4648_v1 = vld [vmem:[%s8112_s1 + $0x210] sm:$0xf0]  ;;  %v5942_v4 = vld [vmem:[%s8112_s1 + $0x14] sm:$0xf0]  ;;  %v4526_v5 = vld [vmem:[%s8112_s1 + $0x108] sm:$0xf] }
  0x65   : > { %1240 = vmatpush.bf16.msrb.mxu0 %v4603_v8  ;;  %v5974_v6 = vld [vmem:[%s8112_s1 + $0x114] sm:$0xf0]  ;;  %v4766_v7 = vld [vmem:[%s8112_s1 + $0x2e8] sm:$0xf]  ;;  %v4512_v11 = vld [vmem:[%s8112_s1 + $0xf8] sm:$0xf0]  ;;  %v4399_v15 = vor.u32 %v5942_v4, %v4398_v2 }
  0x66   : > { %1253 = vmatpush.bf16.msrb.mxu1 %v4731_v9  ;;  %1279 = vmatpush.bf16.msrb.mxu3 %v4607_v14  ;;  %v6034_v8 = vld [vmem:[%s8112_s1 + $0x2f4] sm:$0xf0]  ;;  %v5968_v9 = vld [vmem:[%s8112_s1 + $0xec] sm:$0xf]  ;;  %v4640_v13 = vld [vmem:[%s8112_s1 + $0x1f8] sm:$0xf0]  ;;  %v4651_v14 = vor.u32 %v6003_v0, %v4648_v1  ;;  %v4527_v18 = vor.u32 %v5974_v6, %v4526_v5 }
  0x67   : > { %1266 = vmatpush.bf16.msrb.mxu2 %v4479_v10  ;;  %v4523_v10 = vor.u32 %v5971_v60, %v4520_v61  ;;  %v6000_v12 = vld [vmem:[%s8112_s1 + $0x1ec] sm:$0xf]  ;;  %v4768_v17 = vld [vmem:[%s8112_s1 + $0x2f8] sm:$0xf0]  ;;  %v4767_v19 = vor.u32 %v6034_v8, %v4766_v7  ;;  %v6030_v23 = vld [vmem:[%s8112_s1 + $0x2d4] sm:$0xf0] }
  0x68   : > { %v6032_v16 = vld [vmem:[%s8112_s1 + $0x2ec] sm:$0xf]  ;;  %v4624_v28 = vld [vmem:[%s8112_s1 + $0x1d8] sm:$0xf0]  ;;  %v6026_v35 = vld [vmem:[%s8112_s1 + $0x2b4] sm:$0xf0] }
  0x69   : > { %1241 = vmatpush.bf16.msrb.mxu0 %v4587_v20  ;;  %v4515_v20 = vor.u32 %v5968_v9, %v4512_v11  ;;  %v5964_v24 = vld [vmem:[%s8112_s1 + $0xcc] sm:$0xf]  ;;  %v4771_v25 = vor.u32 %v6032_v16, %v4768_v17  ;;  %v4752_v30 = vld [vmem:[%s8112_s1 + $0x2d8] sm:$0xf0]  ;;  %v6022_v47 = vld [vmem:[%s8112_s1 + $0x294] sm:$0xf0] }
  0x6a   : > { %1254 = vmatpush.bf16.msrb.mxu1 %v4715_v21  ;;  %1280 = vmatpush.bf16.msrb.mxu3 %v4591_v26  ;;  %v4643_v21 = vor.u32 %v6000_v12, %v4640_v13  ;;  %v4496_v26 = vld [vmem:[%s8112_s1 + $0xd8] sm:$0xf0]  ;;  %v5996_v27 = vld [vmem:[%s8112_s1 + $0x1cc] sm:$0xf]  ;;  %v4702_v61 = vld [vmem:[%s8112_s1 + $0x268] sm:$0xf] }
  0x6b   : > { %1267 = vmatpush.bf16.msrb.mxu2 %v4463_v22  ;;  %v4750_v22 = vld [vmem:[%s8112_s1 + $0x2c8] sm:$0xf]  ;;  %v6028_v29 = vld [vmem:[%s8112_s1 + $0x2cc] sm:$0xf]  ;;  %v4608_v40 = vld [vmem:[%s8112_s1 + $0x1b8] sm:$0xf0] }
  0x6c   : > { %v4751_v31 = vor.u32 %v6030_v23, %v4750_v22  ;;  %v5960_v36 = vld [vmem:[%s8112_s1 + $0xac] sm:$0xf]  ;;  %v4755_v37 = vor.u32 %v6028_v29, %v4752_v30  ;;  %v4736_v42 = vld [vmem:[%s8112_s1 + $0x2b8] sm:$0xf0]  ;;  %v4686_v9 = vld [vmem:[%s8112_s1 + $0x248] sm:$0xf] }
  0x6d   : > { %1242 = vmatpush.bf16.msrb.mxu0 %v4571_v32  ;;  %v4499_v32 = vor.u32 %v5964_v24, %v4496_v26  ;;  %v5992_v39 = vld [vmem:[%s8112_s1 + $0x1ac] sm:$0xf]  ;;  %v4592_v53 = vld [vmem:[%s8112_s1 + $0x198] sm:$0xf0]  ;;  %v6010_v22 = vld [vmem:[%s8112_s1 + $0x234] sm:$0xf0] }
  0x6e   : > { %1255 = vmatpush.bf16.msrb.mxu1 %v4699_v33  ;;  %1281 = vmatpush.bf16.msrb.mxu3 %v4575_v38  ;;  %v4627_v33 = vor.u32 %v5996_v27, %v4624_v28  ;;  %v4480_v38 = vld [vmem:[%s8112_s1 + $0xb8] sm:$0xf0]  ;;  %v6024_v41 = vld [vmem:[%s8112_s1 + $0x2ac] sm:$0xf]  ;;  %vm1471_vm13 = vcmask 1042434   ;;  %vm1473_vm15 = vcmask 1041408  }
  0x6f   : > { %1268 = vmatpush.bf16.msrb.mxu2 %v4447_v34  ;;  %v4734_v34 = vld [vmem:[%s8112_s1 + $0x2a8] sm:$0xf]  ;;  %v5956_v48 = vld [vmem:[%s8112_s1 + $0x8c] sm:$0xf]  ;;  %v4739_v49 = vor.u32 %v6024_v41, %v4736_v42  ;;  %v4720_v55 = vld [vmem:[%s8112_s1 + $0x298] sm:$0xf0] }
  0x70   : > { %v4735_v43 = vor.u32 %v6026_v35, %v4734_v34  ;;  %v5988_v51 = vld [vmem:[%s8112_s1 + $0x18c] sm:$0xf]  ;;  %v4448_v1 = vld [vmem:[%s8112_s1 + $0x78] sm:$0xf0]  ;;  %v6006_v34 = vld [vmem:[%s8112_s1 + $0x214] sm:$0xf0] }
  0x71   : > { %1243 = vmatpush.bf16.msrb.mxu0 %v4555_v44  ;;  %v4483_v44 = vor.u32 %v5960_v36, %v4480_v38  ;;  %v6020_v54 = vld [vmem:[%s8112_s1 + $0x28c] sm:$0xf]  ;;  %v4595_v60 = vor.u32 %v5988_v51, %v4592_v53  ;;  %v4704_v5 = vld [vmem:[%s8112_s1 + $0x278] sm:$0xf0] }
  0x72   : > { %1256 = vmatpush.bf16.msrb.mxu1 %v4683_v45  ;;  %1282 = vmatpush.bf16.msrb.mxu3 %v4559_v50  ;;  %v4611_v45 = vor.u32 %v5992_v39, %v4608_v40  ;;  %v4464_v50 = vld [vmem:[%s8112_s1 + $0x98] sm:$0xf0]  ;;  %v4723_v0 = vor.u32 %v6020_v54, %v4720_v55  ;;  %v5984_v2 = vld [vmem:[%s8112_s1 + $0x16c] sm:$0xf] }
  0x73   : > { %1269 = vmatpush.bf16.msrb.mxu2 %v4431_v46  ;;  %v4718_v46 = vld [vmem:[%s8112_s1 + $0x288] sm:$0xf]  ;;  %v6016_v4 = vld [vmem:[%s8112_s1 + $0x26c] sm:$0xf]  ;;  %v4432_v13 = vld [vmem:[%s8112_s1 + $0x58] sm:$0xf0] }
  0x74   : > { %v4719_v57 = vor.u32 %v6022_v47, %v4718_v46  ;;  %v5948_v11 = vld [vmem:[%s8112_s1 + $0x4c] sm:$0xf]  ;;  %v4707_v12 = vor.u32 %v6016_v4, %v4704_v5  ;;  %v4688_v17 = vld [vmem:[%s8112_s1 + $0x258] sm:$0xf0]  ;;  %v7291_v46 = vld [vmem:[%s6677_s17] sm:$0xf] }
  0x75   : > { %1244 = vmatpush.bf16.msrb.mxu0 %v4539_v58  ;;  %v4467_v58 = vor.u32 %v5956_v48, %v4464_v50  ;;  %v6012_v16 = vld [vmem:[%s8112_s1 + $0x24c] sm:$0xf]  ;;  %v4544_v27 = vld [vmem:[%s8112_s1 + $0x138] sm:$0xf0]  ;;  %v687_v47 = vperm.slane %v7291_v46, 0 }
  0x76   : > { %1257 = vmatpush.bf16.msrb.mxu1 %v4667_v62  ;;  %1283 = vmatpush.bf16.msrb.mxu3 %v4543_v3  ;;  %v6018_v62 = vld [vmem:[%s8112_s1 + $0x274] sm:$0xf0]  ;;  %v4576_v3 = vld [vmem:[%s8112_s1 + $0x178] sm:$0xf0]  ;;  %v5944_v23 = vld [vmem:[%s8112_s1 + $0x2c] sm:$0xf]  ;;  %v4691_v24 = vor.u32 %v6012_v16, %v4688_v17 }
  0x77   : > { %1270 = vmatpush.bf16.msrb.mxu2 %v4415_v63  ;;  %v5952_v63 = vld [vmem:[%s8112_s1 + $0x6c] sm:$0xf]  ;;  %v4703_v6 = vor.u32 %v6018_v62, %v4702_v61  ;;  %v4579_v8 = vor.u32 %v5984_v2, %v4576_v3  ;;  %v4672_v29 = vld [vmem:[%s8112_s1 + $0x238] sm:$0xf0] }
  0x78   : > { %v4451_v7 = vor.u32 %v5952_v63, %v4448_v1  ;;  %v5976_v26 = vld [vmem:[%s8112_s1 + $0x12c] sm:$0xf]  ;;  %v4528_v39 = vld [vmem:[%s8112_s1 + $0x118] sm:$0xf0] }
  0x79   : > { %1245 = vmatpush.bf16.msrb.mxu0 %v4523_v10  ;;  %v6014_v10 = vld [vmem:[%s8112_s1 + $0x254] sm:$0xf0]  ;;  %v6008_v28 = vld [vmem:[%s8112_s1 + $0x22c] sm:$0xf]  ;;  %v4656_v41 = vld [vmem:[%s8112_s1 + $0x218] sm:$0xf0] }
  0x7a   : > { %1258 = vmatpush.bf16.msrb.mxu1 %v4651_v14  ;;  %1284 = vmatpush.bf16.msrb.mxu3 %v4527_v18  ;;  %v5980_v14 = vld [vmem:[%s8112_s1 + $0x14c] sm:$0xf]  ;;  %v4687_v18 = vor.u32 %v6014_v10, %v4686_v9  ;;  %v4675_v36 = vor.u32 %v6008_v28, %v4672_v29  ;;  %v689_v29 = vperm.slane %v7291_v46, 2 }
  0x7b   : > { %1271 = vmatpush.bf16.msrb.mxu2 %v4399_v15  ;;  %v4560_v15 = vld [vmem:[%s8112_s1 + $0x158] sm:$0xf0]  ;;  %v5940_v35 = vld [vmem:[%s8112_s1 + $0xc] sm:$0xf] }
  0x7c   : > { %1246 = vmatmul.bf16.vlgmr.msrb.gmra.mxu0 %v6940_v59  ;;  %v5972_v38 = vld [vmem:[%s8112_s1 + $0x10c] sm:$0xf] }
  0x7d   : > { %1290 = vmatpush.bf16.msra.mxu0 %v4767_v19  ;;  %1259 = vmatmul.bf16.vlgmr.msrb.gmra.mxu1 %v6921_v52  ;;  %v4435_v19 = vor.u32 %v5948_v11, %v4432_v13  ;;  %v6004_v40 = vld [vmem:[%s8112_s1 + $0x20c] sm:$0xf] }
  0x7e   : > { %1303 = vmatpush.bf16.msra.mxu1 %v4515_v20  ;;  %1329 = vmatpush.bf16.msra.mxu3 %v4771_v25  ;;  %v4563_v20 = vor.u32 %v5980_v14, %v4560_v15  ;;  %v4416_v25 = vld [vmem:[%s8112_s1 + $0x38] sm:$0xf0] }
  0x7f   : > { %1316 = vmatpush.bf16.msra.mxu2 %v4643_v21  ;;  %1285 = vmatmul.bf16.vlgmr.msrb.gmra.mxu3 %v6940_v59  ;;  %v4670_v21 = vld [vmem:[%s8112_s1 + $0x228] sm:$0xf] }
  0x80   : > { %1272 = vmatmul.bf16.vlgmr.msrb.gmra.mxu2 %v6932_v56  ;;  %v4671_v30 = vor.u32 %v6010_v22, %v4670_v21 }
  0x81   : > { %1291 = vmatpush.bf16.msra.mxu0 %v4751_v31  ;;  %v4419_v31 = vor.u32 %v5944_v23, %v4416_v25 }
  0x82   : > { %1304 = vmatpush.bf16.msra.mxu1 %v4499_v32  ;;  %1330 = vmatpush.bf16.msra.mxu3 %v4755_v37  ;;  %v4547_v32 = vor.u32 %v5976_v26, %v4544_v27  ;;  %v4400_v37 = vld [vmem:[%s8112_s1 + $0x18] sm:$0xf0] }
  0x83   : > { %1317 = vmatpush.bf16.msra.mxu2 %v4627_v33  ;;  %v4654_v33 = vld [vmem:[%s8112_s1 + $0x208] sm:$0xf] }
  0x84   : > { %v4655_v42 = vor.u32 %v6006_v34, %v4654_v33 }
  0x85   : > { %1292 = vmatpush.bf16.msra.mxu0 %v4735_v43  ;;  %v4403_v43 = vor.u32 %v5940_v35, %v4400_v37 }
  0x86   : > { %1305 = vmatpush.bf16.msra.mxu1 %v4483_v44  ;;  %1331 = vmatpush.bf16.msra.mxu3 %v4739_v49  ;;  %v4531_v44 = vor.u32 %v5972_v38, %v4528_v39  ;;  %v690_v38 = vperm.slane %v7291_v46, 3 }
  0x87   : > { %1318 = vmatpush.bf16.msra.mxu2 %v4611_v45  ;;  %v4659_v45 = vor.u32 %v6004_v40, %v4656_v41 }
  0x89   : > { %1293 = vmatpush.bf16.msra.mxu0 %v4719_v57 }
  0x8a   : > { %1306 = vmatpush.bf16.msra.mxu1 %v4467_v58  ;;  %1332 = vmatpush.bf16.msra.mxu3 %v4723_v0 }
  0x8b   : > { %1319 = vmatpush.bf16.msra.mxu2 %v4595_v60 }
  0x8d   : > { %1294 = vmatpush.bf16.msra.mxu0 %v4703_v6 }
  0x8e   : > { %1307 = vmatpush.bf16.msra.mxu1 %v4451_v7  ;;  %1333 = vmatpush.bf16.msra.mxu3 %v4707_v12 }
  0x8f   : > { %1320 = vmatpush.bf16.msra.mxu2 %v4579_v8 }
  0x91   : > { %1295 = vmatpush.bf16.msra.mxu0 %v4687_v18 }
  0x92   : > { %1308 = vmatpush.bf16.msra.mxu1 %v4435_v19  ;;  %1334 = vmatpush.bf16.msra.mxu3 %v4691_v24 }
  0x93   : > { %1321 = vmatpush.bf16.msra.mxu2 %v4563_v20 }
  0x95   : > { %1296 = vmatpush.bf16.msra.mxu0 %v4671_v30 }
  0x96   : > { %1309 = vmatpush.bf16.msra.mxu1 %v4419_v31  ;;  %1335 = vmatpush.bf16.msra.mxu3 %v4675_v36 }
  0x97   : > { %1322 = vmatpush.bf16.msra.mxu2 %v4547_v32 }
  0x99   : > { %1297 = vmatpush.bf16.msra.mxu0 %v4655_v42 }
  0x9a   : > { %1310 = vmatpush.bf16.msra.mxu1 %v4403_v43  ;;  %1336 = vmatpush.bf16.msra.mxu3 %v4659_v45 }
  0x9b   : > { %1323 = vmatpush.bf16.msra.mxu2 %v4531_v44 }
  0x9c   : > { %1298 = vmatmul.bf16.vlgmr.msra.gmra.mxu0 %v6921_v52 }
  0x9d   : > { %1311 = vmatmul.bf16.vlgmr.msra.gmra.mxu1 %v6932_v56  ;;  %1337 = vmatmul.bf16.vlgmr.msra.gmra.mxu3 %v6921_v52  ;;  %v6538_v56 = vmov 8.0  }
  0x9e   : > { %1324 = vmatmul.bf16.vlgmr.msra.gmra.mxu2 %v6940_v59  ;;  %6391 = vrcp.f32 %v6538_v56  ;;  %v688_v59 = vperm.slane %v7291_v46, 1 }
  0xa4   : > { %v6392_v0 = vpop.eup %6391 }
  0xa5   : > { %v1371_v5 = vmul.f32 8.0, %v6392_v0  ;;  %vm1375_vm0 = vweird.f32 %v6392_v0 }
  0xa7   : > { %v1372_v9 = vsub.f32 1.0, %v1371_v5 }
  0xa9   : > { %v1373_v17 = vmul.f32 %v6392_v0, %v1372_v9 }
  0xab   : > { %v1374_v21 = vadd.f32 %v6392_v0, %v1373_v17 }
  0xad   : > { %v7295_v27 = vsel %vm1375_vm0, %v6392_v0, %v1374_v21 }
  0xd9   : > { %v1195_v48 = vpop.f32.mrf.mxu0 }
  0xda   : > { %v1208_v49 = vpop.f32.mrf.mxu1  ;;  %v1196_v50 = vadd.f32 %v1195_v48, %v687_v47 }
  0xdc   : > { %v1209_v51 = vadd.f32 %v1208_v49, %v1196_v50 }
  0xe1   : > { %v1197_v57 = vpop.f32.mrf.mxu0 }
  0xe2   : > { %v1234_v55 = vpop.f32.mrf.mxu3  ;;  %v1210_v58 = vpop.f32.mrf.mxu1 }
  0xe3   : > { %v1221_v53 = vpop.f32.mrf.mxu2  ;;  %v1235_v62 = vadd.f32 %v1234_v55, %v688_v59 }
  0xe4   : > { %v1222_v54 = vadd.f32 %v1221_v53, %v1209_v51 }
  0xe6   : > { %v1342_v52 = vmax.f32 %v1222_v54, 0.0 }
  0xe8   : > { %v1346_v63 = vrot.slane %v1342_v52, 4 }
  0xea   : > { %v1236_v61 = vpop.f32.mrf.mxu3  ;;  %v1347_v4 = vadd.f32 %v1346_v63, %v1342_v52 }
  0xeb   : > { %v1223_v60 = vpop.f32.mrf.mxu2 }
  0xec   : > { %v1348_v8 = vrot.slane %v1347_v4, 2 }
  0xee   : > { %v1349_v16 = vadd.f32 %v1348_v8, %v1347_v4 }
  0xf0   : > { %v1350_v20 = vrot.slane %v1349_v16, 1 }
  0xf2   : > { %v1351_v26 = vadd.f32 %v1350_v20, %v1349_v16 }
  0xf4   : > { %v1377_v31 = vmul.f32 %v7295_v27, %v1351_v26 }
  0xf6   : > { %v7304_v34 = vsub.f32 %v1342_v52, %v1377_v31 }
  0xf8   : > { %v1385_v39 = vmul.f32 %v7304_v34, %v7304_v34 }
  0xf9   : > { %v1247_v1 = vpop.f32.mrf.mxu0 }
  0xfa   : > { %v1248_v2 = vadd.f32 %v1247_v1, %v1235_v62  ;;  %v1260_v3 = vpop.f32.mrf.mxu1  ;;  %v1389_v45 = vrot.slane %v1385_v39, 4 }
  0xfc   : > { %v1261_v6 = vadd.f32 %v1260_v3, %v1248_v2  ;;  %v1390_v55 = vadd.f32 %v1389_v45, %v1385_v39 }
  0xfe   : > { %v1343_v7 = vmax.f32 %v1261_v6, 0.0  ;;  %v1391_v59 = vrot.slane %v1390_v55, 2 }
 0x100   : > { %v1352_v10 = vrot.slane %v1343_v7, 4  ;;  %v1392_v4 = vadd.f32 %v1391_v59, %v1390_v55 }
 0x101   : > { %v1249_v13 = vpop.f32.mrf.mxu0 }
 0x102   : > { %v1286_v12 = vpop.f32.mrf.mxu3  ;;  %v1353_v14 = vadd.f32 %v1352_v10, %v1343_v7  ;;  %v1262_v15 = vpop.f32.mrf.mxu1  ;;  %v1393_v10 = vrot.slane %v1392_v4, 1 }
 0x103   : > { %v1273_v11 = vpop.f32.mrf.mxu2 }
 0x104   : > { %v1354_v18 = vrot.slane %v1353_v14, 2  ;;  %v1274_v32 = vadd.f32 %v1273_v11, %v689_v29  ;;  %v1394_v16 = vadd.f32 %v1393_v10, %v1392_v4 }
 0x106   : > { %v1355_v19 = vadd.f32 %v1354_v18, %v1353_v14  ;;  %v1287_v35 = vadd.f32 %v1286_v12, %v1274_v32 }
 0x108   : > { %v1356_v22 = vrot.slane %v1355_v19, 1 }
 0x10a   : > { %v1288_v24 = vpop.f32.mrf.mxu3  ;;  %v1357_v25 = vadd.f32 %v1356_v22, %v1355_v19  ;;  %v1413_v22 = vmul.f32 %v1394_v16, %v7295_v27 }
 0x10b   : > { %v1275_v23 = vpop.f32.mrf.mxu2 }
 0x10c   : > { %v1378_v28 = vmul.f32 %v7295_v27, %v1357_v25 }
 0x10e   : > { %v7299_v30 = vsub.f32 %v1343_v7, %v1378_v28  ;;  %v1418_v28 = vadd.f32 1e-05, %v1413_v22 }
 0x110   : > { %v1386_v33 = vmul.f32 %v7299_v30, %v7299_v30  ;;  %vm1428_vm7 = vweird.f32 %v1418_v28 }
 0x112   : > { %v1395_v36 = vrot.slane %v1386_v33, 4 }
 0x114   : > { %v1396_v43 = vadd.f32 %v1395_v36, %v1386_v33 }
 0x116   : > { %v1397_v50 = vrot.slane %v1396_v43, 2 }
 0x118   : > { %v1398_v61 = vadd.f32 %v1397_v50, %v1396_v43 }
 0x119   : > { %v1299_v37 = vpop.f32.mrf.mxu0 }
 0x11a   : > { %v1300_v40 = vadd.f32 %v1299_v37, %v1287_v35  ;;  %v1312_v41 = vpop.f32.mrf.mxu1  ;;  %v1399_v1 = vrot.slane %v1398_v61, 1 }
 0x11b   : > { %v1313_v44 = vadd.f32 %v1312_v41, %v690_v38 }
 0x11c   : > { %v1344_v42 = vmax.f32 %v1300_v40, 0.0  ;;  %v1400_v8 = vadd.f32 %v1399_v1, %v1398_v61 }
 0x11e   : > { %v1358_v47 = vrot.slane %v1344_v42, 4  ;;  %v1414_v14 = vmul.f32 %v1400_v8, %v7295_v27 }
 0x120   : > { %v1359_v48 = vadd.f32 %v1358_v47, %v1344_v42  ;;  %v1338_v53 = vpop.f32.mrf.mxu3  ;;  %v1419_v20 = vadd.f32 1e-05, %v1414_v14 }
 0x121   : > { %v1325_v49 = vpop.f32.mrf.mxu2  ;;  %v1301_v54 = vpop.f32.mrf.mxu0 }
 0x122   : > { %v1326_v51 = vadd.f32 %v1325_v49, %v1313_v44  ;;  %v1360_v57 = vrot.slane %v1359_v48, 2  ;;  %v1314_v58 = vpop.f32.mrf.mxu1  ;;  %6393 = vrsqrt.f32 %v1419_v20  ;;  %vm1438_vm2 = vweird.f32 %v1419_v20 }
 0x123   : > { %6395 = vrsqrt.f32 %v1418_v28 }
 0x124   : > { %v1339_v46 = vadd.f32 %v1338_v53, %v1326_v51  ;;  %v1361_v60 = vadd.f32 %v1360_v57, %v1359_v48 }
 0x126   : > { %v1345_v56 = vmax.f32 %v1339_v46, 0.0  ;;  %v1362_v52 = vrot.slane %v1361_v60, 1 }
 0x128   : > { %v1364_v62 = vrot.slane %v1345_v56, 4  ;;  %v1363_v63 = vadd.f32 %v1362_v52, %v1361_v60  ;;  %v1340_v3 = vpop.f32.mrf.mxu3  ;;  %v6394_v36 = vpop.eup %6393 }
 0x129   : > { %v1327_v0 = vpop.f32.mrf.mxu2  ;;  %v1433_v39 = vmul.f32 %v6394_v36, %v1419_v20  ;;  %v6396_v41 = vpop.eup %6395  ;;  %vm1439_vm1 = vweird.f32 %v6394_v36 }
 0x12a   : > { %v1365_v2 = vadd.f32 %v1364_v62, %v1345_v56  ;;  %v1379_v5 = vmul.f32 %v7295_v27, %v1363_v63  ;;  %v1423_v45 = vmul.f32 %v6396_v41, %v1418_v28  ;;  %vm1440_vm4 = vmor %vm1438_vm2, %vm1439_vm1  ;;  %vm1429_vm8 = vweird.f32 %v6396_v41 }
 0x12b   : > { %v1434_v44 = vmul.f32 %v6394_v36, %v1433_v39  ;;  %vm1430_vm14 = vmor %vm1428_vm7, %vm1429_vm8 }
 0x12c   : > { %v1366_v6 = vrot.slane %v1365_v2, 2  ;;  %v7310_v7 = vsub.f32 %v1344_v42, %v1379_v5  ;;  %v1424_v51 = vmul.f32 %v6396_v41, %v1423_v45 }
 0x12d   : > { %v1435_v50 = vmul.f32 0.5, %v1434_v44 }
 0x12e   : > { %v1367_v9 = vadd.f32 %v1366_v6, %v1365_v2  ;;  %v1387_v11 = vmul.f32 %v7310_v7, %v7310_v7  ;;  %v1425_v57 = vmul.f32 0.5, %v1424_v51  ;;  %v1417_v6 = vld [vmem:[%s6682_s16] sm:$0xf] }
 0x12f   : > { %v1436_v54 = vsub.f32 1.5, %v1435_v50 }
 0x130   : > { %v1368_v12 = vrot.slane %v1367_v9, 1  ;;  %v1401_v13 = vrot.slane %v1387_v11, 4 }
 0x131   : > { %v1437_v60 = vmul.f32 %v6394_v36, %v1436_v54 }
 0x132   : > { %v1369_v15 = vadd.f32 %v1368_v12, %v1367_v9  ;;  %v1402_v17 = vadd.f32 %v1401_v13, %v1387_v11  ;;  %v1490_v11 = vld [vmem:[%s6687_s18] sm:$0xf] }
 0x133   : > { %v1441_v52 = vsel %vm1440_vm4, %v6394_v36, %v1437_v60  ;;  %v1492_v14 = vperm.slane %v1490_v11, 0  ;;  %v1494_v16 = vperm.slane %v1490_v11, 2 }
 0x134   : > { %v1380_v18 = vmul.f32 %v7295_v27, %v1369_v15  ;;  %v1403_v19 = vrot.slane %v1402_v17, 2  ;;  %v1466_v2 = vrot.slane %v1441_v52, 7  ;;  %v1493_v15 = vperm.slane %v1490_v11, 1 }
 0x136   : > { %v7316_v21 = vsub.f32 %v1345_v56, %v1380_v18  ;;  %v1404_v23 = vadd.f32 %v1403_v19, %v1402_v17  ;;  %v1426_v56 = vsub.f32 1.5, %v1425_v57  ;;  %v1495_v17 = vperm.slane %v1490_v11, 3 }
 0x138   : > { %v1388_v24 = vmul.f32 %v7316_v21, %v7316_v21  ;;  %v1405_v25 = vrot.slane %v1404_v23, 1  ;;  %v1427_v63 = vmul.f32 %v6396_v41, %v1426_v56 }
 0x13a   : > { %v1407_v26 = vrot.slane %v1388_v24, 4  ;;  %v1406_v29 = vadd.f32 %v1405_v25, %v1404_v23  ;;  %v1431_v8 = vsel %vm1430_vm14, %v6396_v41, %v1427_v63 }
 0x13b   : > { %v1470_v9 = vsel %vm1469_vm12, %v1431_v8, %v1466_v2 }
 0x13c   : > { %v1408_v31 = vadd.f32 %v1407_v26, %v1388_v24  ;;  %v1415_v32 = vmul.f32 %v1406_v29, %v7295_v27 }
 0x13e   : > { %v1409_v33 = vrot.slane %v1408_v31, 2  ;;  %v1420_v35 = vadd.f32 1e-05, %v1415_v32 }
 0x140   : > { %v1410_v37 = vadd.f32 %v1409_v33, %v1408_v31  ;;  %6397 = vrsqrt.f32 %v1420_v35  ;;  %vm1448_vm5 = vweird.f32 %v1420_v35 }
 0x142   : > { %v1411_v38 = vrot.slane %v1410_v37, 1 }
 0x144   : > { %v1412_v40 = vadd.f32 %v1411_v38, %v1410_v37 }
 0x146   : > { %v1416_v42 = vmul.f32 %v1412_v40, %v7295_v27  ;;  %v6398_v43 = vpop.eup %6397 }
 0x147   : > { %v1443_v47 = vmul.f32 %v6398_v43, %v1420_v35  ;;  %vm1449_vm3 = vweird.f32 %v6398_v43 }
 0x148   : > { %v1421_v48 = vadd.f32 1e-05, %v1416_v42  ;;  %vm1450_vm9 = vmor %vm1448_vm5, %vm1449_vm3 }
 0x149   : > { %v1444_v49 = vmul.f32 %v6398_v43, %v1443_v47 }
 0x14a   : > { %6399 = vrsqrt.f32 %v1421_v48  ;;  %vm1458_vm10 = vweird.f32 %v1421_v48 }
 0x14b   : > { %v1445_v53 = vmul.f32 0.5, %v1444_v49 }
 0x14d   : > { %v1446_v58 = vsub.f32 1.5, %v1445_v53 }
 0x14f   : > { %v1447_v27 = vmul.f32 %v6398_v43, %v1446_v58 }
 0x150   : > { %v6400_v55 = vpop.eup %6399 }
 0x151   : > { %v1453_v46 = vmul.f32 %v6400_v55, %v1421_v48  ;;  %vm1459_vm6 = vweird.f32 %v6400_v55  ;;  %v1451_v0 = vsel %vm1450_vm9, %v6398_v43, %v1447_v27 }
 0x152   : > { %vm1460_vm11 = vmor %vm1458_vm10, %vm1459_vm6  ;;  %v1467_v4 = vrot.slane %v1451_v0, 6 }
 0x153   : > { %v1454_v61 = vmul.f32 %v6400_v55, %v1453_v46 }
 0x155   : > { %v1455_v59 = vmul.f32 0.5, %v1454_v61 }
 0x157   : > { %v1456_v62 = vsub.f32 1.5, %v1455_v59 }
 0x159   : > { %v1457_v1 = vmul.f32 %v6400_v55, %v1456_v62 }
 0x15b   : > { %v1461_v3 = vsel %vm1460_vm11, %v6400_v55, %v1457_v1 }
 0x15c   : > { %v1468_v5 = vrot.slane %v1461_v3, 5 }
 0x15e   : > { %v1472_v10 = vsel %vm1471_vm13, %v1467_v4, %v1468_v5 }
 0x15f   : > { %v1474_v12 = vsel %vm1473_vm15, %v1470_v9, %v1472_v10 }
 0x160   : > { %v1476_v13 = vmul.f32 %v1474_v12, %v1417_v6 }
 0x162   : > { %v1478_v18 = vperm.slane %v1476_v13, 0  ;;  %v1479_v19 = vperm.slane %v1476_v13, 1  ;;  %v1480_v20 = vperm.slane %v1476_v13, 2  ;;  %v1481_v22 = vperm.slane %v1476_v13, 3 }
 0x164   : > { %v1486_v23 = vmul.f32 %v1478_v18, %v7304_v34  ;;  %v1487_v24 = vmul.f32 %v1479_v19, %v7299_v30  ;;  %v1488_v25 = vmul.f32 %v1480_v20, %v7310_v7  ;;  %v1489_v26 = vmul.f32 %v1481_v22, %v7316_v21 }
 0x166   : > { %v1500_v28 = vadd.f32 %v1492_v14, %v1486_v23  ;;  %v1501_v29 = vadd.f32 %v1493_v15, %v1487_v24  ;;  %v1502_v31 = vadd.f32 %v1494_v16, %v1488_v25  ;;  %v1503_v32 = vadd.f32 %v1495_v17, %v1489_v26 }
 0x168   : > { %v1504_v33 = vpack.c.bf16 %v1501_v29, %v1500_v28  ;;  %v1505_v35 = vpack.c.bf16 %v1503_v32, %v1502_v31 }
 0x16a   : > { %1509 = vst [vmem:[#allocation2] sm:$0xff] %v1504_v33 }
 0x16b   : > { %1510 = vst [vmem:[#allocation2 + $0x8] sm:$0xff] %v1505_v35 }
 0x16c PF: > { %p1511_p11 = scmp.ge.s32.totalorder %s6526_s30, 1  ;;  %p1512_p12 = scmp.le.s32.totalorder %s6526_s30, 2 }
 0x16d   : > { %p1515_p13 = scmp.lt.s32.totalorder %s6526_s30, 0  ;;  %s1516_s25 = ssub.s32 0, %s6526_s30 }
 0x16e   : > { %s4772_s27 = smin.u32 %s6526_s30, %s1516_s25  ;;  %p7334_p0 = pnand %p1512_p12, %p1511_p11 }
 0x16f   : > { %s1518_s11 = sand.u32 1, %s4772_s27  }
 0x170   : > { %s1519_s13 = ssub.s32 0, %s1518_s11  ;;  %p1514_p2 = pneg %p7334_p0 }
 0x171   : > { %s8146_s13 = smov (!%p1515_p13, %s1519_s13), %s1518_s11 }
 0x172   : > { %p4774_p1 = scmp.lt.s32.totalorder %s8146_s13, 0  ;;  %s1525_s20 = sadd.s32 2, %s8146_s13 }
 0x174   : > { %s8148_s20 = smov (!%p4774_p1, %s1525_s20), %s8146_s13 }
 0x175   : > { %p1527_p3 = scmp.eq.s32.totalorder %s8148_s20, 1 }
 0x177   : > { %p1528_p4 = pnand %p1527_p3, %p1514_p2 }
 0x179   : > { %1531 = sbr.rel (%p1528_p4) target bundleno = 720 (0x2d0), region = 64 }
 0x17e   : > { %v4889_v30 = vld [vmem:[%s6666_s15 + $0xe0] sm:$0xf]  ;;  %v6065_v34 = vld [vmem:[%s6666_s15 + $0xec] sm:$0xf0]  ;;  %vm2661_vm12 = vcmask 1040384   ;;  %vm2663_vm13 = vcmask 1042434  }
 0x17f   : > { %v5017_v7 = vld [vmem:[%s6666_s15 + $0x1e0] sm:$0xf]  ;;  %v4890_v21 = vor.u32 %v6065_v34, %v4889_v30  ;;  %v6097_v36 = vld [vmem:[%s6666_s15 + $0x1ec] sm:$0xf0]  ;;  %vm2665_vm15 = vcmask 1041408  }
 0x180   : > { %v5145_v37 = vld [vmem:[%s6666_s15 + $0x2e0] sm:$0xf]  ;;  %v6129_v38 = vld [vmem:[%s6666_s15 + $0x2ec] sm:$0xf0]  ;;  %v5018_v39 = vor.u32 %v6097_v36, %v5017_v7 }
 0x181   : > { %v5146_v40 = vor.u32 %v6129_v38, %v5145_v37  ;;  %v5273_v41 = vld [vmem:[%s6666_s15 + $0x3e0] sm:$0xf]  ;;  %v6161_v42 = vld [vmem:[%s6666_s15 + $0x3ec] sm:$0xf0]  ;;  %2326 = vmatpush.bf16.msra.mxu0 %v4890_v21 }
 0x182   : > { %v4873_v43 = vld [vmem:[%s6666_s15 + $0xc0] sm:$0xf]  ;;  %v5274_v44 = vor.u32 %v6161_v42, %v5273_v41  ;;  %v6061_v45 = vld [vmem:[%s6666_s15 + $0xcc] sm:$0xf0]  ;;  %2339 = vmatpush.bf16.msra.mxu1 %v5018_v39 }
 0x183   : > { %v5001_v47 = vld [vmem:[%s6666_s15 + $0x1c0] sm:$0xf]  ;;  %v6093_v48 = vld [vmem:[%s6666_s15 + $0x1cc] sm:$0xf0]  ;;  %2352 = vmatpush.bf16.msra.mxu2 %v5146_v40  ;;  %v4874_v49 = vor.u32 %v6061_v45, %v4873_v43 }
 0x184   : > { %v5002_v50 = vor.u32 %v6093_v48, %v5001_v47  ;;  %v5129_v51 = vld [vmem:[%s6666_s15 + $0x2c0] sm:$0xf]  ;;  %v6125_v53 = vld [vmem:[%s6666_s15 + $0x2cc] sm:$0xf0]  ;;  %2365 = vmatpush.bf16.msra.mxu3 %v5274_v44 }
 0x185   : > { %v5257_v54 = vld [vmem:[%s6666_s15 + $0x3c0] sm:$0xf]  ;;  %v5130_v55 = vor.u32 %v6125_v53, %v5129_v51  ;;  %v6157_v57 = vld [vmem:[%s6666_s15 + $0x3cc] sm:$0xf0]  ;;  %2327 = vmatpush.bf16.msra.mxu0 %v4874_v49 }
 0x186   : > { %v4857_v58 = vld [vmem:[%s6666_s15 + $0xa0] sm:$0xf]  ;;  %v6057_v46 = vld [vmem:[%s6666_s15 + $0xac] sm:$0xf0]  ;;  %v5258_v60 = vor.u32 %v6157_v57, %v5257_v54  ;;  %2340 = vmatpush.bf16.msra.mxu1 %v5002_v50 }
 0x187   : > { %v4985_v61 = vld [vmem:[%s6666_s15 + $0x1a0] sm:$0xf]  ;;  %v6089_v56 = vld [vmem:[%s6666_s15 + $0x1ac] sm:$0xf0]  ;;  %v4858_v59 = vor.u32 %v6057_v46, %v4857_v58  ;;  %2353 = vmatpush.bf16.msra.mxu2 %v5130_v55 }
 0x188   : > { %v5113_v27 = vld [vmem:[%s6666_s15 + $0x2a0] sm:$0xf]  ;;  %v6121_v52 = vld [vmem:[%s6666_s15 + $0x2ac] sm:$0xf0]  ;;  %v4986_v0 = vor.u32 %v6089_v56, %v4985_v61  ;;  %2366 = vmatpush.bf16.msra.mxu3 %v5258_v60  ;;  %v1533_v60 = vld [vmem:[#allocation2 + $0x8] sm:$0xff] }
 0x189   : > { %v5241_v62 = vld [vmem:[%s6666_s15 + $0x3a0] sm:$0xf]  ;;  %v6153_v63 = vld [vmem:[%s6666_s15 + $0x3ac] sm:$0xf0]  ;;  %v5114_v1 = vor.u32 %v6121_v52, %v5113_v27  ;;  %2328 = vmatpush.bf16.msra.mxu0 %v4858_v59  ;;  %v6063_v52 = vld [vmem:[%s6666_s15 + $0xe4] sm:$0xf] }
 0x18a   : > { %v4841_v2 = vld [vmem:[%s6666_s15 + $0x80] sm:$0xf]  ;;  %v6053_v3 = vld [vmem:[%s6666_s15 + $0x8c] sm:$0xf0]  ;;  %v5242_v5 = vor.u32 %v6153_v63, %v5241_v62  ;;  %2341 = vmatpush.bf16.msra.mxu1 %v4986_v0  ;;  %v4891_v62 = vld [vmem:[%s6666_s15 + $0xf0] sm:$0xf0] }
 0x18b   : > { %v4969_v4 = vld [vmem:[%s6666_s15 + $0x180] sm:$0xf]  ;;  %v6085_v6 = vld [vmem:[%s6666_s15 + $0x18c] sm:$0xf0]  ;;  %v4842_v12 = vor.u32 %v6053_v3, %v4841_v2  ;;  %2354 = vmatpush.bf16.msra.mxu2 %v5114_v1  ;;  %v6095_v63 = vld [vmem:[%s6666_s15 + $0x1e4] sm:$0xf] }
 0x18c   : > { %v5097_v8 = vld [vmem:[%s6666_s15 + $0x280] sm:$0xf]  ;;  %v6117_v9 = vld [vmem:[%s6666_s15 + $0x28c] sm:$0xf0]  ;;  %v4970_v13 = vor.u32 %v6085_v6, %v4969_v4  ;;  %2367 = vmatpush.bf16.msra.mxu3 %v5242_v5  ;;  %v5019_v1 = vld [vmem:[%s6666_s15 + $0x1f0] sm:$0xf0]  ;;  %v1676_v4 = vunpack.c.l.b16 %v1533_v60 }
 0x18d   : > { %v5225_v10 = vld [vmem:[%s6666_s15 + $0x380] sm:$0xf]  ;;  %v6149_v11 = vld [vmem:[%s6666_s15 + $0x38c] sm:$0xf0]  ;;  %v5098_v14 = vor.u32 %v6117_v9, %v5097_v8  ;;  %2329 = vmatpush.bf16.msra.mxu0 %v4842_v12  ;;  %v6127_v2 = vld [vmem:[%s6666_s15 + $0x2e4] sm:$0xf] }
 0x18e   : > { %v4825_v15 = vld [vmem:[%s6666_s15 + $0x60] sm:$0xf]  ;;  %v6049_v16 = vld [vmem:[%s6666_s15 + $0x6c] sm:$0xf0]  ;;  %v5226_v18 = vor.u32 %v6149_v11, %v5225_v10  ;;  %2342 = vmatpush.bf16.msra.mxu1 %v4970_v13  ;;  %v5147_v3 = vld [vmem:[%s6666_s15 + $0x2f0] sm:$0xf0]  ;;  %v1677_v11 = vunpack.c.h.b16 %v1533_v60  ;;  %v4894_v13 = vor.u32 %v6063_v52, %v4891_v62 }
 0x18f   : > { %v4953_v17 = vld [vmem:[%s6666_s15 + $0x160] sm:$0xf]  ;;  %v6081_v19 = vld [vmem:[%s6666_s15 + $0x16c] sm:$0xf0]  ;;  %v4826_v25 = vor.u32 %v6049_v16, %v4825_v15  ;;  %2355 = vmatpush.bf16.msra.mxu2 %v5098_v14  ;;  %v6159_v8 = vld [vmem:[%s6666_s15 + $0x3e4] sm:$0xf]  ;;  %v5022_v15 = vor.u32 %v6095_v63, %v5019_v1  ;;  %v5150_v16 = vor.u32 %v6127_v2, %v5147_v3 }
 0x190   : > { %v5081_v20 = vld [vmem:[%s6666_s15 + $0x260] sm:$0xf]  ;;  %v6113_v22 = vld [vmem:[%s6666_s15 + $0x26c] sm:$0xf0]  ;;  %v4954_v26 = vor.u32 %v6081_v19, %v4953_v17  ;;  %2368 = vmatpush.bf16.msra.mxu3 %v5226_v18  ;;  %v5275_v9 = vld [vmem:[%s6666_s15 + $0x3f0] sm:$0xf0] }
 0x191   : > { %v5209_v23 = vld [vmem:[%s6666_s15 + $0x360] sm:$0xf]  ;;  %v6145_v24 = vld [vmem:[%s6666_s15 + $0x36c] sm:$0xf0]  ;;  %v5082_v28 = vor.u32 %v6113_v22, %v5081_v20  ;;  %2330 = vmatpush.bf16.msra.mxu0 %v4826_v25  ;;  %v6059_v17 = vld [vmem:[%s6666_s15 + $0xc4] sm:$0xf]  ;;  %v5278_v20 = vor.u32 %v6159_v8, %v5275_v9  ;;  %v7421_v22 = vpack.c.b16 %v1676_v4, %v1676_v4 }
 0x192   : > { %v4809_v29 = vld [vmem:[%s6666_s15 + $0x40] sm:$0xf]  ;;  %v6045_v31 = vld [vmem:[%s6666_s15 + $0x4c] sm:$0xf0]  ;;  %v5210_v33 = vor.u32 %v6145_v24, %v5209_v23  ;;  %2343 = vmatpush.bf16.msra.mxu1 %v4954_v26  ;;  %v4875_v18 = vld [vmem:[%s6666_s15 + $0xd0] sm:$0xf0] }
 0x193   : > { %v4937_v32 = vld [vmem:[%s6666_s15 + $0x140] sm:$0xf]  ;;  %v6077_v35 = vld [vmem:[%s6666_s15 + $0x14c] sm:$0xf0]  ;;  %v4810_v36 = vor.u32 %v6045_v31, %v4809_v29  ;;  %2356 = vmatpush.bf16.msra.mxu2 %v5082_v28  ;;  %v6091_v19 = vld [vmem:[%s6666_s15 + $0x1c4] sm:$0xf]  ;;  %v7428_v28 = vpack.c.b16 %v1677_v11, %v1677_v11 }
 0x194   : > { %v5065_v30 = vld [vmem:[%s6666_s15 + $0x240] sm:$0xf]  ;;  %v6109_v34 = vld [vmem:[%s6666_s15 + $0x24c] sm:$0xf0]  ;;  %v4938_v37 = vor.u32 %v6077_v35, %v4937_v32  ;;  %2369 = vmatpush.bf16.msra.mxu3 %v5210_v33  ;;  %v5003_v23 = vld [vmem:[%s6666_s15 + $0x1d0] sm:$0xf0]  ;;  %v4878_v32 = vor.u32 %v6059_v17, %v4875_v18 }
 0x195   : > { %v5193_v7 = vld [vmem:[%s6666_s15 + $0x340] sm:$0xf]  ;;  %v6141_v21 = vld [vmem:[%s6666_s15 + $0x34c] sm:$0xf0]  ;;  %v5066_v38 = vor.u32 %v6109_v34, %v5065_v30  ;;  %2331 = vmatpush.bf16.msra.mxu0 %v4810_v36  ;;  %v6123_v24 = vld [vmem:[%s6666_s15 + $0x2c4] sm:$0xf]  ;;  %v5006_v35 = vor.u32 %v6091_v19, %v5003_v23 }
 0x196   : > { %v4793_v39 = vld [vmem:[%s6666_s15 + $0x20] sm:$0xf]  ;;  %v6041_v40 = vld [vmem:[%s6666_s15 + $0x2c] sm:$0xf0]  ;;  %v5194_v42 = vor.u32 %v6141_v21, %v5193_v7  ;;  %2344 = vmatpush.bf16.msra.mxu1 %v4938_v37  ;;  %v5131_v25 = vld [vmem:[%s6666_s15 + $0x2d0] sm:$0xf0] }
 0x197   : > { %v4921_v41 = vld [vmem:[%s6666_s15 + $0x120] sm:$0xf]  ;;  %v6073_v43 = vld [vmem:[%s6666_s15 + $0x12c] sm:$0xf0]  ;;  %v4794_v50 = vor.u32 %v6041_v40, %v4793_v39  ;;  %2357 = vmatpush.bf16.msra.mxu2 %v5066_v38  ;;  %v6155_v29 = vld [vmem:[%s6666_s15 + $0x3c4] sm:$0xf]  ;;  %v5134_v30 = vor.u32 %v6123_v24, %v5131_v25 }
 0x198   : > { %v5049_v44 = vld [vmem:[%s6666_s15 + $0x220] sm:$0xf]  ;;  %v6105_v45 = vld [vmem:[%s6666_s15 + $0x22c] sm:$0xf0]  ;;  %v4922_v55 = vor.u32 %v6073_v43, %v4921_v41  ;;  %2370 = vmatpush.bf16.msra.mxu3 %v5194_v42  ;;  %v5259_v31 = vld [vmem:[%s6666_s15 + $0x3d0] sm:$0xf0] }
 0x199   : > { %v5177_v47 = vld [vmem:[%s6666_s15 + $0x320] sm:$0xf]  ;;  %v6137_v48 = vld [vmem:[%s6666_s15 + $0x32c] sm:$0xf0]  ;;  %v5050_v57 = vor.u32 %v6105_v45, %v5049_v44  ;;  %2332 = vmatpush.bf16.msra.mxu0 %v4794_v50  ;;  %v6055_v34 = vld [vmem:[%s6666_s15 + $0xa4] sm:$0xf]  ;;  %v5262_v36 = vor.u32 %v6155_v29, %v5259_v31 }
 0x19a   : > { %v4777_v49 = vld [vmem:[%s6666_s15] sm:$0xf]  ;;  %v6037_v51 = vld [vmem:[%s6666_s15 + $0xc] sm:$0xf0]  ;;  %v5178_v61 = vor.u32 %v6137_v48, %v5177_v47  ;;  %2345 = vmatpush.bf16.msra.mxu1 %v4922_v55  ;;  %v4859_v7 = vld [vmem:[%s6666_s15 + $0xb0] sm:$0xf0] }
 0x19b   : > { %v4905_v53 = vld [vmem:[%s6666_s15 + $0x100] sm:$0xf]  ;;  %v6069_v54 = vld [vmem:[%s6666_s15 + $0x10c] sm:$0xf0]  ;;  %v4778_v0 = vor.u32 %v6037_v51, %v4777_v49  ;;  %2358 = vmatpush.bf16.msra.mxu2 %v5050_v57  ;;  %v6087_v21 = vld [vmem:[%s6666_s15 + $0x1a4] sm:$0xf]  ;;  %v4862_v42 = vor.u32 %v6055_v34, %v4859_v7 }
 0x19c   : > { %v5033_v58 = vld [vmem:[%s6666_s15 + $0x200] sm:$0xf]  ;;  %v6101_v46 = vld [vmem:[%s6666_s15 + $0x20c] sm:$0xf0]  ;;  %v4906_v5 = vor.u32 %v6069_v54, %v4905_v53  ;;  %2371 = vmatpush.bf16.msra.mxu3 %v5178_v61  ;;  %v4987_v37 = vld [vmem:[%s6666_s15 + $0x1b0] sm:$0xf0] }
 0x19d   : > { %v5161_v56 = vld [vmem:[%s6666_s15 + $0x300] sm:$0xf]  ;;  %v6133_v27 = vld [vmem:[%s6666_s15 + $0x30c] sm:$0xf0]  ;;  %v5034_v6 = vor.u32 %v6101_v46, %v5033_v58  ;;  %2333 = vmatpush.bf16.msra.mxu0 %v4778_v0  ;;  %v6119_v38 = vld [vmem:[%s6666_s15 + $0x2a4] sm:$0xf]  ;;  %v4990_v43 = vor.u32 %v6087_v21, %v4987_v37 }
 0x19e   : > { %v1532_v59 = vld [vmem:[#allocation2] sm:$0xff]  ;;  %v5162_v12 = vor.u32 %v6133_v27, %v5161_v56  ;;  %2346 = vmatpush.bf16.msra.mxu1 %v4906_v5  ;;  %v5115_v39 = vld [vmem:[%s6666_s15 + $0x2b0] sm:$0xf0] }
 0x19f   : > { %v1674_v10 = vunpack.c.l.b16 %v1532_v59  ;;  %v1675_v14 = vunpack.c.h.b16 %v1532_v59  ;;  %2359 = vmatpush.bf16.msra.mxu2 %v5034_v6  ;;  %v6151_v40 = vld [vmem:[%s6666_s15 + $0x3a4] sm:$0xf]  ;;  %v5243_v41 = vld [vmem:[%s6666_s15 + $0x3b0] sm:$0xf0]  ;;  %v5118_v44 = vor.u32 %v6119_v38, %v5115_v39 }
 0x1a0   : > { %2372 = vmatpush.bf16.msra.mxu3 %v5162_v12  ;;  %v6051_v45 = vld [vmem:[%s6666_s15 + $0x84] sm:$0xf]  ;;  %v4843_v47 = vld [vmem:[%s6666_s15 + $0x90] sm:$0xf0]  ;;  %v5246_v49 = vor.u32 %v6151_v40, %v5243_v41 }
 0x1a1   : > { %v7426_v26 = vpack.c.b16 %v1674_v10, %v1674_v10  ;;  %2378 = vmatpush.bf16.msrb.mxu0 %v4894_v13  ;;  %v7432_v33 = vpack.c.b16 %v1675_v14, %v1675_v14  ;;  %v6083_v48 = vld [vmem:[%s6666_s15 + $0x184] sm:$0xf]  ;;  %v4971_v50 = vld [vmem:[%s6666_s15 + $0x190] sm:$0xf0]  ;;  %v4846_v57 = vor.u32 %v6051_v45, %v4843_v47  ;;  %v6098_v47 = vld [vmem:[%s6666_s15 + $0x1f4] sm:$0xf0] }
 0x1a2   : > { %2391 = vmatpush.bf16.msrb.mxu1 %v5022_v15  ;;  %2360 = vmatmul.bf16.vlgmr.msra.gmra.mxu2 %v7421_v22  ;;  %v6115_v51 = vld [vmem:[%s6666_s15 + $0x284] sm:$0xf]  ;;  %v5099_v53 = vld [vmem:[%s6666_s15 + $0x290] sm:$0xf0]  ;;  %v4974_v58 = vor.u32 %v6083_v48, %v4971_v50  ;;  %v5153_v48 = vld [vmem:[%s6666_s15 + $0x2e8] sm:$0xf] }
 0x1a3   : > { %2404 = vmatpush.bf16.msrb.mxu2 %v5150_v16  ;;  %2334 = vmatmul.bf16.vlgmr.msra.gmra.mxu0 %v7426_v26  ;;  %v6147_v54 = vld [vmem:[%s6666_s15 + $0x384] sm:$0xf]  ;;  %v5227_v55 = vld [vmem:[%s6666_s15 + $0x390] sm:$0xf0]  ;;  %v5102_v46 = vor.u32 %v6115_v51, %v5099_v53  ;;  %v5281_v53 = vld [vmem:[%s6666_s15 + $0x3e8] sm:$0xf] }
 0x1a4   : > { %2417 = vmatpush.bf16.msrb.mxu3 %v5278_v20  ;;  %2347 = vmatmul.bf16.vlgmr.msra.gmra.mxu1 %v7432_v33  ;;  %v6047_v60 = vld [vmem:[%s6666_s15 + $0x64] sm:$0xf]  ;;  %v4827_v61 = vld [vmem:[%s6666_s15 + $0x70] sm:$0xf0]  ;;  %v5230_v27 = vor.u32 %v6147_v54, %v5227_v55  ;;  %v6162_v54 = vld [vmem:[%s6666_s15 + $0x3f4] sm:$0xf0] }
 0x1a5   : > { %2373 = vmatmul.bf16.vlgmr.msra.gmra.mxu3 %v7428_v28  ;;  %2379 = vmatpush.bf16.msrb.mxu0 %v4878_v32  ;;  %v6079_v56 = vld [vmem:[%s6666_s15 + $0x164] sm:$0xf]  ;;  %v4955_v59 = vld [vmem:[%s6666_s15 + $0x170] sm:$0xf0]  ;;  %v4830_v1 = vor.u32 %v6047_v60, %v4827_v61  ;;  %v4881_v60 = vld [vmem:[%s6666_s15 + $0xc8] sm:$0xf] }
 0x1a6   : > { %2392 = vmatpush.bf16.msrb.mxu1 %v5006_v35  ;;  %v6111_v52 = vld [vmem:[%s6666_s15 + $0x264] sm:$0xf]  ;;  %v5083_v62 = vld [vmem:[%s6666_s15 + $0x270] sm:$0xf0]  ;;  %v4958_v2 = vor.u32 %v6079_v56, %v4955_v59  ;;  %v6062_v61 = vld [vmem:[%s6666_s15 + $0xd4] sm:$0xf0] }
 0x1a7   : > { %2405 = vmatpush.bf16.msrb.mxu2 %v5134_v30  ;;  %v6143_v63 = vld [vmem:[%s6666_s15 + $0x364] sm:$0xf]  ;;  %v5211_v0 = vld [vmem:[%s6666_s15 + $0x370] sm:$0xf0]  ;;  %v5086_v3 = vor.u32 %v6111_v52, %v5083_v62  ;;  %v5009_v56 = vld [vmem:[%s6666_s15 + $0x1c8] sm:$0xf] }
 0x1a8   : > { %2418 = vmatpush.bf16.msrb.mxu3 %v5262_v36  ;;  %v6043_v4 = vld [vmem:[%s6666_s15 + $0x44] sm:$0xf]  ;;  %v4811_v5 = vld [vmem:[%s6666_s15 + $0x50] sm:$0xf0]  ;;  %v5214_v8 = vor.u32 %v6143_v63, %v5211_v0  ;;  %v6094_v59 = vld [vmem:[%s6666_s15 + $0x1d4] sm:$0xf0] }
 0x1a9   : > { %2380 = vmatpush.bf16.msrb.mxu0 %v4862_v42  ;;  %v6075_v6 = vld [vmem:[%s6666_s15 + $0x144] sm:$0xf]  ;;  %v4939_v9 = vld [vmem:[%s6666_s15 + $0x150] sm:$0xf0]  ;;  %v4814_v14 = vor.u32 %v6043_v4, %v4811_v5  ;;  %v4897_v42 = vld [vmem:[%s6666_s15 + $0xe8] sm:$0xf] }
 0x1aa   : > { %2393 = vmatpush.bf16.msrb.mxu1 %v4990_v43  ;;  %v6107_v10 = vld [vmem:[%s6666_s15 + $0x244] sm:$0xf]  ;;  %v5067_v11 = vld [vmem:[%s6666_s15 + $0x250] sm:$0xf0]  ;;  %v4942_v15 = vor.u32 %v6075_v6, %v4939_v9  ;;  %v6066_v43 = vld [vmem:[%s6666_s15 + $0xf4] sm:$0xf0] }
 0x1ab   : > { %2406 = vmatpush.bf16.msrb.mxu2 %v5118_v44  ;;  %v6139_v12 = vld [vmem:[%s6666_s15 + $0x344] sm:$0xf]  ;;  %v5195_v13 = vld [vmem:[%s6666_s15 + $0x350] sm:$0xf0]  ;;  %v5070_v16 = vor.u32 %v6107_v10, %v5067_v11  ;;  %v5025_v44 = vld [vmem:[%s6666_s15 + $0x1e8] sm:$0xf] }
 0x1ac   : > { %2419 = vmatpush.bf16.msrb.mxu3 %v5246_v49  ;;  %v6039_v17 = vld [vmem:[%s6666_s15 + $0x24] sm:$0xf]  ;;  %v4795_v18 = vld [vmem:[%s6666_s15 + $0x30] sm:$0xf0]  ;;  %v5198_v20 = vor.u32 %v6139_v12, %v5195_v13  ;;  %v6130_v49 = vld [vmem:[%s6666_s15 + $0x2f4] sm:$0xf0] }
 0x1ad   : > { %2381 = vmatpush.bf16.msrb.mxu0 %v4846_v57  ;;  %v6071_v19 = vld [vmem:[%s6666_s15 + $0x124] sm:$0xf]  ;;  %v4923_v23 = vld [vmem:[%s6666_s15 + $0x130] sm:$0xf0]  ;;  %v4798_v32 = vor.u32 %v6039_v17, %v4795_v18  ;;  %v4898_v57 = vor.u32 %v6066_v43, %v4897_v42  ;;  %v5137_v52 = vld [vmem:[%s6666_s15 + $0x2c8] sm:$0xf] }
 0x1ae   : > { %2394 = vmatpush.bf16.msrb.mxu1 %v4974_v58  ;;  %v6103_v24 = vld [vmem:[%s6666_s15 + $0x224] sm:$0xf]  ;;  %v5051_v25 = vld [vmem:[%s6666_s15 + $0x230] sm:$0xf0]  ;;  %v4926_v34 = vor.u32 %v6071_v19, %v4923_v23  ;;  %v5026_v58 = vor.u32 %v6098_v47, %v5025_v44  ;;  %v6126_v62 = vld [vmem:[%s6666_s15 + $0x2d4] sm:$0xf0] }
 0x1af   : > { %2407 = vmatpush.bf16.msrb.mxu2 %v5102_v46  ;;  %v6135_v29 = vld [vmem:[%s6666_s15 + $0x324] sm:$0xf]  ;;  %v5179_v31 = vld [vmem:[%s6666_s15 + $0x330] sm:$0xf0]  ;;  %v5054_v7 = vor.u32 %v6103_v24, %v5051_v25  ;;  %v5154_v46 = vor.u32 %v6130_v49, %v5153_v48  ;;  %v5265_v63 = vld [vmem:[%s6666_s15 + $0x3c8] sm:$0xf] }
 0x1b0   : > { %2420 = vmatpush.bf16.msrb.mxu3 %v5230_v27  ;;  %v6035_v35 = vld [vmem:[%s6666_s15 + $0x4] sm:$0xf]  ;;  %v4779_v30 = vld [vmem:[%s6666_s15 + $0x10] sm:$0xf0]  ;;  %v5182_v38 = vor.u32 %v6135_v29, %v5179_v31  ;;  %v5282_v27 = vor.u32 %v6162_v54, %v5281_v53  ;;  %v6158_v0 = vld [vmem:[%s6666_s15 + $0x3d4] sm:$0xf0] }
 0x1b1   : > { %2382 = vmatpush.bf16.msrb.mxu0 %v4830_v1  ;;  %v6067_v21 = vld [vmem:[%s6666_s15 + $0x104] sm:$0xf]  ;;  %v4907_v36 = vld [vmem:[%s6666_s15 + $0x110] sm:$0xf0]  ;;  %v4782_v45 = vor.u32 %v6035_v35, %v4779_v30  ;;  %v4882_v1 = vor.u32 %v6062_v61, %v4881_v60  ;;  %v4865_v4 = vld [vmem:[%s6666_s15 + $0xa8] sm:$0xf] }
 0x1b2   : > { %2395 = vmatpush.bf16.msrb.mxu1 %v4958_v2  ;;  %v6099_v37 = vld [vmem:[%s6666_s15 + $0x204] sm:$0xf]  ;;  %v5035_v39 = vld [vmem:[%s6666_s15 + $0x210] sm:$0xf0]  ;;  %v4910_v50 = vor.u32 %v6067_v21, %v4907_v36  ;;  %v5010_v2 = vor.u32 %v6094_v59, %v5009_v56  ;;  %v6058_v5 = vld [vmem:[%s6666_s15 + $0xb4] sm:$0xf0] }
 0x1b3   : > { %2408 = vmatpush.bf16.msrb.mxu2 %v5086_v3  ;;  %v6131_v40 = vld [vmem:[%s6666_s15 + $0x304] sm:$0xf]  ;;  %v5163_v41 = vld [vmem:[%s6666_s15 + $0x310] sm:$0xf0]  ;;  %v5038_v51 = vor.u32 %v6099_v37, %v5035_v39  ;;  %v5138_v3 = vor.u32 %v6126_v62, %v5137_v52  ;;  %v4993_v6 = vld [vmem:[%s6666_s15 + $0x1a8] sm:$0xf] }
 0x1b4   : > { %2421 = vmatpush.bf16.msrb.mxu3 %v5214_v8  ;;  %v5166_v55 = vor.u32 %v6131_v40, %v5163_v41  ;;  %v5266_v8 = vor.u32 %v6158_v0, %v5265_v63  ;;  %v6090_v9 = vld [vmem:[%s6666_s15 + $0x1b4] sm:$0xf0]  ;;  %v5121_v10 = vld [vmem:[%s6666_s15 + $0x2a8] sm:$0xf] }
 0x1b5   : > { %2383 = vmatpush.bf16.msrb.mxu0 %v4814_v14  ;;  %v6122_v11 = vld [vmem:[%s6666_s15 + $0x2b4] sm:$0xf0]  ;;  %v5249_v12 = vld [vmem:[%s6666_s15 + $0x3a8] sm:$0xf]  ;;  %v4866_v14 = vor.u32 %v6058_v5, %v4865_v4 }
 0x1b6   : > { %2396 = vmatpush.bf16.msrb.mxu1 %v4942_v15  ;;  %v6154_v13 = vld [vmem:[%s6666_s15 + $0x3b4] sm:$0xf0]  ;;  %v4994_v15 = vor.u32 %v6090_v9, %v4993_v6  ;;  %v4849_v17 = vld [vmem:[%s6666_s15 + $0x88] sm:$0xf] }
 0x1b7   : > { %2409 = vmatpush.bf16.msrb.mxu2 %v5070_v16  ;;  %v5122_v16 = vor.u32 %v6122_v11, %v5121_v10  ;;  %v6054_v18 = vld [vmem:[%s6666_s15 + $0x94] sm:$0xf0]  ;;  %v4977_v19 = vld [vmem:[%s6666_s15 + $0x188] sm:$0xf] }
 0x1b8   : > { %2422 = vmatpush.bf16.msrb.mxu3 %v5198_v20  ;;  %v5250_v20 = vor.u32 %v6154_v13, %v5249_v12  ;;  %v6086_v23 = vld [vmem:[%s6666_s15 + $0x194] sm:$0xf0]  ;;  %v5105_v24 = vld [vmem:[%s6666_s15 + $0x288] sm:$0xf] }
 0x1b9   : > { %2384 = vmatpush.bf16.msrb.mxu0 %v4798_v32  ;;  %v6118_v25 = vld [vmem:[%s6666_s15 + $0x294] sm:$0xf0]  ;;  %v5233_v29 = vld [vmem:[%s6666_s15 + $0x388] sm:$0xf]  ;;  %v4850_v32 = vor.u32 %v6054_v18, %v4849_v17  ;;  %v4978_v35 = vor.u32 %v6086_v23, %v4977_v19  ;;  %v5027_v18 = vld [vmem:[%s6666_s15 + $0x1f8] sm:$0xf0] }
 0x1ba   : > { %2397 = vmatpush.bf16.msrb.mxu1 %v4926_v34  ;;  %v6150_v31 = vld [vmem:[%s6666_s15 + $0x394] sm:$0xf0]  ;;  %v5106_v30 = vor.u32 %v6118_v25, %v5105_v24  ;;  %v4833_v34 = vld [vmem:[%s6666_s15 + $0x68] sm:$0xf]  ;;  %v6128_v19 = vld [vmem:[%s6666_s15 + $0x2ec] sm:$0xf] }
 0x1bb   : > { %2410 = vmatpush.bf16.msrb.mxu2 %v5054_v7  ;;  %v6050_v7 = vld [vmem:[%s6666_s15 + $0x74] sm:$0xf0]  ;;  %v4961_v21 = vld [vmem:[%s6666_s15 + $0x168] sm:$0xf]  ;;  %v5234_v36 = vor.u32 %v6150_v31, %v5233_v29  ;;  %v6160_v25 = vld [vmem:[%s6666_s15 + $0x3ec] sm:$0xf] }
 0x1bc   : > { %2423 = vmatpush.bf16.msrb.mxu3 %v5182_v38  ;;  %v6082_v37 = vld [vmem:[%s6666_s15 + $0x174] sm:$0xf0]  ;;  %v5089_v38 = vld [vmem:[%s6666_s15 + $0x268] sm:$0xf]  ;;  %v4834_v42 = vor.u32 %v6050_v7, %v4833_v34  ;;  %v5283_v29 = vld [vmem:[%s6666_s15 + $0x3f8] sm:$0xf0] }
 0x1bd   : > { %2385 = vmatpush.bf16.msrb.mxu0 %v4782_v45  ;;  %v6114_v39 = vld [vmem:[%s6666_s15 + $0x274] sm:$0xf0]  ;;  %v5217_v40 = vld [vmem:[%s6666_s15 + $0x368] sm:$0xf]  ;;  %v4962_v43 = vor.u32 %v6082_v37, %v4961_v21  ;;  %v6060_v34 = vld [vmem:[%s6666_s15 + $0xcc] sm:$0xf] }
 0x1be   : > { %2398 = vmatpush.bf16.msrb.mxu1 %v4910_v50  ;;  %v6146_v41 = vld [vmem:[%s6666_s15 + $0x374] sm:$0xf0]  ;;  %v5090_v44 = vor.u32 %v6114_v39, %v5089_v38  ;;  %v4817_v45 = vld [vmem:[%s6666_s15 + $0x48] sm:$0xf]  ;;  %v4883_v7 = vld [vmem:[%s6666_s15 + $0xd8] sm:$0xf0] }
 0x1bf   : > { %2411 = vmatpush.bf16.msrb.mxu2 %v5038_v51  ;;  %v6046_v47 = vld [vmem:[%s6666_s15 + $0x54] sm:$0xf0]  ;;  %v4945_v48 = vld [vmem:[%s6666_s15 + $0x148] sm:$0xf]  ;;  %v5218_v49 = vor.u32 %v6146_v41, %v5217_v40  ;;  %v6092_v21 = vld [vmem:[%s6666_s15 + $0x1cc] sm:$0xf] }
 0x1c0   : > { %2424 = vmatpush.bf16.msrb.mxu3 %v5166_v55  ;;  %2386 = vmatmul.bf16.vlgmr.msrb.gmra.mxu0 %v7426_v26  ;;  %v6078_v50 = vld [vmem:[%s6666_s15 + $0x154] sm:$0xf0]  ;;  %v5073_v51 = vld [vmem:[%s6666_s15 + $0x248] sm:$0xf]  ;;  %v5011_v37 = vld [vmem:[%s6666_s15 + $0x1d8] sm:$0xf0] }
 0x1c1   : > { %2430 = vmatpush.bf16.msra.mxu0 %v4898_v57  ;;  %2399 = vmatmul.bf16.vlgmr.msrb.gmra.mxu1 %v7432_v33  ;;  %v6110_v53 = vld [vmem:[%s6666_s15 + $0x254] sm:$0xf0]  ;;  %v5201_v54 = vld [vmem:[%s6666_s15 + $0x348] sm:$0xf]  ;;  %v4818_v57 = vor.u32 %v6046_v47, %v4817_v45  ;;  %v6124_v38 = vld [vmem:[%s6666_s15 + $0x2cc] sm:$0xf] }
 0x1c2   : > { %2443 = vmatpush.bf16.msra.mxu1 %v5026_v58  ;;  %2412 = vmatmul.bf16.vlgmr.msrb.gmra.mxu2 %v7421_v22  ;;  %v6142_v55 = vld [vmem:[%s6666_s15 + $0x354] sm:$0xf0]  ;;  %v4946_v58 = vor.u32 %v6078_v50, %v4945_v48  ;;  %v4801_v60 = vld [vmem:[%s6666_s15 + $0x28] sm:$0xf]  ;;  %v5139_v39 = vld [vmem:[%s6666_s15 + $0x2d8] sm:$0xf0] }
 0x1c3   : > { %2456 = vmatpush.bf16.msra.mxu2 %v5154_v46  ;;  %2425 = vmatmul.bf16.vlgmr.msrb.gmra.mxu3 %v7428_v28  ;;  %v5074_v46 = vor.u32 %v6110_v53, %v5073_v51  ;;  %v6042_v61 = vld [vmem:[%s6666_s15 + $0x34] sm:$0xf0]  ;;  %v4929_v56 = vld [vmem:[%s6666_s15 + $0x128] sm:$0xf]  ;;  %v6156_v40 = vld [vmem:[%s6666_s15 + $0x3cc] sm:$0xf] }
 0x1c4   : > { %2469 = vmatpush.bf16.msra.mxu3 %v5282_v27  ;;  %v5202_v27 = vor.u32 %v6142_v55, %v5201_v54  ;;  %v6074_v59 = vld [vmem:[%s6666_s15 + $0x134] sm:$0xf0]  ;;  %v5057_v52 = vld [vmem:[%s6666_s15 + $0x228] sm:$0xf]  ;;  %v5267_v41 = vld [vmem:[%s6666_s15 + $0x3d8] sm:$0xf0] }
 0x1c5   : > { %2431 = vmatpush.bf16.msra.mxu0 %v4882_v1  ;;  %v6106_v62 = vld [vmem:[%s6666_s15 + $0x234] sm:$0xf0]  ;;  %v5185_v63 = vld [vmem:[%s6666_s15 + $0x328] sm:$0xf]  ;;  %v4802_v1 = vor.u32 %v6042_v61, %v4801_v60  ;;  %v4930_v4 = vor.u32 %v6074_v59, %v4929_v56  ;;  %v6056_v45 = vld [vmem:[%s6666_s15 + $0xac] sm:$0xf] }
 0x1c6   : > { %2444 = vmatpush.bf16.msra.mxu1 %v5010_v2  ;;  %v6138_v0 = vld [vmem:[%s6666_s15 + $0x334] sm:$0xf0]  ;;  %v4785_v2 = vld [vmem:[%s6666_s15 + $0x8] sm:$0xf]  ;;  %v5058_v5 = vor.u32 %v6106_v62, %v5057_v52  ;;  %v4867_v47 = vld [vmem:[%s6666_s15 + $0xb8] sm:$0xf0] }
 0x1c7   : > { %2457 = vmatpush.bf16.msra.mxu2 %v5138_v3  ;;  %v6038_v3 = vld [vmem:[%s6666_s15 + $0x14] sm:$0xf0]  ;;  %v4913_v6 = vld [vmem:[%s6666_s15 + $0x108] sm:$0xf]  ;;  %v5186_v10 = vor.u32 %v6138_v0, %v5185_v63  ;;  %v6088_v48 = vld [vmem:[%s6666_s15 + $0x1ac] sm:$0xf] }
 0x1c8   : > { %2470 = vmatpush.bf16.msra.mxu3 %v5266_v8  ;;  %v6070_v8 = vld [vmem:[%s6666_s15 + $0x114] sm:$0xf0]  ;;  %v5041_v9 = vld [vmem:[%s6666_s15 + $0x208] sm:$0xf]  ;;  %v4786_v17 = vor.u32 %v6038_v3, %v4785_v2  ;;  %v4995_v50 = vld [vmem:[%s6666_s15 + $0x1b8] sm:$0xf0] }
 0x1c9   : > { %2432 = vmatpush.bf16.msra.mxu0 %v4866_v14  ;;  %v6102_v11 = vld [vmem:[%s6666_s15 + $0x214] sm:$0xf0]  ;;  %v5169_v12 = vld [vmem:[%s6666_s15 + $0x308] sm:$0xf]  ;;  %v6064_v14 = vld [vmem:[%s6666_s15 + $0xec] sm:$0xf]  ;;  %v4914_v23 = vor.u32 %v6070_v8, %v4913_v6 }
 0x1ca   : > { %2445 = vmatpush.bf16.msra.mxu1 %v4994_v15  ;;  %v6134_v13 = vld [vmem:[%s6666_s15 + $0x314] sm:$0xf0]  ;;  %v4899_v15 = vld [vmem:[%s6666_s15 + $0xf8] sm:$0xf0]  ;;  %v5042_v24 = vor.u32 %v6102_v11, %v5041_v9  ;;  %v6120_v51 = vld [vmem:[%s6666_s15 + $0x2ac] sm:$0xf] }
 0x1cb   : > { %2458 = vmatpush.bf16.msra.mxu2 %v5122_v16  ;;  %v6096_v16 = vld [vmem:[%s6666_s15 + $0x1ec] sm:$0xf]  ;;  %v5170_v31 = vor.u32 %v6134_v13, %v5169_v12  ;;  %v5123_v53 = vld [vmem:[%s6666_s15 + $0x2b8] sm:$0xf0] }
 0x1cc   : > { %2471 = vmatpush.bf16.msra.mxu3 %v5250_v20  ;;  %v5155_v20 = vld [vmem:[%s6666_s15 + $0x2f8] sm:$0xf0]  ;;  %v6152_v54 = vld [vmem:[%s6666_s15 + $0x3ac] sm:$0xf] }
 0x1cd   : > { %2433 = vmatpush.bf16.msra.mxu0 %v4850_v32  ;;  %v4902_v32 = vor.u32 %v6064_v14, %v4899_v15  ;;  %v5251_v55 = vld [vmem:[%s6666_s15 + $0x3b8] sm:$0xf0]  ;;  %v6052_v60 = vld [vmem:[%s6666_s15 + $0x8c] sm:$0xf] }
 0x1ce   : > { %2446 = vmatpush.bf16.msra.mxu1 %v4978_v35  ;;  %v5030_v35 = vor.u32 %v6096_v16, %v5027_v18  ;;  %v4851_v61 = vld [vmem:[%s6666_s15 + $0x98] sm:$0xf0]  ;;  %v6084_v56 = vld [vmem:[%s6666_s15 + $0x18c] sm:$0xf] }
 0x1cf   : > { %2459 = vmatpush.bf16.msra.mxu2 %v5106_v30  ;;  %v5158_v30 = vor.u32 %v6128_v19, %v5155_v20  ;;  %v4979_v59 = vld [vmem:[%s6666_s15 + $0x198] sm:$0xf0]  ;;  %v6116_v52 = vld [vmem:[%s6666_s15 + $0x28c] sm:$0xf] }
 0x1d0   : > { %2472 = vmatpush.bf16.msra.mxu3 %v5234_v36  ;;  %v5286_v36 = vor.u32 %v6160_v25, %v5283_v29  ;;  %v5107_v62 = vld [vmem:[%s6666_s15 + $0x298] sm:$0xf0]  ;;  %v6148_v63 = vld [vmem:[%s6666_s15 + $0x38c] sm:$0xf]  ;;  %v4982_v2 = vor.u32 %v6084_v56, %v4979_v59 }
 0x1d1   : > { %2434 = vmatpush.bf16.msra.mxu0 %v4834_v42  ;;  %v4886_v42 = vor.u32 %v6060_v34, %v4883_v7  ;;  %v5235_v0 = vld [vmem:[%s6666_s15 + $0x398] sm:$0xf0]  ;;  %v5110_v3 = vor.u32 %v6116_v52, %v5107_v62  ;;  %v6080_v6 = vld [vmem:[%s6666_s15 + $0x16c] sm:$0xf] }
 0x1d2   : > { %2447 = vmatpush.bf16.msra.mxu1 %v4962_v43  ;;  %v5014_v43 = vor.u32 %v6092_v21, %v5011_v37  ;;  %v5238_v8 = vor.u32 %v6148_v63, %v5235_v0  ;;  %v4963_v9 = vld [vmem:[%s6666_s15 + $0x178] sm:$0xf0]  ;;  %v6144_v12 = vld [vmem:[%s6666_s15 + $0x36c] sm:$0xf] }
 0x1d3   : > { %2460 = vmatpush.bf16.msra.mxu2 %v5090_v44  ;;  %v5142_v44 = vor.u32 %v6124_v38, %v5139_v39  ;;  %v5091_v11 = vld [vmem:[%s6666_s15 + $0x278] sm:$0xf0]  ;;  %v4966_v15 = vor.u32 %v6080_v6, %v4963_v9  ;;  %v6076_v19 = vld [vmem:[%s6666_s15 + $0x14c] sm:$0xf] }
 0x1d4   : > { %2473 = vmatpush.bf16.msra.mxu3 %v5218_v49  ;;  %v5270_v49 = vor.u32 %v6156_v40, %v5267_v41  ;;  %v5219_v13 = vld [vmem:[%s6666_s15 + $0x378] sm:$0xf0]  ;;  %v6140_v29 = vld [vmem:[%s6666_s15 + $0x34c] sm:$0xf] }
 0x1d5   : > { %2435 = vmatpush.bf16.msra.mxu0 %v4818_v57  ;;  %v4870_v57 = vor.u32 %v6056_v45, %v4867_v47  ;;  %v4819_v18 = vld [vmem:[%s6666_s15 + $0x58] sm:$0xf0]  ;;  %v5222_v20 = vor.u32 %v6144_v12, %v5219_v13  ;;  %v6040_v34 = vld [vmem:[%s6666_s15 + $0x2c] sm:$0xf] }
 0x1d6   : > { %2448 = vmatpush.bf16.msra.mxu1 %v4946_v58  ;;  %v4998_v58 = vor.u32 %v6088_v48, %v4995_v50  ;;  %v5075_v25 = vld [vmem:[%s6666_s15 + $0x258] sm:$0xf0]  ;;  %v6072_v21 = vld [vmem:[%s6666_s15 + $0x12c] sm:$0xf] }
 0x1d7   : > { %2461 = vmatpush.bf16.msra.mxu2 %v5074_v46  ;;  %v5126_v46 = vor.u32 %v6120_v51, %v5123_v53  ;;  %v4803_v7 = vld [vmem:[%s6666_s15 + $0x38] sm:$0xf0]  ;;  %v6104_v38 = vld [vmem:[%s6666_s15 + $0x22c] sm:$0xf] }
 0x1d8   : > { %2474 = vmatpush.bf16.msra.mxu3 %v5202_v27  ;;  %v5254_v27 = vor.u32 %v6152_v54, %v5251_v55  ;;  %v4931_v37 = vld [vmem:[%s6666_s15 + $0x138] sm:$0xf0]  ;;  %v6136_v40 = vld [vmem:[%s6666_s15 + $0x32c] sm:$0xf] }
 0x1d9   : > { %2436 = vmatpush.bf16.msra.mxu0 %v4802_v1  ;;  %v4854_v1 = vor.u32 %v6052_v60, %v4851_v61  ;;  %v5059_v39 = vld [vmem:[%s6666_s15 + $0x238] sm:$0xf0]  ;;  %v6036_v45 = vld [vmem:[%s6666_s15 + $0xc] sm:$0xf]  ;;  %v7627_v61 = vld [vmem:[%s6677_s17] sm:$0xf] }
 0x1da   : > { %2449 = vmatpush.bf16.msra.mxu1 %v4930_v4  ;;  %v6048_v4 = vld [vmem:[%s6666_s15 + $0x6c] sm:$0xf]  ;;  %v5187_v41 = vld [vmem:[%s6666_s15 + $0x338] sm:$0xf0]  ;;  %v1664_v56 = vperm.slane %v7627_v61, 0 }
 0x1db   : > { %2462 = vmatpush.bf16.msra.mxu2 %v5058_v5  ;;  %v4835_v5 = vld [vmem:[%s6666_s15 + $0x78] sm:$0xf0]  ;;  %v6068_v48 = vld [vmem:[%s6666_s15 + $0x10c] sm:$0xf] }
 0x1dc   : > { %2475 = vmatpush.bf16.msra.mxu3 %v5186_v10  ;;  %v6112_v10 = vld [vmem:[%s6666_s15 + $0x26c] sm:$0xf]  ;;  %v4838_v14 = vor.u32 %v6048_v4, %v4835_v5  ;;  %v4787_v47 = vld [vmem:[%s6666_s15 + $0x18] sm:$0xf0] }
 0x1dd   : > { %2437 = vmatpush.bf16.msra.mxu0 %v4786_v17  ;;  %v5094_v16 = vor.u32 %v6112_v10, %v5091_v11  ;;  %v6044_v17 = vld [vmem:[%s6666_s15 + $0x4c] sm:$0xf]  ;;  %v4915_v50 = vld [vmem:[%s6666_s15 + $0x118] sm:$0xf0] }
 0x1de   : > { %2450 = vmatpush.bf16.msra.mxu1 %v4914_v23  ;;  %v4947_v23 = vld [vmem:[%s6666_s15 + $0x158] sm:$0xf0]  ;;  %v6100_v51 = vld [vmem:[%s6666_s15 + $0x20c] sm:$0xf] }
 0x1df   : > { %2463 = vmatpush.bf16.msra.mxu2 %v5042_v24  ;;  %v6108_v24 = vld [vmem:[%s6666_s15 + $0x24c] sm:$0xf]  ;;  %v5043_v53 = vld [vmem:[%s6666_s15 + $0x218] sm:$0xf0] }
 0x1e0   : > { %2476 = vmatpush.bf16.msra.mxu3 %v5170_v31  ;;  %2438 = vmatmul.bf16.vlgmr.msra.gmra.mxu0 %v7426_v26  ;;  %v5203_v31 = vld [vmem:[%s6666_s15 + $0x358] sm:$0xf0]  ;;  %v6132_v54 = vld [vmem:[%s6666_s15 + $0x30c] sm:$0xf] }
 0x1e1   : > { %2482 = vmatpush.bf16.msrb.mxu0 %v4902_v32  ;;  %2451 = vmatmul.bf16.vlgmr.msra.gmra.mxu1 %v7432_v33  ;;  %v4822_v32 = vor.u32 %v6044_v17, %v4819_v18  ;;  %v5171_v55 = vld [vmem:[%s6666_s15 + $0x318] sm:$0xf0]  ;;  %v6539_v18 = vmov 8.0  }
 0x1e2   : > { %2495 = vmatpush.bf16.msrb.mxu1 %v5030_v35  ;;  %2464 = vmatmul.bf16.vlgmr.msra.gmra.mxu2 %v7421_v22  ;;  %v4950_v35 = vor.u32 %v6076_v19, %v4947_v23  ;;  %v5174_v60 = vor.u32 %v6132_v54, %v5171_v55  ;;  %6401 = vrcp.f32 %v6539_v18 }
 0x1e3   : > { %2508 = vmatpush.bf16.msrb.mxu2 %v5158_v30  ;;  %2477 = vmatmul.bf16.vlgmr.msra.gmra.mxu3 %v7428_v28  ;;  %v5078_v30 = vor.u32 %v6108_v24, %v5075_v25  ;;  %v1666_v25 = vperm.slane %v7627_v61, 2 }
 0x1e4   : > { %2521 = vmatpush.bf16.msrb.mxu3 %v5286_v36  ;;  %v5206_v36 = vor.u32 %v6140_v29, %v5203_v31 }
 0x1e5   : > { %2483 = vmatpush.bf16.msrb.mxu0 %v4886_v42  ;;  %v4806_v42 = vor.u32 %v6040_v34, %v4803_v7 }
 0x1e6   : > { %2496 = vmatpush.bf16.msrb.mxu1 %v5014_v43  ;;  %v4934_v43 = vor.u32 %v6072_v21, %v4931_v37 }
 0x1e7   : > { %2509 = vmatpush.bf16.msrb.mxu2 %v5142_v44  ;;  %v5062_v44 = vor.u32 %v6104_v38, %v5059_v39 }
 0x1e8   : > { %2522 = vmatpush.bf16.msrb.mxu3 %v5270_v49  ;;  %v5190_v49 = vor.u32 %v6136_v40, %v5187_v41  ;;  %v6402_v23 = vpop.eup %6401 }
 0x1e9   : > { %2484 = vmatpush.bf16.msrb.mxu0 %v4870_v57  ;;  %v4790_v57 = vor.u32 %v6036_v45, %v4787_v47  ;;  %v2563_v31 = vmul.f32 8.0, %v6402_v23  ;;  %vm2567_vm0 = vweird.f32 %v6402_v23 }
 0x1ea   : > { %2497 = vmatpush.bf16.msrb.mxu1 %v4998_v58  ;;  %v4918_v58 = vor.u32 %v6068_v48, %v4915_v50 }
 0x1eb   : > { %2510 = vmatpush.bf16.msrb.mxu2 %v5126_v46  ;;  %v5046_v46 = vor.u32 %v6100_v51, %v5043_v53  ;;  %v2564_v21 = vsub.f32 1.0, %v2563_v31 }
 0x1ec   : > { %2523 = vmatpush.bf16.msrb.mxu3 %v5254_v27 }
 0x1ed   : > { %2485 = vmatpush.bf16.msrb.mxu0 %v4854_v1 }
 0x1ee   : > { %2498 = vmatpush.bf16.msrb.mxu1 %v4982_v2 }
 0x1ef   : > { %2511 = vmatpush.bf16.msrb.mxu2 %v5110_v3 }
 0x1f0   : > { %2524 = vmatpush.bf16.msrb.mxu3 %v5238_v8 }
 0x1f1   : > { %2486 = vmatpush.bf16.msrb.mxu0 %v4838_v14 }
 0x1f2   : > { %2499 = vmatpush.bf16.msrb.mxu1 %v4966_v15 }
 0x1f3   : > { %2512 = vmatpush.bf16.msrb.mxu2 %v5094_v16 }
 0x1f4   : > { %2525 = vmatpush.bf16.msrb.mxu3 %v5222_v20 }
 0x1f5   : > { %2487 = vmatpush.bf16.msrb.mxu0 %v4822_v32 }
 0x1f6   : > { %2500 = vmatpush.bf16.msrb.mxu1 %v4950_v35 }
 0x1f7   : > { %2513 = vmatpush.bf16.msrb.mxu2 %v5078_v30 }
 0x1f8   : > { %2526 = vmatpush.bf16.msrb.mxu3 %v5206_v36 }
 0x1f9   : > { %2488 = vmatpush.bf16.msrb.mxu0 %v4806_v42  ;;  %v2565_v42 = vmul.f32 %v6402_v23, %v2564_v21 }
 0x1fa   : > { %2501 = vmatpush.bf16.msrb.mxu1 %v4934_v43 }
 0x1fb   : > { %2514 = vmatpush.bf16.msrb.mxu2 %v5062_v44  ;;  %v2566_v50 = vadd.f32 %v6402_v23, %v2565_v42 }
 0x1fc   : > { %2527 = vmatpush.bf16.msrb.mxu3 %v5190_v49 }
 0x1fd   : > { %2489 = vmatpush.bf16.msrb.mxu0 %v4790_v57 }
 0x1fe   : > { %2502 = vmatpush.bf16.msrb.mxu1 %v4918_v58 }
 0x1ff   : > { %2515 = vmatpush.bf16.msrb.mxu2 %v5046_v46  ;;  %v7632_v46 = vsel %vm2567_vm0, %v6402_v23, %v2566_v50 }
 0x200   : > { %2528 = vmatpush.bf16.msrb.mxu3 %v5174_v60  ;;  %2490 = vmatmul.bf16.vlgmr.msrb.gmra.mxu0 %v7426_v26 }
 0x201   : > { %2503 = vmatmul.bf16.vlgmr.msrb.gmra.mxu1 %v7432_v33 }
 0x202   : > { %2516 = vmatmul.bf16.vlgmr.msrb.gmra.mxu2 %v7421_v22  ;;  %v1665_v22 = vperm.slane %v7627_v61, 1 }
 0x203   : > { %2529 = vmatmul.bf16.vlgmr.msrb.gmra.mxu3 %v7428_v28 }
 0x220   : > { %v2335_v27 = vpop.f32.mrf.mxu0 }
 0x221   : > { %v2336_v59 = vadd.f32 %v2335_v27, %v1664_v56  ;;  %v2348_v52 = vpop.f32.mrf.mxu1 }
 0x223   : > { %v2349_v62 = vadd.f32 %v2348_v52, %v2336_v59 }
 0x225   : > { %v2361_v63 = vpop.f32.mrf.mxu2 }
 0x226   : > { %v2362_v0 = vadd.f32 %v2361_v63, %v2349_v62 }
 0x228   : > { %v2374_v1 = vpop.f32.mrf.mxu3  ;;  %v2337_v3 = vpop.f32.mrf.mxu0 }
 0x229   : > { %v2375_v2 = vadd.f32 %v2374_v1, %v2362_v0  ;;  %v2350_v26 = vpop.f32.mrf.mxu1  ;;  %v1667_v3 = vperm.slane %v7627_v61, 3 }
 0x22b   : > { %v2534_v20 = vmax.f32 %v2375_v2, 0.0 }
 0x22d   : > { %v2363_v4 = vpop.f32.mrf.mxu2  ;;  %v2538_v29 = vrot.slane %v2534_v20, 4 }
 0x22f   : > { %v2539_v7 = vadd.f32 %v2538_v29, %v2534_v20 }
 0x230   : > { %v2376_v33 = vpop.f32.mrf.mxu3 }
 0x231   : > { %v2540_v39 = vrot.slane %v2539_v7, 2 }
 0x233   : > { %v2541_v48 = vadd.f32 %v2540_v39, %v2539_v7 }
 0x235   : > { %v2542_v55 = vrot.slane %v2541_v48, 1 }
 0x237   : > { %v2543_v27 = vadd.f32 %v2542_v55, %v2541_v48 }
 0x239   : > { %v2569_v63 = vmul.f32 %v7632_v46, %v2543_v27 }
 0x23b   : > { %v7642_v26 = vsub.f32 %v2534_v20, %v2569_v63 }
 0x23d   : > { %v2387_v5 = vpop.f32.mrf.mxu0 }
 0x23e   : > { %v2400_v28 = vpop.f32.mrf.mxu1  ;;  %v2388_v6 = vadd.f32 %v2387_v5, %v1665_v22 }
 0x240   : > { %v2401_v9 = vadd.f32 %v2400_v28, %v2388_v6 }
 0x245   : > { %v2413_v8 = vpop.f32.mrf.mxu2  ;;  %v2389_v11 = vpop.f32.mrf.mxu0 }
 0x246   : > { %v2426_v10 = vpop.f32.mrf.mxu3  ;;  %v2402_v12 = vpop.f32.mrf.mxu1  ;;  %v2414_v13 = vadd.f32 %v2413_v8, %v2401_v9  ;;  %v2577_v8 = vmul.f32 %v7642_v26, %v7642_v26 }
 0x248   : > { %v2427_v15 = vadd.f32 %v2426_v10, %v2414_v13  ;;  %v2581_v12 = vrot.slane %v2577_v8, 4 }
 0x24a   : > { %v2535_v17 = vmax.f32 %v2427_v15, 0.0 }
 0x24c   : > { %v2544_v19 = vrot.slane %v2535_v17, 4 }
 0x24d   : > { %v2415_v14 = vpop.f32.mrf.mxu2 }
 0x24e   : > { %v2428_v16 = vpop.f32.mrf.mxu3  ;;  %v2545_v24 = vadd.f32 %v2544_v19, %v2535_v17  ;;  %v2582_v19 = vadd.f32 %v2581_v12, %v2577_v8 }
 0x250   : > { %v2546_v32 = vrot.slane %v2545_v24, 2  ;;  %v2583_v29 = vrot.slane %v2582_v19, 2 }
 0x252   : > { %v2547_v37 = vadd.f32 %v2546_v32, %v2545_v24  ;;  %v2584_v21 = vadd.f32 %v2583_v29, %v2582_v19 }
 0x254   : > { %v2548_v43 = vrot.slane %v2547_v37, 1 }
 0x256   : > { %v2549_v51 = vadd.f32 %v2548_v43, %v2547_v37 }
 0x258   : > { %v2570_v60 = vmul.f32 %v7632_v46, %v2549_v51 }
 0x25a   : > { %v7635_v52 = vsub.f32 %v2535_v17, %v2570_v60 }
 0x25c   : > { %v2578_v1 = vmul.f32 %v7635_v52, %v7635_v52 }
 0x25d   : > { %v2439_v35 = vpop.f32.mrf.mxu0 }
 0x25e   : > { %v2440_v30 = vadd.f32 %v2439_v35, %v1666_v25  ;;  %v2452_v34 = vpop.f32.mrf.mxu1  ;;  %v2587_v33 = vrot.slane %v2578_v1, 4 }
 0x260   : > { %v2453_v36 = vadd.f32 %v2452_v34, %v2440_v30  ;;  %v2588_v10 = vadd.f32 %v2587_v33, %v2578_v1 }
 0x262   : > { %v2589_v14 = vrot.slane %v2588_v10, 2 }
 0x264   : > { %v2590_v24 = vadd.f32 %v2589_v14, %v2588_v10 }
 0x265   : > { %v2465_v38 = vpop.f32.mrf.mxu2  ;;  %v2441_v45 = vpop.f32.mrf.mxu0 }
 0x266   : > { %v2466_v40 = vadd.f32 %v2465_v38, %v2453_v36  ;;  %v2478_v41 = vpop.f32.mrf.mxu3  ;;  %v2454_v47 = vpop.f32.mrf.mxu1  ;;  %v2591_v30 = vrot.slane %v2590_v24, 1 }
 0x268   : > { %v2479_v44 = vadd.f32 %v2478_v41, %v2466_v40  ;;  %v2592_v38 = vadd.f32 %v2591_v30, %v2590_v24  ;;  %v2585_v40 = vrot.slane %v2584_v21, 1 }
 0x26a   : > { %v2536_v49 = vmax.f32 %v2479_v44, 0.0  ;;  %v2606_v43 = vmul.f32 %v2592_v38, %v7632_v46  ;;  %v2586_v45 = vadd.f32 %v2585_v40, %v2584_v21  ;;  %v2682_v21 = vld [vmem:[%s6687_s18] sm:$0xf] }
 0x26b   : > { %v2684_v38 = vperm.slane %v2682_v21, 0  ;;  %v2686_v40 = vperm.slane %v2682_v21, 2 }
 0x26c   : > { %v2550_v53 = vrot.slane %v2536_v49, 4  ;;  %v2605_v51 = vmul.f32 %v2586_v45, %v7632_v46 }
 0x26d   : > { %v2467_v54 = vpop.f32.mrf.mxu2 }
 0x26e   : > { %v2551_v57 = vadd.f32 %v2550_v53, %v2536_v49  ;;  %v2480_v58 = vpop.f32.mrf.mxu3 }
 0x270   : > { %v2552_v56 = vrot.slane %v2551_v57, 2 }
 0x272   : > { %v2553_v59 = vadd.f32 %v2552_v56, %v2551_v57  ;;  %v2610_v57 = vadd.f32 1e-05, %v2605_v51 }
 0x274   : > { %v2554_v62 = vrot.slane %v2553_v59, 1  ;;  %vm2620_vm7 = vweird.f32 %v2610_v57 }
 0x276   : > { %v2555_v0 = vadd.f32 %v2554_v62, %v2553_v59 }
 0x278   : > { %v2571_v2 = vmul.f32 %v7632_v46, %v2555_v0 }
 0x27a   : > { %v7644_v4 = vsub.f32 %v2536_v49, %v2571_v2  ;;  %v2611_v49 = vadd.f32 1e-05, %v2606_v43 }
 0x27c   : > { %v2579_v22 = vmul.f32 %v7644_v4, %v7644_v4  ;;  %6403 = vrsqrt.f32 %v2611_v49  ;;  %vm2630_vm1 = vweird.f32 %v2611_v49 }
 0x27d   : > { %v2491_v5 = vpop.f32.mrf.mxu0 }
 0x27e   : > { %v2492_v28 = vadd.f32 %v2491_v5, %v1667_v3  ;;  %v2504_v6 = vpop.f32.mrf.mxu1  ;;  %v2593_v9 = vrot.slane %v2579_v22, 4 }
 0x280   : > { %v2505_v11 = vadd.f32 %v2504_v6, %v2492_v28  ;;  %v2594_v13 = vadd.f32 %v2593_v9, %v2579_v22 }
 0x282   : > { %v2595_v20 = vrot.slane %v2594_v13, 2  ;;  %v6404_v56 = vpop.eup %6403 }
 0x283   : > { %v2625_v63 = vmul.f32 %v6404_v56, %v2611_v49  ;;  %vm2631_vm2 = vweird.f32 %v6404_v56 }
 0x284   : > { %v2596_v31 = vadd.f32 %v2595_v20, %v2594_v13  ;;  %vm2632_vm4 = vmor %vm2630_vm1, %vm2631_vm2 }
 0x285   : > { %v2517_v61 = vpop.f32.mrf.mxu2  ;;  %v2493_v17 = vpop.f32.mrf.mxu0  ;;  %v2626_v33 = vmul.f32 %v6404_v56, %v2625_v63 }
 0x286   : > { %v2518_v15 = vadd.f32 %v2517_v61, %v2505_v11  ;;  %v2530_v16 = vpop.f32.mrf.mxu3  ;;  %v2506_v18 = vpop.f32.mrf.mxu1  ;;  %v2597_v36 = vrot.slane %v2596_v31, 1 }
 0x287   : > { %v2627_v6 = vmul.f32 0.5, %v2626_v33 }
 0x288   : > { %v2531_v23 = vadd.f32 %v2530_v16, %v2518_v15  ;;  %v2598_v41 = vadd.f32 %v2597_v36, %v2596_v31 }
 0x289   : > { %v2628_v10 = vsub.f32 1.5, %v2627_v6 }
 0x28a   : > { %v2537_v25 = vmax.f32 %v2531_v23, 0.0  ;;  %v2607_v47 = vmul.f32 %v2598_v41, %v7632_v46  ;;  %v2687_v41 = vperm.slane %v2682_v21, 3 }
 0x28b   : > { %v2629_v14 = vmul.f32 %v6404_v56, %v2628_v10 }
 0x28c   : > { %v2556_v32 = vrot.slane %v2537_v25, 4  ;;  %v2612_v53 = vadd.f32 1e-05, %v2607_v47 }
 0x28d   : > { %v2519_v35 = vpop.f32.mrf.mxu2  ;;  %v2633_v18 = vsel %vm2632_vm4, %v6404_v56, %v2629_v14 }
 0x28e   : > { %v2557_v34 = vadd.f32 %v2556_v32, %v2537_v25  ;;  %v2532_v7 = vpop.f32.mrf.mxu3  ;;  %6405 = vrsqrt.f32 %v2612_v53  ;;  %vm2640_vm5 = vweird.f32 %v2612_v53  ;;  %v2609_v35 = vld [vmem:[%s6682_s16] sm:$0xf] }
 0x28f   : > { %6407 = vrsqrt.f32 %v2610_v57 }
 0x290   : > { %v2558_v37 = vrot.slane %v2557_v34, 2 }
 0x292   : > { %v2559_v39 = vadd.f32 %v2558_v37, %v2557_v34 }
 0x294   : > { %v2560_v42 = vrot.slane %v2559_v39, 1  ;;  %v6406_v59 = vpop.eup %6405 }
 0x295   : > { %v2635_v1 = vmul.f32 %v6406_v59, %v2612_v53  ;;  %v6408_v2 = vpop.eup %6407  ;;  %vm2641_vm3 = vweird.f32 %v6406_v59 }
 0x296   : > { %v2561_v44 = vadd.f32 %v2560_v42, %v2559_v39  ;;  %v2615_v5 = vmul.f32 %v6408_v2, %v2610_v57  ;;  %vm2621_vm8 = vweird.f32 %v6408_v2  ;;  %vm2642_vm9 = vmor %vm2640_vm5, %vm2641_vm3  ;;  %v2685_v39 = vperm.slane %v2682_v21, 1 }
 0x297   : > { %v2636_v28 = vmul.f32 %v6406_v59, %v2635_v1  ;;  %vm2622_vm14 = vmor %vm2620_vm7, %vm2621_vm8 }
 0x298   : > { %v2572_v48 = vmul.f32 %v7632_v46, %v2561_v44  ;;  %v2616_v8 = vmul.f32 %v6408_v2, %v2615_v5 }
 0x299   : > { %v2637_v9 = vmul.f32 0.5, %v2636_v28 }
 0x29a   : > { %v7653_v50 = vsub.f32 %v2537_v25, %v2572_v48  ;;  %v2617_v12 = vmul.f32 0.5, %v2616_v8  ;;  %v2658_v25 = vrot.slane %v2633_v18, 7 }
 0x29b   : > { %v2638_v13 = vsub.f32 1.5, %v2637_v9 }
 0x29c   : > { %v2580_v54 = vmul.f32 %v7653_v50, %v7653_v50  ;;  %v2618_v16 = vsub.f32 1.5, %v2617_v12 }
 0x29d   : > { %v2639_v17 = vmul.f32 %v6406_v59, %v2638_v13 }
 0x29e   : > { %v2599_v55 = vrot.slane %v2580_v54, 4  ;;  %v2619_v20 = vmul.f32 %v6408_v2, %v2618_v16 }
 0x29f   : > { %v2643_v23 = vsel %vm2642_vm9, %v6406_v59, %v2639_v17 }
 0x2a0   : > { %v2600_v58 = vadd.f32 %v2599_v55, %v2580_v54  ;;  %v2659_v31 = vrot.slane %v2643_v23, 6  ;;  %v2623_v30 = vsel %vm2622_vm14, %v6408_v2, %v2619_v20 }
 0x2a1   : > { %v2662_v34 = vsel %vm2661_vm12, %v2623_v30, %v2658_v25 }
 0x2a2   : > { %v2601_v60 = vrot.slane %v2600_v58, 2 }
 0x2a4   : > { %v2602_v27 = vadd.f32 %v2601_v60, %v2600_v58 }
 0x2a6   : > { %v2603_v62 = vrot.slane %v2602_v27, 1 }
 0x2a8   : > { %v2604_v0 = vadd.f32 %v2603_v62, %v2602_v27 }
 0x2aa   : > { %v2608_v3 = vmul.f32 %v2604_v0, %v7632_v46 }
 0x2ac   : > { %v2613_v22 = vadd.f32 1e-05, %v2608_v3 }
 0x2ae   : > { %6409 = vrsqrt.f32 %v2613_v22  ;;  %vm2650_vm10 = vweird.f32 %v2613_v22 }
 0x2b4   : > { %v6410_v11 = vpop.eup %6409 }
 0x2b5   : > { %v2645_v61 = vmul.f32 %v6410_v11, %v2613_v22  ;;  %vm2651_vm6 = vweird.f32 %v6410_v11 }
 0x2b6   : > { %vm2652_vm11 = vmor %vm2650_vm10, %vm2651_vm6 }
 0x2b7   : > { %v2646_v15 = vmul.f32 %v6410_v11, %v2645_v61 }
 0x2b9   : > { %v2647_v46 = vmul.f32 0.5, %v2646_v15 }
 0x2bb   : > { %v2648_v19 = vsub.f32 1.5, %v2647_v46 }
 0x2bd   : > { %v2649_v24 = vmul.f32 %v6410_v11, %v2648_v19 }
 0x2bf   : > { %v2653_v29 = vsel %vm2652_vm11, %v6410_v11, %v2649_v24 }
 0x2c0   : > { %v2660_v32 = vrot.slane %v2653_v29, 5 }
 0x2c2   : > { %v2664_v7 = vsel %vm2663_vm13, %v2659_v31, %v2660_v32 }
 0x2c3   : > { %v2666_v36 = vsel %vm2665_vm15, %v2662_v34, %v2664_v7 }
 0x2c4   : > { %v2668_v37 = vmul.f32 %v2666_v36, %v2609_v35 }
 0x2c6   : > { %v2670_v42 = vperm.slane %v2668_v37, 0  ;;  %v2671_v43 = vperm.slane %v2668_v37, 1  ;;  %v2672_v44 = vperm.slane %v2668_v37, 2  ;;  %v2673_v45 = vperm.slane %v2668_v37, 3 }
 0x2c8   : > { %v2678_v47 = vmul.f32 %v2670_v42, %v7642_v26  ;;  %v2679_v48 = vmul.f32 %v2671_v43, %v7635_v52  ;;  %v2680_v49 = vmul.f32 %v2672_v44, %v7644_v4  ;;  %v2681_v51 = vmul.f32 %v2673_v45, %v7653_v50 }
 0x2ca   : > { %v2692_v53 = vadd.f32 %v2684_v38, %v2678_v47  ;;  %v2693_v54 = vadd.f32 %v2685_v39, %v2679_v48  ;;  %v2694_v55 = vadd.f32 %v2686_v40, %v2680_v49  ;;  %v2695_v57 = vadd.f32 %v2687_v41, %v2681_v51 }
 0x2cc   : > { %v2696_v58 = vpack.c.bf16 %v2693_v54, %v2692_v53  ;;  %v2697_v60 = vpack.c.bf16 %v2695_v57, %v2694_v55 }
 0x2ce   : > { %2701 = vst [vmem:[#allocation3 + $0x8] sm:$0xff] %v2696_v58 }
 0x2cf   : > { %2702 = vst [vmem:[#allocation3] sm:$0xff] %v2697_v60 }
 0x2d0 PF: > { %p2703_p5 = scmp.eq.s32.totalorder %s8148_s20, 0 }
 0x2d2   : > { %p2704_p6 = pnand %p2703_p5, %p1514_p2 }
 0x2d4   : > { %2707 = sbr.rel (%p2704_p6) target bundleno = 1067 (0x42b), region = 68 }
 0x2d9   : > { %v5401_v52 = vld [vmem:[%s6666_s15 + $0xe0] sm:$0xf]  ;;  %v6193_v26 = vld [vmem:[%s6666_s15 + $0xec] sm:$0xf0]  ;;  %vm3837_vm12 = vcmask 1040384   ;;  %vm3839_vm13 = vcmask 1042434  }
 0x2da   : > { %v5529_v4 = vld [vmem:[%s6666_s15 + $0x1e0] sm:$0xf]  ;;  %v5402_v50 = vor.u32 %v6193_v26, %v5401_v52  ;;  %v6225_v56 = vld [vmem:[%s6666_s15 + $0x1ec] sm:$0xf0]  ;;  %vm3841_vm15 = vcmask 1041408  }
 0x2db   : > { %v5657_v27 = vld [vmem:[%s6666_s15 + $0x2e0] sm:$0xf]  ;;  %v6257_v59 = vld [vmem:[%s6666_s15 + $0x2ec] sm:$0xf0]  ;;  %v5530_v62 = vor.u32 %v6225_v56, %v5529_v4 }
 0x2dc   : > { %v5658_v63 = vor.u32 %v6257_v59, %v5657_v27  ;;  %v5785_v0 = vld [vmem:[%s6666_s15 + $0x3e0] sm:$0xf]  ;;  %v6289_v1 = vld [vmem:[%s6666_s15 + $0x3ec] sm:$0xf0]  ;;  %3502 = vmatpush.bf16.msra.mxu0 %v5402_v50 }
 0x2dd   : > { %v5385_v2 = vld [vmem:[%s6666_s15 + $0xc0] sm:$0xf]  ;;  %v5786_v3 = vor.u32 %v6289_v1, %v5785_v0  ;;  %v6189_v33 = vld [vmem:[%s6666_s15 + $0xcc] sm:$0xf0]  ;;  %3515 = vmatpush.bf16.msra.mxu1 %v5530_v62 }
 0x2de   : > { %v5513_v22 = vld [vmem:[%s6666_s15 + $0x1c0] sm:$0xf]  ;;  %v6221_v5 = vld [vmem:[%s6666_s15 + $0x1cc] sm:$0xf0]  ;;  %3528 = vmatpush.bf16.msra.mxu2 %v5658_v63  ;;  %v5386_v28 = vor.u32 %v6189_v33, %v5385_v2 }
 0x2df   : > { %v5514_v6 = vor.u32 %v6221_v5, %v5513_v22  ;;  %v5641_v8 = vld [vmem:[%s6666_s15 + $0x2c0] sm:$0xf]  ;;  %v6253_v9 = vld [vmem:[%s6666_s15 + $0x2cc] sm:$0xf0]  ;;  %3541 = vmatpush.bf16.msra.mxu3 %v5786_v3 }
 0x2e0   : > { %v5769_v10 = vld [vmem:[%s6666_s15 + $0x3c0] sm:$0xf]  ;;  %v5642_v11 = vor.u32 %v6253_v9, %v5641_v8  ;;  %v6285_v12 = vld [vmem:[%s6666_s15 + $0x3cc] sm:$0xf0]  ;;  %3503 = vmatpush.bf16.msra.mxu0 %v5386_v28 }
 0x2e1   : > { %v5369_v13 = vld [vmem:[%s6666_s15 + $0xa0] sm:$0xf]  ;;  %v6185_v61 = vld [vmem:[%s6666_s15 + $0xac] sm:$0xf0]  ;;  %v5770_v14 = vor.u32 %v6285_v12, %v5769_v10  ;;  %3516 = vmatpush.bf16.msra.mxu1 %v5514_v6 }
 0x2e2   : > { %v5497_v15 = vld [vmem:[%s6666_s15 + $0x1a0] sm:$0xf]  ;;  %v6217_v16 = vld [vmem:[%s6666_s15 + $0x1ac] sm:$0xf0]  ;;  %v5370_v46 = vor.u32 %v6185_v61, %v5369_v13  ;;  %3529 = vmatpush.bf16.msra.mxu2 %v5642_v11 }
 0x2e3   : > { %v5625_v17 = vld [vmem:[%s6666_s15 + $0x2a0] sm:$0xf]  ;;  %v6249_v18 = vld [vmem:[%s6666_s15 + $0x2ac] sm:$0xf0]  ;;  %v5498_v23 = vor.u32 %v6217_v16, %v5497_v15  ;;  %3542 = vmatpush.bf16.msra.mxu3 %v5770_v14 }
 0x2e4   : > { %v5753_v19 = vld [vmem:[%s6666_s15 + $0x3a0] sm:$0xf]  ;;  %v6281_v20 = vld [vmem:[%s6666_s15 + $0x3ac] sm:$0xf0]  ;;  %v5626_v24 = vor.u32 %v6249_v18, %v5625_v17  ;;  %3504 = vmatpush.bf16.msra.mxu0 %v5370_v46  ;;  %v2708_v46 = vld [vmem:[#allocation3 + $0x8] sm:$0xff] }
 0x2e5   : > { %v5353_v25 = vld [vmem:[%s6666_s15 + $0x80] sm:$0xf]  ;;  %v6181_v29 = vld [vmem:[%s6666_s15 + $0x8c] sm:$0xf0]  ;;  %v5754_v32 = vor.u32 %v6281_v20, %v5753_v19  ;;  %3517 = vmatpush.bf16.msra.mxu1 %v5498_v23  ;;  %v6191_v18 = vld [vmem:[%s6666_s15 + $0xe4] sm:$0xf] }
 0x2e6   : > { %v5481_v31 = vld [vmem:[%s6666_s15 + $0x180] sm:$0xf]  ;;  %v6213_v35 = vld [vmem:[%s6666_s15 + $0x18c] sm:$0xf0]  ;;  %v5354_v36 = vor.u32 %v6181_v29, %v5353_v25  ;;  %3530 = vmatpush.bf16.msra.mxu2 %v5626_v24  ;;  %v5403_v19 = vld [vmem:[%s6666_s15 + $0xf0] sm:$0xf0] }
 0x2e7   : > { %v5609_v30 = vld [vmem:[%s6666_s15 + $0x280] sm:$0xf]  ;;  %v6245_v34 = vld [vmem:[%s6666_s15 + $0x28c] sm:$0xf0]  ;;  %v5482_v37 = vor.u32 %v6213_v35, %v5481_v31  ;;  %3543 = vmatpush.bf16.msra.mxu3 %v5754_v32  ;;  %v6223_v20 = vld [vmem:[%s6666_s15 + $0x1e4] sm:$0xf] }
 0x2e8   : > { %v5737_v7 = vld [vmem:[%s6666_s15 + $0x380] sm:$0xf]  ;;  %v6277_v21 = vld [vmem:[%s6666_s15 + $0x38c] sm:$0xf0]  ;;  %v5610_v38 = vor.u32 %v6245_v34, %v5609_v30  ;;  %3505 = vmatpush.bf16.msra.mxu0 %v5354_v36  ;;  %v5531_v24 = vld [vmem:[%s6666_s15 + $0x1f0] sm:$0xf0] }
 0x2e9   : > { %v5337_v39 = vld [vmem:[%s6666_s15 + $0x60] sm:$0xf]  ;;  %v6177_v40 = vld [vmem:[%s6666_s15 + $0x6c] sm:$0xf0]  ;;  %v5738_v42 = vor.u32 %v6277_v21, %v5737_v7  ;;  %3518 = vmatpush.bf16.msra.mxu1 %v5482_v37  ;;  %v6255_v25 = vld [vmem:[%s6666_s15 + $0x2e4] sm:$0xf]  ;;  %v2850_v7 = vunpack.c.l.b16 %v2708_v46  ;;  %v5406_v37 = vor.u32 %v6191_v18, %v5403_v19 }
 0x2ea   : > { %v5465_v41 = vld [vmem:[%s6666_s15 + $0x160] sm:$0xf]  ;;  %v6209_v43 = vld [vmem:[%s6666_s15 + $0x16c] sm:$0xf0]  ;;  %v5338_v49 = vor.u32 %v6177_v40, %v5337_v39  ;;  %3531 = vmatpush.bf16.msra.mxu2 %v5610_v38  ;;  %v5659_v29 = vld [vmem:[%s6666_s15 + $0x2f0] sm:$0xf0]  ;;  %v2851_v38 = vunpack.c.h.b16 %v2708_v46  ;;  %v5534_v39 = vor.u32 %v6223_v20, %v5531_v24 }
 0x2eb   : > { %v5593_v44 = vld [vmem:[%s6666_s15 + $0x260] sm:$0xf]  ;;  %v6241_v45 = vld [vmem:[%s6666_s15 + $0x26c] sm:$0xf0]  ;;  %v5466_v51 = vor.u32 %v6209_v43, %v5465_v41  ;;  %3544 = vmatpush.bf16.msra.mxu3 %v5738_v42  ;;  %v6287_v30 = vld [vmem:[%s6666_s15 + $0x3e4] sm:$0xf]  ;;  %v5662_v40 = vor.u32 %v6255_v25, %v5659_v29 }
 0x2ec   : > { %v5721_v47 = vld [vmem:[%s6666_s15 + $0x360] sm:$0xf]  ;;  %v6273_v48 = vld [vmem:[%s6666_s15 + $0x36c] sm:$0xf0]  ;;  %v5594_v53 = vor.u32 %v6241_v45, %v5593_v44  ;;  %3506 = vmatpush.bf16.msra.mxu0 %v5338_v49  ;;  %v5787_v34 = vld [vmem:[%s6666_s15 + $0x3f0] sm:$0xf0] }
 0x2ed   : > { %v5321_v54 = vld [vmem:[%s6666_s15 + $0x40] sm:$0xf]  ;;  %v6173_v55 = vld [vmem:[%s6666_s15 + $0x4c] sm:$0xf0]  ;;  %v5722_v58 = vor.u32 %v6273_v48, %v5721_v47  ;;  %3519 = vmatpush.bf16.msra.mxu1 %v5466_v51  ;;  %v6187_v41 = vld [vmem:[%s6666_s15 + $0xc4] sm:$0xf]  ;;  %v5790_v44 = vor.u32 %v6287_v30, %v5787_v34  ;;  %v7749_v51 = vpack.c.b16 %v2850_v7, %v2850_v7 }
 0x2ee   : > { %v5449_v57 = vld [vmem:[%s6666_s15 + $0x140] sm:$0xf]  ;;  %v6205_v60 = vld [vmem:[%s6666_s15 + $0x14c] sm:$0xf0]  ;;  %v5322_v56 = vor.u32 %v6173_v55, %v5321_v54  ;;  %3532 = vmatpush.bf16.msra.mxu2 %v5594_v53  ;;  %v5387_v42 = vld [vmem:[%s6666_s15 + $0xd0] sm:$0xf0] }
 0x2ef   : > { %v5577_v52 = vld [vmem:[%s6666_s15 + $0x240] sm:$0xf]  ;;  %v6237_v26 = vld [vmem:[%s6666_s15 + $0x24c] sm:$0xf0]  ;;  %v5450_v27 = vor.u32 %v6205_v60, %v5449_v57  ;;  %3545 = vmatpush.bf16.msra.mxu3 %v5722_v58  ;;  %v6219_v43 = vld [vmem:[%s6666_s15 + $0x1c4] sm:$0xf]  ;;  %v5390_v57 = vor.u32 %v6187_v41, %v5387_v42  ;;  %v7755_v58 = vpack.c.b16 %v2851_v38, %v2851_v38 }
 0x2f0   : > { %v5705_v4 = vld [vmem:[%s6666_s15 + $0x340] sm:$0xf]  ;;  %v6269_v50 = vld [vmem:[%s6666_s15 + $0x34c] sm:$0xf0]  ;;  %v5578_v59 = vor.u32 %v6237_v26, %v5577_v52  ;;  %3507 = vmatpush.bf16.msra.mxu0 %v5322_v56  ;;  %v5515_v47 = vld [vmem:[%s6666_s15 + $0x1d0] sm:$0xf0] }
 0x2f1   : > { %v5305_v62 = vld [vmem:[%s6666_s15 + $0x20] sm:$0xf]  ;;  %v6169_v63 = vld [vmem:[%s6666_s15 + $0x2c] sm:$0xf0]  ;;  %v5706_v1 = vor.u32 %v6269_v50, %v5705_v4  ;;  %3520 = vmatpush.bf16.msra.mxu1 %v5450_v27  ;;  %v6251_v48 = vld [vmem:[%s6666_s15 + $0x2c4] sm:$0xf]  ;;  %v5518_v60 = vor.u32 %v6219_v43, %v5515_v47 }
 0x2f2   : > { %v5433_v0 = vld [vmem:[%s6666_s15 + $0x120] sm:$0xf]  ;;  %v6201_v2 = vld [vmem:[%s6666_s15 + $0x12c] sm:$0xf0]  ;;  %v5306_v6 = vor.u32 %v6169_v63, %v5305_v62  ;;  %3533 = vmatpush.bf16.msra.mxu2 %v5578_v59  ;;  %v5643_v49 = vld [vmem:[%s6666_s15 + $0x2d0] sm:$0xf0] }
 0x2f3   : > { %v5561_v3 = vld [vmem:[%s6666_s15 + $0x220] sm:$0xf]  ;;  %v6233_v33 = vld [vmem:[%s6666_s15 + $0x22c] sm:$0xf0]  ;;  %v5434_v11 = vor.u32 %v6201_v2, %v5433_v0  ;;  %3546 = vmatpush.bf16.msra.mxu3 %v5706_v1  ;;  %v6283_v54 = vld [vmem:[%s6666_s15 + $0x3c4] sm:$0xf]  ;;  %v5646_v52 = vor.u32 %v6251_v48, %v5643_v49 }
 0x2f4   : > { %v5689_v22 = vld [vmem:[%s6666_s15 + $0x320] sm:$0xf]  ;;  %v6265_v5 = vld [vmem:[%s6666_s15 + $0x32c] sm:$0xf0]  ;;  %v5562_v12 = vor.u32 %v6233_v33, %v5561_v3  ;;  %3508 = vmatpush.bf16.msra.mxu0 %v5306_v6  ;;  %v5771_v55 = vld [vmem:[%s6666_s15 + $0x3d0] sm:$0xf0] }
 0x2f5   : > { %v5289_v28 = vld [vmem:[%s6666_s15] sm:$0xf]  ;;  %v6165_v8 = vld [vmem:[%s6666_s15 + $0xc] sm:$0xf0]  ;;  %v5690_v15 = vor.u32 %v6265_v5, %v5689_v22  ;;  %3521 = vmatpush.bf16.msra.mxu1 %v5434_v11  ;;  %v6183_v26 = vld [vmem:[%s6666_s15 + $0xa4] sm:$0xf]  ;;  %v5774_v56 = vor.u32 %v6283_v54, %v5771_v55 }
 0x2f6   : > { %v5417_v9 = vld [vmem:[%s6666_s15 + $0x100] sm:$0xf]  ;;  %v6197_v10 = vld [vmem:[%s6666_s15 + $0x10c] sm:$0xf0]  ;;  %v5290_v23 = vor.u32 %v6165_v8, %v5289_v28  ;;  %3534 = vmatpush.bf16.msra.mxu2 %v5562_v12  ;;  %v5371_v4 = vld [vmem:[%s6666_s15 + $0xb0] sm:$0xf0] }
 0x2f7   : > { %v5545_v13 = vld [vmem:[%s6666_s15 + $0x200] sm:$0xf]  ;;  %v6229_v61 = vld [vmem:[%s6666_s15 + $0x20c] sm:$0xf0]  ;;  %v5418_v32 = vor.u32 %v6197_v10, %v5417_v9  ;;  %3547 = vmatpush.bf16.msra.mxu3 %v5690_v15  ;;  %v6215_v50 = vld [vmem:[%s6666_s15 + $0x1a4] sm:$0xf]  ;;  %v5374_v1 = vor.u32 %v6183_v26, %v5371_v4 }
 0x2f8   : > { %v2709_v14 = vld [vmem:[#allocation3] sm:$0xff]  ;;  %v5673_v16 = vld [vmem:[%s6666_s15 + $0x300] sm:$0xf]  ;;  %v5546_v35 = vor.u32 %v6229_v61, %v5545_v13  ;;  %3509 = vmatpush.bf16.msra.mxu0 %v5290_v23  ;;  %v6247_v59 = vld [vmem:[%s6666_s15 + $0x2a4] sm:$0xf] }
 0x2f9   : > { %v6261_v17 = vld [vmem:[%s6666_s15 + $0x30c] sm:$0xf0]  ;;  %v2852_v31 = vunpack.c.l.b16 %v2709_v14  ;;  %v2853_v21 = vunpack.c.h.b16 %v2709_v14  ;;  %3522 = vmatpush.bf16.msra.mxu1 %v5418_v32  ;;  %v5499_v27 = vld [vmem:[%s6666_s15 + $0x1b0] sm:$0xf0]  ;;  %v6279_v63 = vld [vmem:[%s6666_s15 + $0x3a4] sm:$0xf] }
 0x2fa   : > { %v5674_v36 = vor.u32 %v6261_v17, %v5673_v16  ;;  %3535 = vmatpush.bf16.msra.mxu2 %v5546_v35  ;;  %v5627_v62 = vld [vmem:[%s6666_s15 + $0x2b0] sm:$0xf0]  ;;  %v5502_v2 = vor.u32 %v6215_v50, %v5499_v27  ;;  %v6179_v33 = vld [vmem:[%s6666_s15 + $0x84] sm:$0xf] }
 0x2fb   : > { %v7744_v45 = vpack.c.b16 %v2852_v31, %v2852_v31  ;;  %v7751_v53 = vpack.c.b16 %v2853_v21, %v2853_v21  ;;  %3510 = vmatmul.bf16.vlgmr.msra.gmra.mxu0 %v7749_v51  ;;  %v5755_v0 = vld [vmem:[%s6666_s15 + $0x3b0] sm:$0xf0]  ;;  %v5630_v3 = vor.u32 %v6247_v59, %v5627_v62  ;;  %v6211_v5 = vld [vmem:[%s6666_s15 + $0x184] sm:$0xf] }
 0x2fc   : > { %3548 = vmatpush.bf16.msra.mxu3 %v5674_v36  ;;  %3554 = vmatpush.bf16.msrb.mxu0 %v5406_v37  ;;  %v5355_v22 = vld [vmem:[%s6666_s15 + $0x90] sm:$0xf0]  ;;  %v5758_v28 = vor.u32 %v6279_v63, %v5755_v0  ;;  %v6243_v8 = vld [vmem:[%s6666_s15 + $0x284] sm:$0xf] }
 0x2fd   : > { %3567 = vmatpush.bf16.msrb.mxu1 %v5534_v39  ;;  %3536 = vmatmul.bf16.vlgmr.msra.gmra.mxu2 %v7744_v45  ;;  %v5483_v6 = vld [vmem:[%s6666_s15 + $0x190] sm:$0xf0]  ;;  %v6275_v10 = vld [vmem:[%s6666_s15 + $0x384] sm:$0xf]  ;;  %v5358_v12 = vor.u32 %v6179_v33, %v5355_v22  ;;  %v6226_v22 = vld [vmem:[%s6666_s15 + $0x1f4] sm:$0xf0] }
 0x2fe   : > { %3580 = vmatpush.bf16.msrb.mxu2 %v5662_v40  ;;  %3523 = vmatmul.bf16.vlgmr.msra.gmra.mxu1 %v7755_v58  ;;  %v5611_v9 = vld [vmem:[%s6666_s15 + $0x290] sm:$0xf0]  ;;  %v5486_v13 = vor.u32 %v6211_v5, %v5483_v6  ;;  %v6175_v14 = vld [vmem:[%s6666_s15 + $0x64] sm:$0xf]  ;;  %v5665_v5 = vld [vmem:[%s6666_s15 + $0x2e8] sm:$0xf] }
 0x2ff   : > { %3549 = vmatmul.bf16.vlgmr.msra.gmra.mxu3 %v7751_v53  ;;  %v5739_v11 = vld [vmem:[%s6666_s15 + $0x390] sm:$0xf0]  ;;  %v5614_v61 = vor.u32 %v6243_v8, %v5611_v9  ;;  %v6207_v16 = vld [vmem:[%s6666_s15 + $0x164] sm:$0xf]  ;;  %v5793_v9 = vld [vmem:[%s6666_s15 + $0x3e8] sm:$0xf] }
 0x300   : > { %3593 = vmatpush.bf16.msrb.mxu3 %v5790_v44  ;;  %3555 = vmatpush.bf16.msrb.mxu0 %v5390_v57  ;;  %v5339_v15 = vld [vmem:[%s6666_s15 + $0x70] sm:$0xf0]  ;;  %v5742_v17 = vor.u32 %v6275_v10, %v5739_v11  ;;  %v6239_v18 = vld [vmem:[%s6666_s15 + $0x264] sm:$0xf]  ;;  %v6290_v10 = vld [vmem:[%s6666_s15 + $0x3f4] sm:$0xf0] }
 0x301   : > { %3568 = vmatpush.bf16.msrb.mxu1 %v5518_v60  ;;  %v5467_v46 = vld [vmem:[%s6666_s15 + $0x170] sm:$0xf0]  ;;  %v6271_v20 = vld [vmem:[%s6666_s15 + $0x364] sm:$0xf]  ;;  %v5342_v24 = vor.u32 %v6175_v14, %v5339_v15  ;;  %v5393_v14 = vld [vmem:[%s6666_s15 + $0xc8] sm:$0xf] }
 0x302   : > { %3581 = vmatpush.bf16.msrb.mxu2 %v5646_v52  ;;  %v5595_v19 = vld [vmem:[%s6666_s15 + $0x270] sm:$0xf0]  ;;  %v5470_v25 = vor.u32 %v6207_v16, %v5467_v46  ;;  %v6171_v31 = vld [vmem:[%s6666_s15 + $0x44] sm:$0xf]  ;;  %v6190_v15 = vld [vmem:[%s6666_s15 + $0xd4] sm:$0xf0] }
 0x303   : > { %v5723_v23 = vld [vmem:[%s6666_s15 + $0x370] sm:$0xf0]  ;;  %v5598_v29 = vor.u32 %v6239_v18, %v5595_v19  ;;  %v6203_v35 = vld [vmem:[%s6666_s15 + $0x144] sm:$0xf]  ;;  %v5521_v16 = vld [vmem:[%s6666_s15 + $0x1c8] sm:$0xf] }
 0x304   : > { %3594 = vmatpush.bf16.msrb.mxu3 %v5774_v56  ;;  %3556 = vmatpush.bf16.msrb.mxu0 %v5374_v1  ;;  %v5323_v32 = vld [vmem:[%s6666_s15 + $0x50] sm:$0xf0]  ;;  %v5726_v30 = vor.u32 %v6271_v20, %v5723_v23  ;;  %v6235_v7 = vld [vmem:[%s6666_s15 + $0x244] sm:$0xf]  ;;  %v5409_v1 = vld [vmem:[%s6666_s15 + $0xe8] sm:$0xf] }
 0x305   : > { %3569 = vmatpush.bf16.msrb.mxu1 %v5502_v2  ;;  %v5451_v34 = vld [vmem:[%s6666_s15 + $0x150] sm:$0xf0]  ;;  %v6267_v36 = vld [vmem:[%s6666_s15 + $0x344] sm:$0xf]  ;;  %v5326_v38 = vor.u32 %v6171_v31, %v5323_v32  ;;  %v6194_v2 = vld [vmem:[%s6666_s15 + $0xf4] sm:$0xf0] }
 0x306   : > { %3582 = vmatpush.bf16.msrb.mxu2 %v5630_v3  ;;  %v5579_v21 = vld [vmem:[%s6666_s15 + $0x250] sm:$0xf0]  ;;  %v5454_v39 = vor.u32 %v6203_v35, %v5451_v34  ;;  %v6167_v41 = vld [vmem:[%s6666_s15 + $0x24] sm:$0xf]  ;;  %v5537_v3 = vld [vmem:[%s6666_s15 + $0x1e8] sm:$0xf] }
 0x307   : > { %v5707_v37 = vld [vmem:[%s6666_s15 + $0x350] sm:$0xf0]  ;;  %v5582_v40 = vor.u32 %v6235_v7, %v5579_v21  ;;  %v6199_v43 = vld [vmem:[%s6666_s15 + $0x124] sm:$0xf]  ;;  %v6222_v46 = vld [vmem:[%s6666_s15 + $0x1d4] sm:$0xf0] }
 0x308   : > { %3595 = vmatpush.bf16.msrb.mxu3 %v5758_v28  ;;  %3557 = vmatpush.bf16.msrb.mxu0 %v5358_v12  ;;  %v5307_v42 = vld [vmem:[%s6666_s15 + $0x30] sm:$0xf0]  ;;  %v5710_v44 = vor.u32 %v6267_v36, %v5707_v37  ;;  %v6231_v48 = vld [vmem:[%s6666_s15 + $0x224] sm:$0xf]  ;;  %v6258_v28 = vld [vmem:[%s6666_s15 + $0x2f4] sm:$0xf0]  ;;  %v5410_v12 = vor.u32 %v6194_v2, %v5409_v1 }
 0x309   : > { %3570 = vmatpush.bf16.msrb.mxu1 %v5486_v13  ;;  %v5435_v47 = vld [vmem:[%s6666_s15 + $0x130] sm:$0xf0]  ;;  %v6263_v54 = vld [vmem:[%s6666_s15 + $0x324] sm:$0xf]  ;;  %v5310_v57 = vor.u32 %v6167_v41, %v5307_v42  ;;  %v5538_v13 = vor.u32 %v6226_v22, %v5537_v3  ;;  %v5649_v18 = vld [vmem:[%s6666_s15 + $0x2c8] sm:$0xf] }
 0x30a   : > { %3583 = vmatpush.bf16.msrb.mxu2 %v5614_v61  ;;  %v5563_v49 = vld [vmem:[%s6666_s15 + $0x230] sm:$0xf0]  ;;  %v6163_v60 = vld [vmem:[%s6666_s15 + $0x4] sm:$0xf]  ;;  %v5438_v26 = vor.u32 %v6199_v43, %v5435_v47  ;;  %v5666_v61 = vor.u32 %v6258_v28, %v5665_v5  ;;  %v6254_v19 = vld [vmem:[%s6666_s15 + $0x2d4] sm:$0xf0] }
 0x30b   : > { %v5691_v55 = vld [vmem:[%s6666_s15 + $0x330] sm:$0xf0]  ;;  %v5566_v4 = vor.u32 %v6231_v48, %v5563_v49  ;;  %v6195_v50 = vld [vmem:[%s6666_s15 + $0x104] sm:$0xf]  ;;  %v5777_v20 = vld [vmem:[%s6666_s15 + $0x3c8] sm:$0xf] }
 0x30c   : > { %3596 = vmatpush.bf16.msrb.mxu3 %v5742_v17  ;;  %3558 = vmatpush.bf16.msrb.mxu0 %v5342_v24  ;;  %v5291_v52 = vld [vmem:[%s6666_s15 + $0x10] sm:$0xf0]  ;;  %v6227_v27 = vld [vmem:[%s6666_s15 + $0x204] sm:$0xf]  ;;  %v5694_v59 = vor.u32 %v6263_v54, %v5691_v55  ;;  %v5794_v17 = vor.u32 %v6290_v10, %v5793_v9  ;;  %v6286_v23 = vld [vmem:[%s6666_s15 + $0x3d4] sm:$0xf0]  ;;  %v5394_v24 = vor.u32 %v6190_v15, %v5393_v14 }
 0x30d   : > { %3571 = vmatpush.bf16.msrb.mxu1 %v5470_v25  ;;  %v5419_v56 = vld [vmem:[%s6666_s15 + $0x110] sm:$0xf0]  ;;  %v6259_v63 = vld [vmem:[%s6666_s15 + $0x304] sm:$0xf]  ;;  %v5294_v33 = vor.u32 %v6163_v60, %v5291_v52  ;;  %v5522_v25 = vor.u32 %v6222_v46, %v5521_v16  ;;  %v5377_v31 = vld [vmem:[%s6666_s15 + $0xa8] sm:$0xf] }
 0x30e   : > { %3584 = vmatpush.bf16.msrb.mxu2 %v5598_v29  ;;  %v5547_v62 = vld [vmem:[%s6666_s15 + $0x210] sm:$0xf0]  ;;  %v5422_v6 = vor.u32 %v6195_v50, %v5419_v56  ;;  %v5650_v29 = vor.u32 %v6254_v19, %v5649_v18  ;;  %v6186_v32 = vld [vmem:[%s6666_s15 + $0xb4] sm:$0xf0]  ;;  %v5505_v35 = vld [vmem:[%s6666_s15 + $0x1a8] sm:$0xf] }
 0x30f   : > { %v5675_v0 = vld [vmem:[%s6666_s15 + $0x310] sm:$0xf0]  ;;  %v5550_v8 = vor.u32 %v6227_v27, %v5547_v62  ;;  %v6218_v34 = vld [vmem:[%s6666_s15 + $0x1b4] sm:$0xf0]  ;;  %v5633_v7 = vld [vmem:[%s6666_s15 + $0x2a8] sm:$0xf] }
 0x310   : > { %3597 = vmatpush.bf16.msrb.mxu3 %v5726_v30  ;;  %3559 = vmatpush.bf16.msrb.mxu0 %v5326_v38  ;;  %v5678_v11 = vor.u32 %v6259_v63, %v5675_v0  ;;  %v5778_v30 = vor.u32 %v6286_v23, %v5777_v20  ;;  %v6250_v21 = vld [vmem:[%s6666_s15 + $0x2b4] sm:$0xf0]  ;;  %v5761_v36 = vld [vmem:[%s6666_s15 + $0x3a8] sm:$0xf]  ;;  %v5378_v38 = vor.u32 %v6186_v32, %v5377_v31 }
 0x311   : > { %3572 = vmatpush.bf16.msrb.mxu1 %v5454_v39  ;;  %v6282_v37 = vld [vmem:[%s6666_s15 + $0x3b4] sm:$0xf0]  ;;  %v5506_v39 = vor.u32 %v6218_v34, %v5505_v35  ;;  %v5361_v41 = vld [vmem:[%s6666_s15 + $0x88] sm:$0xf] }
 0x312   : > { %3585 = vmatpush.bf16.msrb.mxu2 %v5582_v40  ;;  %v5634_v40 = vor.u32 %v6250_v21, %v5633_v7  ;;  %v6182_v42 = vld [vmem:[%s6666_s15 + $0x94] sm:$0xf0]  ;;  %v5489_v43 = vld [vmem:[%s6666_s15 + $0x188] sm:$0xf] }
 0x313   : > { %v6214_v47 = vld [vmem:[%s6666_s15 + $0x194] sm:$0xf0]  ;;  %v5617_v48 = vld [vmem:[%s6666_s15 + $0x288] sm:$0xf] }
 0x314   : > { %3598 = vmatpush.bf16.msrb.mxu3 %v5710_v44  ;;  %3560 = vmatpush.bf16.msrb.mxu0 %v5310_v57  ;;  %v5762_v44 = vor.u32 %v6282_v37, %v5761_v36  ;;  %v6246_v49 = vld [vmem:[%s6666_s15 + $0x294] sm:$0xf0]  ;;  %v5745_v54 = vld [vmem:[%s6666_s15 + $0x388] sm:$0xf]  ;;  %v5362_v57 = vor.u32 %v6182_v42, %v5361_v41  ;;  %v5490_v60 = vor.u32 %v6214_v47, %v5489_v43  ;;  %v5539_v42 = vld [vmem:[%s6666_s15 + $0x1f8] sm:$0xf0] }
 0x315   : > { %3573 = vmatpush.bf16.msrb.mxu1 %v5438_v26  ;;  %v6278_v55 = vld [vmem:[%s6666_s15 + $0x394] sm:$0xf0]  ;;  %v5618_v52 = vor.u32 %v6246_v49, %v5617_v48  ;;  %v5345_v26 = vld [vmem:[%s6666_s15 + $0x68] sm:$0xf]  ;;  %v6256_v43 = vld [vmem:[%s6666_s15 + $0x2ec] sm:$0xf] }
 0x316   : > { %3586 = vmatpush.bf16.msrb.mxu2 %v5566_v4  ;;  %v6178_v4 = vld [vmem:[%s6666_s15 + $0x74] sm:$0xf0]  ;;  %v5473_v50 = vld [vmem:[%s6666_s15 + $0x168] sm:$0xf]  ;;  %v5746_v56 = vor.u32 %v6278_v55, %v5745_v54  ;;  %v6288_v49 = vld [vmem:[%s6666_s15 + $0x3ec] sm:$0xf] }
 0x317   : > { %v6210_v27 = vld [vmem:[%s6666_s15 + $0x174] sm:$0xf0]  ;;  %v5729_v63 = vld [vmem:[%s6666_s15 + $0x368] sm:$0xf]  ;;  %v5346_v1 = vor.u32 %v6178_v4, %v5345_v26  ;;  %v5795_v54 = vld [vmem:[%s6666_s15 + $0x3f8] sm:$0xf0] }
 0x318   : > { %3599 = vmatpush.bf16.msrb.mxu3 %v5694_v59  ;;  %3561 = vmatpush.bf16.msrb.mxu0 %v5294_v33  ;;  %v5601_v59 = vld [vmem:[%s6666_s15 + $0x268] sm:$0xf]  ;;  %v6242_v62 = vld [vmem:[%s6666_s15 + $0x274] sm:$0xf0]  ;;  %v5474_v2 = vor.u32 %v6210_v27, %v5473_v50  ;;  %v6188_v26 = vld [vmem:[%s6666_s15 + $0xcc] sm:$0xf] }
 0x319   : > { %3574 = vmatpush.bf16.msrb.mxu1 %v5422_v6  ;;  %v6274_v0 = vld [vmem:[%s6666_s15 + $0x374] sm:$0xf0]  ;;  %v5602_v3 = vor.u32 %v6242_v62, %v5601_v59  ;;  %v5329_v33 = vld [vmem:[%s6666_s15 + $0x48] sm:$0xf]  ;;  %v5395_v4 = vld [vmem:[%s6666_s15 + $0xd8] sm:$0xf0] }
 0x31a   : > { %3587 = vmatpush.bf16.msrb.mxu2 %v5550_v8  ;;  %v6174_v22 = vld [vmem:[%s6666_s15 + $0x54] sm:$0xf0]  ;;  %v5457_v5 = vld [vmem:[%s6666_s15 + $0x148] sm:$0xf]  ;;  %v5730_v28 = vor.u32 %v6274_v0, %v5729_v63  ;;  %v6220_v50 = vld [vmem:[%s6666_s15 + $0x1cc] sm:$0xf] }
 0x31b   : > { %3562 = vmatmul.bf16.vlgmr.msrb.gmra.mxu0 %v7749_v51  ;;  %v6206_v6 = vld [vmem:[%s6666_s15 + $0x154] sm:$0xf0]  ;;  %v5585_v8 = vld [vmem:[%s6666_s15 + $0x248] sm:$0xf]  ;;  %v5523_v27 = vld [vmem:[%s6666_s15 + $0x1d8] sm:$0xf0] }
 0x31c   : > { %3600 = vmatpush.bf16.msrb.mxu3 %v5678_v11  ;;  %3606 = vmatpush.bf16.msra.mxu0 %v5410_v12  ;;  %v6238_v9 = vld [vmem:[%s6666_s15 + $0x254] sm:$0xf0]  ;;  %v5713_v10 = vld [vmem:[%s6666_s15 + $0x348] sm:$0xf]  ;;  %v5330_v12 = vor.u32 %v6174_v22, %v5329_v33  ;;  %v6252_v59 = vld [vmem:[%s6666_s15 + $0x2cc] sm:$0xf] }
 0x31d   : > { %3619 = vmatpush.bf16.msra.mxu1 %v5538_v13  ;;  %3588 = vmatmul.bf16.vlgmr.msrb.gmra.mxu2 %v7744_v45  ;;  %v6270_v11 = vld [vmem:[%s6666_s15 + $0x354] sm:$0xf0]  ;;  %v5458_v13 = vor.u32 %v6206_v6, %v5457_v5  ;;  %v5313_v14 = vld [vmem:[%s6666_s15 + $0x28] sm:$0xf]  ;;  %v5651_v62 = vld [vmem:[%s6666_s15 + $0x2d8] sm:$0xf0] }
 0x31e   : > { %3632 = vmatpush.bf16.msra.mxu2 %v5666_v61  ;;  %3575 = vmatmul.bf16.vlgmr.msrb.gmra.mxu1 %v7755_v58  ;;  %v5586_v61 = vor.u32 %v6238_v9, %v5585_v8  ;;  %v6170_v15 = vld [vmem:[%s6666_s15 + $0x34] sm:$0xf0]  ;;  %v5441_v16 = vld [vmem:[%s6666_s15 + $0x128] sm:$0xf]  ;;  %v6284_v63 = vld [vmem:[%s6666_s15 + $0x3cc] sm:$0xf] }
 0x31f   : > { %3601 = vmatmul.bf16.vlgmr.msrb.gmra.mxu3 %v7751_v53  ;;  %v6202_v46 = vld [vmem:[%s6666_s15 + $0x134] sm:$0xf0]  ;;  %v5569_v18 = vld [vmem:[%s6666_s15 + $0x228] sm:$0xf]  ;;  %v5779_v0 = vld [vmem:[%s6666_s15 + $0x3d8] sm:$0xf0] }
 0x320   : > { %3645 = vmatpush.bf16.msra.mxu3 %v5794_v17  ;;  %3607 = vmatpush.bf16.msra.mxu0 %v5394_v24  ;;  %v5714_v17 = vor.u32 %v6270_v11, %v5713_v10  ;;  %v6234_v19 = vld [vmem:[%s6666_s15 + $0x234] sm:$0xf0]  ;;  %v5697_v20 = vld [vmem:[%s6666_s15 + $0x328] sm:$0xf]  ;;  %v5314_v24 = vor.u32 %v6170_v15, %v5313_v14  ;;  %v5442_v31 = vor.u32 %v6202_v46, %v5441_v16  ;;  %v6184_v33 = vld [vmem:[%s6666_s15 + $0xac] sm:$0xf] }
 0x321   : > { %3620 = vmatpush.bf16.msra.mxu1 %v5522_v25  ;;  %v6266_v23 = vld [vmem:[%s6666_s15 + $0x334] sm:$0xf0]  ;;  %v5297_v25 = vld [vmem:[%s6666_s15 + $0x8] sm:$0xf]  ;;  %v5570_v32 = vor.u32 %v6234_v19, %v5569_v18  ;;  %v5379_v22 = vld [vmem:[%s6666_s15 + $0xb8] sm:$0xf0] }
 0x322   : > { %3633 = vmatpush.bf16.msra.mxu2 %v5650_v29  ;;  %v6166_v29 = vld [vmem:[%s6666_s15 + $0x14] sm:$0xf0]  ;;  %v5425_v35 = vld [vmem:[%s6666_s15 + $0x108] sm:$0xf]  ;;  %v5698_v7 = vor.u32 %v6266_v23, %v5697_v20  ;;  %v6216_v5 = vld [vmem:[%s6666_s15 + $0x1ac] sm:$0xf] }
 0x323   : > { %v5553_v34 = vld [vmem:[%s6666_s15 + $0x208] sm:$0xf]  ;;  %v6230_v21 = vld [vmem:[%s6666_s15 + $0x214] sm:$0xf0]  ;;  %v5298_v41 = vor.u32 %v6166_v29, %v5297_v25  ;;  %v5507_v6 = vld [vmem:[%s6666_s15 + $0x1b8] sm:$0xf0] }
 0x324   : > { %3646 = vmatpush.bf16.msra.mxu3 %v5778_v30  ;;  %3608 = vmatpush.bf16.msra.mxu0 %v5378_v38  ;;  %v6198_v30 = vld [vmem:[%s6666_s15 + $0x114] sm:$0xf0]  ;;  %v5681_v36 = vld [vmem:[%s6666_s15 + $0x308] sm:$0xf]  ;;  %v6192_v38 = vld [vmem:[%s6666_s15 + $0xec] sm:$0xf]  ;;  %v5554_v48 = vor.u32 %v6230_v21, %v5553_v34 }
 0x325   : > { %3621 = vmatpush.bf16.msra.mxu1 %v5506_v39  ;;  %v6262_v37 = vld [vmem:[%s6666_s15 + $0x314] sm:$0xf0]  ;;  %v5411_v39 = vld [vmem:[%s6666_s15 + $0xf8] sm:$0xf0]  ;;  %v5426_v47 = vor.u32 %v6198_v30, %v5425_v35  ;;  %v6248_v8 = vld [vmem:[%s6666_s15 + $0x2ac] sm:$0xf] }
 0x326   : > { %3634 = vmatpush.bf16.msra.mxu2 %v5634_v40  ;;  %v6224_v40 = vld [vmem:[%s6666_s15 + $0x1ec] sm:$0xf]  ;;  %v5682_v55 = vor.u32 %v6262_v37, %v5681_v36  ;;  %v5635_v9 = vld [vmem:[%s6666_s15 + $0x2b8] sm:$0xf0] }
 0x327   : > { %v6280_v10 = vld [vmem:[%s6666_s15 + $0x3ac] sm:$0xf]  ;;  %v5763_v11 = vld [vmem:[%s6666_s15 + $0x3b8] sm:$0xf0] }
 0x328   : > { %3647 = vmatpush.bf16.msra.mxu3 %v5762_v44  ;;  %3609 = vmatpush.bf16.msra.mxu0 %v5362_v57  ;;  %v5667_v44 = vld [vmem:[%s6666_s15 + $0x2f8] sm:$0xf0]  ;;  %v5414_v57 = vor.u32 %v6192_v38, %v5411_v39  ;;  %v6180_v14 = vld [vmem:[%s6666_s15 + $0x8c] sm:$0xf] }
 0x329   : > { %3622 = vmatpush.bf16.msra.mxu1 %v5490_v60  ;;  %v5542_v60 = vor.u32 %v6224_v40, %v5539_v42  ;;  %v5363_v15 = vld [vmem:[%s6666_s15 + $0x98] sm:$0xf0]  ;;  %v6212_v16 = vld [vmem:[%s6666_s15 + $0x18c] sm:$0xf] }
 0x32a   : > { %3635 = vmatpush.bf16.msra.mxu2 %v5618_v52  ;;  %v5670_v52 = vor.u32 %v6256_v43, %v5667_v44  ;;  %v5491_v46 = vld [vmem:[%s6666_s15 + $0x198] sm:$0xf0]  ;;  %v6244_v18 = vld [vmem:[%s6666_s15 + $0x28c] sm:$0xf] }
 0x32b   : > { %v5619_v19 = vld [vmem:[%s6666_s15 + $0x298] sm:$0xf0]  ;;  %v6276_v20 = vld [vmem:[%s6666_s15 + $0x38c] sm:$0xf]  ;;  %v5494_v25 = vor.u32 %v6212_v16, %v5491_v46 }
 0x32c   : > { %3648 = vmatpush.bf16.msra.mxu3 %v5746_v56  ;;  %3610 = vmatpush.bf16.msra.mxu0 %v5346_v1  ;;  %v5798_v56 = vor.u32 %v6288_v49, %v5795_v54  ;;  %v5398_v1 = vor.u32 %v6188_v26, %v5395_v4  ;;  %v5747_v23 = vld [vmem:[%s6666_s15 + $0x398] sm:$0xf0]  ;;  %v5622_v29 = vor.u32 %v6244_v18, %v5619_v19  ;;  %v6208_v35 = vld [vmem:[%s6666_s15 + $0x16c] sm:$0xf] }
 0x32d   : > { %3623 = vmatpush.bf16.msra.mxu1 %v5474_v2  ;;  %v5526_v2 = vor.u32 %v6220_v50, %v5523_v27  ;;  %v5750_v30 = vor.u32 %v6276_v20, %v5747_v23  ;;  %v5475_v34 = vld [vmem:[%s6666_s15 + $0x178] sm:$0xf0]  ;;  %v6272_v36 = vld [vmem:[%s6666_s15 + $0x36c] sm:$0xf] }
 0x32e   : > { %3636 = vmatpush.bf16.msra.mxu2 %v5602_v3  ;;  %v5654_v3 = vor.u32 %v6252_v59, %v5651_v62  ;;  %v5603_v21 = vld [vmem:[%s6666_s15 + $0x278] sm:$0xf0]  ;;  %v5478_v39 = vor.u32 %v6208_v35, %v5475_v34  ;;  %v6204_v43 = vld [vmem:[%s6666_s15 + $0x14c] sm:$0xf] }
 0x32f   : > { %v5731_v37 = vld [vmem:[%s6666_s15 + $0x378] sm:$0xf0]  ;;  %v6268_v54 = vld [vmem:[%s6666_s15 + $0x34c] sm:$0xf] }
 0x330   : > { %3649 = vmatpush.bf16.msra.mxu3 %v5730_v28  ;;  %3611 = vmatpush.bf16.msra.mxu0 %v5330_v12  ;;  %v5782_v28 = vor.u32 %v6284_v63, %v5779_v0  ;;  %v5382_v12 = vor.u32 %v6184_v33, %v5379_v22  ;;  %v5331_v42 = vld [vmem:[%s6666_s15 + $0x58] sm:$0xf0]  ;;  %v5734_v44 = vor.u32 %v6272_v36, %v5731_v37  ;;  %v6168_v26 = vld [vmem:[%s6666_s15 + $0x2c] sm:$0xf] }
 0x331   : > { %3624 = vmatpush.bf16.msra.mxu1 %v5458_v13  ;;  %v5510_v13 = vor.u32 %v6216_v5, %v5507_v6  ;;  %v5587_v49 = vld [vmem:[%s6666_s15 + $0x258] sm:$0xf0]  ;;  %v6200_v50 = vld [vmem:[%s6666_s15 + $0x12c] sm:$0xf] }
 0x332   : > { %3637 = vmatpush.bf16.msra.mxu2 %v5586_v61  ;;  %v5638_v61 = vor.u32 %v6248_v8, %v5635_v9  ;;  %v5315_v4 = vld [vmem:[%s6666_s15 + $0x38] sm:$0xf0]  ;;  %v6232_v59 = vld [vmem:[%s6666_s15 + $0x22c] sm:$0xf] }
 0x333   : > { %v5443_v27 = vld [vmem:[%s6666_s15 + $0x138] sm:$0xf0]  ;;  %v6264_v63 = vld [vmem:[%s6666_s15 + $0x32c] sm:$0xf] }
 0x334   : > { %3650 = vmatpush.bf16.msra.mxu3 %v5714_v17  ;;  %3612 = vmatpush.bf16.msra.mxu0 %v5314_v24  ;;  %v5766_v17 = vor.u32 %v6280_v10, %v5763_v11  ;;  %v5366_v24 = vor.u32 %v6180_v14, %v5363_v15  ;;  %v5571_v62 = vld [vmem:[%s6666_s15 + $0x238] sm:$0xf0]  ;;  %v6164_v33 = vld [vmem:[%s6666_s15 + $0xc] sm:$0xf]  ;;  %v7950_v15 = vld [vmem:[%s6677_s17] sm:$0xf] }
 0x335   : > { %3625 = vmatpush.bf16.msra.mxu1 %v5442_v31  ;;  %v6176_v31 = vld [vmem:[%s6666_s15 + $0x6c] sm:$0xf]  ;;  %v5699_v0 = vld [vmem:[%s6666_s15 + $0x338] sm:$0xf0]  ;;  %v2840_v16 = vperm.slane %v7950_v15, 0 }
 0x336   : > { %3638 = vmatpush.bf16.msra.mxu2 %v5570_v32  ;;  %v5347_v32 = vld [vmem:[%s6666_s15 + $0x78] sm:$0xf0]  ;;  %v6196_v5 = vld [vmem:[%s6666_s15 + $0x10c] sm:$0xf] }
 0x337   : > { %v5350_v38 = vor.u32 %v6176_v31, %v5347_v32  ;;  %v5299_v22 = vld [vmem:[%s6666_s15 + $0x18] sm:$0xf0]  ;;  %v6228_v8 = vld [vmem:[%s6666_s15 + $0x20c] sm:$0xf] }
 0x338   : > { %3651 = vmatpush.bf16.msra.mxu3 %v5698_v7  ;;  %3613 = vmatpush.bf16.msra.mxu0 %v5298_v41  ;;  %v6240_v7 = vld [vmem:[%s6666_s15 + $0x26c] sm:$0xf]  ;;  %v5427_v6 = vld [vmem:[%s6666_s15 + $0x118] sm:$0xf0] }
 0x339   : > { %3626 = vmatpush.bf16.msra.mxu1 %v5426_v47  ;;  %v5606_v40 = vor.u32 %v6240_v7, %v5603_v21  ;;  %v6172_v41 = vld [vmem:[%s6666_s15 + $0x4c] sm:$0xf]  ;;  %v5459_v47 = vld [vmem:[%s6666_s15 + $0x158] sm:$0xf0] }
 0x33a   : > { %3639 = vmatpush.bf16.msra.mxu2 %v5554_v48  ;;  %v6236_v48 = vld [vmem:[%s6666_s15 + $0x24c] sm:$0xf]  ;;  %v5555_v9 = vld [vmem:[%s6666_s15 + $0x218] sm:$0xf0] }
 0x33b   : > { %3614 = vmatmul.bf16.vlgmr.msra.gmra.mxu0 %v7749_v51  ;;  %v6260_v10 = vld [vmem:[%s6666_s15 + $0x30c] sm:$0xf]  ;;  %v5683_v11 = vld [vmem:[%s6666_s15 + $0x318] sm:$0xf0] }
 0x33c   : > { %3652 = vmatpush.bf16.msra.mxu3 %v5682_v55  ;;  %3658 = vmatpush.bf16.msrb.mxu0 %v5414_v57  ;;  %v5715_v55 = vld [vmem:[%s6666_s15 + $0x358] sm:$0xf0]  ;;  %v5334_v57 = vor.u32 %v6172_v41, %v5331_v42  ;;  %v5686_v14 = vor.u32 %v6260_v10, %v5683_v11  ;;  %v6540_v42 = vmov 8.0  }
 0x33d   : > { %3671 = vmatpush.bf16.msrb.mxu1 %v5542_v60  ;;  %3640 = vmatmul.bf16.vlgmr.msra.gmra.mxu2 %v7744_v45  ;;  %v5462_v60 = vor.u32 %v6204_v43, %v5459_v47  ;;  %6411 = vrcp.f32 %v6540_v42 }
 0x33e   : > { %3684 = vmatpush.bf16.msrb.mxu2 %v5670_v52  ;;  %3627 = vmatmul.bf16.vlgmr.msra.gmra.mxu1 %v7755_v58  ;;  %v5590_v52 = vor.u32 %v6236_v48, %v5587_v49  ;;  %v2842_v49 = vperm.slane %v7950_v15, 2 }
 0x33f   : > { %3653 = vmatmul.bf16.vlgmr.msra.gmra.mxu3 %v7751_v53 }
 0x340   : > { %3697 = vmatpush.bf16.msrb.mxu3 %v5798_v56  ;;  %3659 = vmatpush.bf16.msrb.mxu0 %v5398_v1  ;;  %v5718_v56 = vor.u32 %v6268_v54, %v5715_v55  ;;  %v5318_v1 = vor.u32 %v6168_v26, %v5315_v4 }
 0x341   : > { %3672 = vmatpush.bf16.msrb.mxu1 %v5526_v2  ;;  %v5446_v2 = vor.u32 %v6200_v50, %v5443_v27 }
 0x342   : > { %3685 = vmatpush.bf16.msrb.mxu2 %v5654_v3  ;;  %v5574_v3 = vor.u32 %v6232_v59, %v5571_v62 }
 0x343   : > { %v6412_v47 = vpop.eup %6411 }
 0x344   : > { %3698 = vmatpush.bf16.msrb.mxu3 %v5782_v28  ;;  %3660 = vmatpush.bf16.msrb.mxu0 %v5382_v12  ;;  %v5702_v28 = vor.u32 %v6264_v63, %v5699_v0  ;;  %v5302_v12 = vor.u32 %v6164_v33, %v5299_v22  ;;  %v3739_v55 = vmul.f32 8.0, %v6412_v47  ;;  %vm3743_vm0 = vweird.f32 %v6412_v47 }
 0x345   : > { %3673 = vmatpush.bf16.msrb.mxu1 %v5510_v13  ;;  %v5430_v13 = vor.u32 %v6196_v5, %v5427_v6 }
 0x346   : > { %3686 = vmatpush.bf16.msrb.mxu2 %v5638_v61  ;;  %v5558_v61 = vor.u32 %v6228_v8, %v5555_v9  ;;  %v3740_v50 = vsub.f32 1.0, %v3739_v55 }
 0x348   : > { %3699 = vmatpush.bf16.msrb.mxu3 %v5766_v17  ;;  %3661 = vmatpush.bf16.msrb.mxu0 %v5366_v24 }
 0x349   : > { %3674 = vmatpush.bf16.msrb.mxu1 %v5494_v25 }
 0x34a   : > { %3687 = vmatpush.bf16.msrb.mxu2 %v5622_v29 }
 0x34c   : > { %3700 = vmatpush.bf16.msrb.mxu3 %v5750_v30  ;;  %3662 = vmatpush.bf16.msrb.mxu0 %v5350_v38 }
 0x34d   : > { %3675 = vmatpush.bf16.msrb.mxu1 %v5478_v39 }
 0x34e   : > { %3688 = vmatpush.bf16.msrb.mxu2 %v5606_v40 }
 0x350   : > { %3701 = vmatpush.bf16.msrb.mxu3 %v5734_v44  ;;  %3663 = vmatpush.bf16.msrb.mxu0 %v5334_v57 }
 0x351   : > { %3676 = vmatpush.bf16.msrb.mxu1 %v5462_v60 }
 0x352   : > { %3689 = vmatpush.bf16.msrb.mxu2 %v5590_v52 }
 0x354   : > { %3702 = vmatpush.bf16.msrb.mxu3 %v5718_v56  ;;  %3664 = vmatpush.bf16.msrb.mxu0 %v5318_v1  ;;  %v3741_v1 = vmul.f32 %v6412_v47, %v3740_v50 }
 0x355   : > { %3677 = vmatpush.bf16.msrb.mxu1 %v5446_v2 }
 0x356   : > { %3690 = vmatpush.bf16.msrb.mxu2 %v5574_v3  ;;  %v3742_v6 = vadd.f32 %v6412_v47, %v3741_v1 }
 0x358   : > { %3703 = vmatpush.bf16.msrb.mxu3 %v5702_v28  ;;  %3665 = vmatpush.bf16.msrb.mxu0 %v5302_v12 }
 0x359   : > { %3678 = vmatpush.bf16.msrb.mxu1 %v5430_v13 }
 0x35a   : > { %3691 = vmatpush.bf16.msrb.mxu2 %v5558_v61  ;;  %v7955_v61 = vsel %vm3743_vm0, %v6412_v47, %v3742_v6 }
 0x35b   : > { %3666 = vmatmul.bf16.vlgmr.msrb.gmra.mxu0 %v7749_v51 }
 0x35c   : > { %3704 = vmatpush.bf16.msrb.mxu3 %v5686_v14  ;;  %3679 = vmatmul.bf16.vlgmr.msrb.gmra.mxu1 %v7755_v58 }
 0x35d   : > { %3692 = vmatmul.bf16.vlgmr.msrb.gmra.mxu2 %v7744_v45  ;;  %v2841_v45 = vperm.slane %v7950_v15, 1 }
 0x35f   : > { %3705 = vmatmul.bf16.vlgmr.msrb.gmra.mxu3 %v7751_v53 }
 0x378   : > { %v3511_v17 = vpop.f32.mrf.mxu0 }
 0x379   : > { %v3512_v46 = vadd.f32 %v3511_v17, %v2840_v16 }
 0x37b   : > { %v3524_v18 = vpop.f32.mrf.mxu1 }
 0x37c   : > { %v3525_v19 = vadd.f32 %v3524_v18, %v3512_v46 }
 0x380   : > { %v3537_v20 = vpop.f32.mrf.mxu2  ;;  %v3513_v29 = vpop.f32.mrf.mxu0 }
 0x381   : > { %v3538_v23 = vadd.f32 %v3537_v20, %v3525_v19  ;;  %v2843_v29 = vperm.slane %v7950_v15, 3 }
 0x382   : > { %v3550_v24 = vpop.f32.mrf.mxu3 }
 0x383   : > { %v3551_v25 = vadd.f32 %v3550_v24, %v3538_v23  ;;  %v3526_v51 = vpop.f32.mrf.mxu1 }
 0x385   : > { %v3710_v44 = vmax.f32 %v3551_v25, 0.0 }
 0x387   : > { %v3714_v54 = vrot.slane %v3710_v44, 4 }
 0x388   : > { %v3539_v31 = vpop.f32.mrf.mxu2 }
 0x389   : > { %v3715_v4 = vadd.f32 %v3714_v54, %v3710_v44 }
 0x38a   : > { %v3552_v58 = vpop.f32.mrf.mxu3 }
 0x38b   : > { %v3716_v62 = vrot.slane %v3715_v4, 2 }
 0x38d   : > { %v3717_v5 = vadd.f32 %v3716_v62, %v3715_v4 }
 0x38f   : > { %v3718_v11 = vrot.slane %v3717_v5, 1 }
 0x391   : > { %v3719_v17 = vadd.f32 %v3718_v11, %v3717_v5 }
 0x393   : > { %v3745_v20 = vmul.f32 %v7955_v61, %v3719_v17 }
 0x395   : > { %v7965_v51 = vsub.f32 %v3710_v44, %v3745_v20 }
 0x398   : > { %v3563_v32 = vpop.f32.mrf.mxu0 }
 0x399   : > { %v3564_v35 = vadd.f32 %v3563_v32, %v2841_v45 }
 0x39b   : > { %v3576_v53 = vpop.f32.mrf.mxu1 }
 0x39c   : > { %v3577_v34 = vadd.f32 %v3576_v53, %v3564_v35 }
 0x3a0   : > { %v3589_v30 = vpop.f32.mrf.mxu2  ;;  %v3565_v21 = vpop.f32.mrf.mxu0 }
 0x3a1   : > { %v3590_v37 = vadd.f32 %v3589_v30, %v3577_v34  ;;  %v3753_v30 = vmul.f32 %v7965_v51, %v7965_v51 }
 0x3a2   : > { %v3602_v7 = vpop.f32.mrf.mxu3 }
 0x3a3   : > { %v3578_v36 = vpop.f32.mrf.mxu1  ;;  %v3603_v39 = vadd.f32 %v3602_v7, %v3590_v37 }
 0x3a4   : > { %v3757_v36 = vrot.slane %v3753_v30, 4 }
 0x3a5   : > { %v3711_v41 = vmax.f32 %v3603_v39, 0.0 }
 0x3a7   : > { %v3720_v43 = vrot.slane %v3711_v41, 4 }
 0x3a8   : > { %v3591_v38 = vpop.f32.mrf.mxu2 }
 0x3a9   : > { %v3721_v48 = vadd.f32 %v3720_v43, %v3711_v41  ;;  %v3758_v43 = vadd.f32 %v3757_v36, %v3753_v30 }
 0x3aa   : > { %v3604_v40 = vpop.f32.mrf.mxu3 }
 0x3ab   : > { %v3722_v57 = vrot.slane %v3721_v48, 2  ;;  %v3759_v54 = vrot.slane %v3758_v43, 2 }
 0x3ad   : > { %v3723_v27 = vadd.f32 %v3722_v57, %v3721_v48  ;;  %v3760_v50 = vadd.f32 %v3759_v54, %v3758_v43 }
 0x3af   : > { %v3724_v2 = vrot.slane %v3723_v27, 1 }
 0x3b1   : > { %v3725_v8 = vadd.f32 %v3724_v2, %v3723_v27 }
 0x3b3   : > { %v3746_v14 = vmul.f32 %v7955_v61, %v3725_v8 }
 0x3b5   : > { %v7958_v18 = vsub.f32 %v3711_v41, %v3746_v14 }
 0x3b7   : > { %v3754_v24 = vmul.f32 %v7958_v18, %v7958_v18 }
 0x3b8   : > { %v3615_v60 = vpop.f32.mrf.mxu0 }
 0x3b9   : > { %v3616_v52 = vadd.f32 %v3615_v60, %v2842_v49  ;;  %v3763_v58 = vrot.slane %v3754_v24, 4 }
 0x3bb   : > { %v3628_v26 = vpop.f32.mrf.mxu1  ;;  %v3764_v7 = vadd.f32 %v3763_v58, %v3754_v24 }
 0x3bc   : > { %v3629_v56 = vadd.f32 %v3628_v26, %v3616_v52 }
 0x3bd   : > { %v3765_v38 = vrot.slane %v3764_v7, 2 }
 0x3bf   : > { %v3766_v48 = vadd.f32 %v3765_v38, %v3764_v7 }
 0x3c0   : > { %v3641_v59 = vpop.f32.mrf.mxu2  ;;  %v3617_v33 = vpop.f32.mrf.mxu0 }
 0x3c1   : > { %v3642_v63 = vadd.f32 %v3641_v59, %v3629_v56  ;;  %v3767_v52 = vrot.slane %v3766_v48, 1 }
 0x3c2   : > { %v3654_v0 = vpop.f32.mrf.mxu3 }
 0x3c3   : > { %v3655_v3 = vadd.f32 %v3654_v0, %v3642_v63  ;;  %v3630_v22 = vpop.f32.mrf.mxu1  ;;  %v3768_v59 = vadd.f32 %v3767_v52, %v3766_v48  ;;  %v3761_v63 = vrot.slane %v3760_v50, 1 }
 0x3c5   : > { %v3712_v28 = vmax.f32 %v3655_v3, 0.0  ;;  %v3782_v2 = vmul.f32 %v3768_v59, %v7955_v61  ;;  %v3762_v33 = vadd.f32 %v3761_v63, %v3760_v50  ;;  %v3858_v50 = vld [vmem:[%s6687_s18] sm:$0xf] }
 0x3c6   : > { %v3860_v59 = vperm.slane %v3858_v50, 0  ;;  %v3862_v63 = vperm.slane %v3858_v50, 2 }
 0x3c7   : > { %v3726_v9 = vrot.slane %v3712_v28, 4  ;;  %v3781_v8 = vmul.f32 %v3762_v33, %v7955_v61 }
 0x3c8   : > { %v3643_v10 = vpop.f32.mrf.mxu2 }
 0x3c9   : > { %v3727_v12 = vadd.f32 %v3726_v9, %v3712_v28 }
 0x3ca   : > { %v3656_v13 = vpop.f32.mrf.mxu3 }
 0x3cb   : > { %v3728_v16 = vrot.slane %v3727_v12, 2 }
 0x3cd   : > { %v3729_v46 = vadd.f32 %v3728_v16, %v3727_v12  ;;  %v3786_v12 = vadd.f32 1e-05, %v3781_v8 }
 0x3cf   : > { %v3730_v19 = vrot.slane %v3729_v46, 1  ;;  %vm3796_vm7 = vweird.f32 %v3786_v12 }
 0x3d1   : > { %v3731_v23 = vadd.f32 %v3730_v19, %v3729_v46 }
 0x3d3   : > { %v3747_v25 = vmul.f32 %v7955_v61, %v3731_v23 }
 0x3d5   : > { %v7967_v31 = vsub.f32 %v3712_v28, %v3747_v25  ;;  %v3787_v28 = vadd.f32 1e-05, %v3782_v2 }
 0x3d7   : > { %v3755_v45 = vmul.f32 %v7967_v31, %v7967_v31  ;;  %6413 = vrsqrt.f32 %v3787_v28  ;;  %vm3806_vm1 = vweird.f32 %v3787_v28 }
 0x3d8   : > { %v3667_v32 = vpop.f32.mrf.mxu0 }
 0x3d9   : > { %v3668_v53 = vadd.f32 %v3667_v32, %v2843_v29  ;;  %v3680_v35 = vpop.f32.mrf.mxu1  ;;  %v3769_v34 = vrot.slane %v3755_v45, 4 }
 0x3db   : > { %v3681_v21 = vadd.f32 %v3680_v35, %v3668_v53  ;;  %v3770_v37 = vadd.f32 %v3769_v34, %v3755_v45 }
 0x3dd   : > { %v3771_v44 = vrot.slane %v3770_v37, 2  ;;  %v6414_v16 = vpop.eup %6413 }
 0x3de   : > { %v3801_v20 = vmul.f32 %v6414_v16, %v3787_v28  ;;  %vm3807_vm2 = vweird.f32 %v6414_v16 }
 0x3df   : > { %v3772_v55 = vadd.f32 %v3771_v44, %v3770_v37  ;;  %vm3808_vm4 = vmor %vm3806_vm1, %vm3807_vm2 }
 0x3e0   : > { %v3693_v15 = vpop.f32.mrf.mxu2  ;;  %v3669_v41 = vpop.f32.mrf.mxu0  ;;  %v3802_v58 = vmul.f32 %v6414_v16, %v3801_v20 }
 0x3e1   : > { %v3694_v39 = vadd.f32 %v3693_v15, %v3681_v21  ;;  %v3682_v42 = vpop.f32.mrf.mxu1  ;;  %v3773_v56 = vrot.slane %v3772_v55, 1 }
 0x3e2   : > { %v3706_v40 = vpop.f32.mrf.mxu3  ;;  %v3803_v35 = vmul.f32 0.5, %v3802_v58 }
 0x3e3   : > { %v3707_v47 = vadd.f32 %v3706_v40, %v3694_v39  ;;  %v3774_v0 = vadd.f32 %v3773_v56, %v3772_v55 }
 0x3e4   : > { %v3804_v7 = vsub.f32 1.5, %v3803_v35 }
 0x3e5   : > { %v3713_v49 = vmax.f32 %v3707_v47, 0.0  ;;  %v3783_v22 = vmul.f32 %v3774_v0, %v7955_v61  ;;  %v3863_v0 = vperm.slane %v3858_v50, 3 }
 0x3e6   : > { %v3805_v38 = vmul.f32 %v6414_v16, %v3804_v7 }
 0x3e7   : > { %v3732_v57 = vrot.slane %v3713_v49, 4  ;;  %v3788_v9 = vadd.f32 1e-05, %v3783_v22 }
 0x3e8   : > { %v3695_v60 = vpop.f32.mrf.mxu2  ;;  %v3809_v42 = vsel %vm3808_vm4, %v6414_v16, %v3805_v38 }
 0x3e9   : > { %v3733_v26 = vadd.f32 %v3732_v57, %v3713_v49  ;;  %6415 = vrsqrt.f32 %v3788_v9  ;;  %vm3816_vm5 = vweird.f32 %v3788_v9  ;;  %v3785_v60 = vld [vmem:[%s6682_s16] sm:$0xf] }
 0x3ea   : > { %v3708_v4 = vpop.f32.mrf.mxu3  ;;  %6417 = vrsqrt.f32 %v3786_v12 }
 0x3eb   : > { %v3734_v27 = vrot.slane %v3733_v26, 2 }
 0x3ed   : > { %v3735_v62 = vadd.f32 %v3734_v27, %v3733_v26 }
 0x3ef   : > { %v3736_v1 = vrot.slane %v3735_v62, 1  ;;  %v6416_v46 = vpop.eup %6415 }
 0x3f0   : > { %v3811_v24 = vmul.f32 %v6416_v46, %v3788_v9  ;;  %v6418_v25 = vpop.eup %6417  ;;  %vm3817_vm3 = vweird.f32 %v6416_v46 }
 0x3f1   : > { %v3737_v3 = vadd.f32 %v3736_v1, %v3735_v62  ;;  %v3791_v32 = vmul.f32 %v6418_v25, %v3786_v12  ;;  %vm3797_vm8 = vweird.f32 %v6418_v25  ;;  %vm3818_vm9 = vmor %vm3816_vm5, %vm3817_vm3  ;;  %v3861_v62 = vperm.slane %v3858_v50, 1 }
 0x3f2   : > { %v3812_v53 = vmul.f32 %v6416_v46, %v3811_v24  ;;  %vm3798_vm14 = vmor %vm3796_vm7, %vm3797_vm8 }
 0x3f3   : > { %v3748_v5 = vmul.f32 %v7955_v61, %v3737_v3  ;;  %v3792_v30 = vmul.f32 %v6418_v25, %v3791_v32 }
 0x3f4   : > { %v3813_v34 = vmul.f32 0.5, %v3812_v53 }
 0x3f5   : > { %v7976_v6 = vsub.f32 %v3713_v49, %v3748_v5  ;;  %v3793_v36 = vmul.f32 0.5, %v3792_v30  ;;  %v3834_v49 = vrot.slane %v3809_v42, 7 }
 0x3f6   : > { %v3814_v37 = vsub.f32 1.5, %v3813_v34 }
 0x3f7   : > { %v3756_v10 = vmul.f32 %v7976_v6, %v7976_v6  ;;  %v3794_v40 = vsub.f32 1.5, %v3793_v36 }
 0x3f8   : > { %v3815_v41 = vmul.f32 %v6416_v46, %v3814_v37 }
 0x3f9   : > { %v3775_v11 = vrot.slane %v3756_v10, 4  ;;  %v3795_v44 = vmul.f32 %v6418_v25, %v3794_v40 }
 0x3fa   : > { %v3819_v47 = vsel %vm3818_vm9, %v6416_v46, %v3815_v41 }
 0x3fb   : > { %v3776_v13 = vadd.f32 %v3775_v11, %v3756_v10  ;;  %v3835_v55 = vrot.slane %v3819_v47, 6  ;;  %v3799_v52 = vsel %vm3798_vm14, %v6418_v25, %v3795_v44 }
 0x3fc   : > { %v3838_v26 = vsel %vm3837_vm12, %v3799_v52, %v3834_v49 }
 0x3fd   : > { %v3777_v14 = vrot.slane %v3776_v13, 2 }
 0x3ff   : > { %v3778_v17 = vadd.f32 %v3777_v14, %v3776_v13 }
 0x401   : > { %v3779_v19 = vrot.slane %v3778_v17, 1 }
 0x403   : > { %v3780_v23 = vadd.f32 %v3779_v19, %v3778_v17 }
 0x405   : > { %v3784_v29 = vmul.f32 %v3780_v23, %v7955_v61 }
 0x407   : > { %v3789_v45 = vadd.f32 1e-05, %v3784_v29 }
 0x409   : > { %6419 = vrsqrt.f32 %v3789_v45  ;;  %vm3826_vm10 = vweird.f32 %v3789_v45 }
 0x40f   : > { %v6420_v21 = vpop.eup %6419 }
 0x410   : > { %v3821_v15 = vmul.f32 %v6420_v21, %v3789_v45  ;;  %vm3827_vm6 = vweird.f32 %v6420_v21 }
 0x411   : > { %vm3828_vm11 = vmor %vm3826_vm10, %vm3827_vm6 }
 0x412   : > { %v3822_v39 = vmul.f32 %v6420_v21, %v3821_v15 }
 0x414   : > { %v3823_v61 = vmul.f32 0.5, %v3822_v39 }
 0x416   : > { %v3824_v43 = vsub.f32 1.5, %v3823_v61 }
 0x418   : > { %v3825_v48 = vmul.f32 %v6420_v21, %v3824_v43 }
 0x41a   : > { %v3829_v54 = vsel %vm3828_vm11, %v6420_v21, %v3825_v48 }
 0x41b   : > { %v3836_v57 = vrot.slane %v3829_v54, 5 }
 0x41d   : > { %v3840_v4 = vsel %vm3839_vm13, %v3835_v55, %v3836_v57 }
 0x41e   : > { %v3842_v56 = vsel %vm3841_vm15, %v3838_v26, %v3840_v4 }
 0x41f   : > { %v3844_v27 = vmul.f32 %v3842_v56, %v3785_v60 }
 0x421   : > { %v3846_v1 = vperm.slane %v3844_v27, 0  ;;  %v3847_v2 = vperm.slane %v3844_v27, 1  ;;  %v3848_v3 = vperm.slane %v3844_v27, 2  ;;  %v3849_v33 = vperm.slane %v3844_v27, 3 }
 0x423   : > { %v3854_v22 = vmul.f32 %v3846_v1, %v7965_v51  ;;  %v3855_v5 = vmul.f32 %v3847_v2, %v7958_v18  ;;  %v3856_v28 = vmul.f32 %v3848_v3, %v7967_v31  ;;  %v3857_v8 = vmul.f32 %v3849_v33, %v7976_v6 }
 0x425   : > { %v3868_v9 = vadd.f32 %v3860_v59, %v3854_v22  ;;  %v3869_v10 = vadd.f32 %v3861_v62, %v3855_v5  ;;  %v3870_v11 = vadd.f32 %v3862_v63, %v3856_v28  ;;  %v3871_v12 = vadd.f32 %v3863_v0, %v3857_v8 }
 0x427   : > { %v3872_v13 = vpack.c.bf16 %v3869_v10, %v3868_v9  ;;  %v3873_v14 = vpack.c.bf16 %v3871_v12, %v3870_v11 }
 0x429   : > { %3877 = vst [vmem:[#allocation2] sm:$0xff] %v3872_v13 }
 0x42a   : > { %3878 = vst [vmem:[#allocation2 + $0x8] sm:$0xff] %v3873_v14 }
 0x42b PF: > { %p3879_p7 = scmp.eq.s32.totalorder %s6526_s30, 3 }
 0x42c   : > { %v6299_v18 = vld [vmem:[%s8114_s3 + $0x38] sm:$0xff] (%p3879_p7)  ;;  %v6298_v16 = vld [vmem:[%s8114_s3 + $0x30] sm:$0xff] (%p3879_p7)  ;;  %v6297_v20 = vld [vmem:[%s8114_s3 + $0x28] sm:$0xff] (%p3879_p7) }
 0x42d   : > { %3884 = sbr.rel (!%p3879_p7) target bundleno = 1243 (0x4db), region = 72  ;;  %v6307_v51 = vld [vmem:[%s8114_s3 + $0x78] sm:$0xff] (%p3879_p7)  ;;  %4161 = vmatpush.bf16.msra.mxu0 (%p3879_p7), %v6299_v18  ;;  %v6306_v17 = vld [vmem:[%s8114_s3 + $0x70] sm:$0xff] (%p3879_p7)  ;;  %v6305_v23 = vld [vmem:[%s8114_s3 + $0x68] sm:$0xff] (%p3879_p7) }
 0x42e   : > { %v6315_v31 = vld [vmem:[%s8114_s3 + $0xb8] sm:$0xff] (%p3879_p7)  ;;  %4174 = vmatpush.bf16.msra.mxu1 (%p3879_p7), %v6307_v51  ;;  %v6314_v46 = vld [vmem:[%s8114_s3 + $0xb0] sm:$0xff] (%p3879_p7)  ;;  %v6313_v24 = vld [vmem:[%s8114_s3 + $0xa8] sm:$0xff] (%p3879_p7) }
 0x42f   : > { %v6323_v6 = vld [vmem:[%s8114_s3 + $0xf8] sm:$0xff] (%p3879_p7)  ;;  %4187 = vmatpush.bf16.msra.mxu2 (%p3879_p7), %v6315_v31  ;;  %v6322_v19 = vld [vmem:[%s8114_s3 + $0xf0] sm:$0xff] (%p3879_p7)  ;;  %v6321_v25 = vld [vmem:[%s8114_s3 + $0xe8] sm:$0xff] (%p3879_p7) }
 0x430   : > { %4200 = vmatpush.bf16.msra.mxu3 (%p3879_p7), %v6323_v6  ;;  %v6296_v29 = vld [vmem:[%s8114_s3 + $0x20] sm:$0xff] (%p3879_p7)  ;;  %v6295_v53 = vld [vmem:[%s8114_s3 + $0x18] sm:$0xff] (%p3879_p7)  ;;  %v6294_v7 = vld [vmem:[%s8114_s3 + $0x10] sm:$0xff] (%p3879_p7) }
 0x431   : > { %4162 = vmatpush.bf16.msra.mxu0 (%p3879_p7), %v6298_v16  ;;  %v6304_v58 = vld [vmem:[%s8114_s3 + $0x60] sm:$0xff] (%p3879_p7)  ;;  %v6303_v35 = vld [vmem:[%s8114_s3 + $0x58] sm:$0xff] (%p3879_p7)  ;;  %v6302_v21 = vld [vmem:[%s8114_s3 + $0x50] sm:$0xff] (%p3879_p7) }
 0x432   : > { %4175 = vmatpush.bf16.msra.mxu1 %v6306_v17  ;;  %v6312_v45 = vld [vmem:[%s8114_s3 + $0xa0] sm:$0xff]  ;;  %v6311_v30 = vld [vmem:[%s8114_s3 + $0x98] sm:$0xff]  ;;  %v6310_v36 = vld [vmem:[%s8114_s3 + $0x90] sm:$0xff] }
 0x433   : > { %4188 = vmatpush.bf16.msra.mxu2 %v6314_v46  ;;  %v6320_v32 = vld [vmem:[%s8114_s3 + $0xe0] sm:$0xff]  ;;  %v6319_v34 = vld [vmem:[%s8114_s3 + $0xd8] sm:$0xff]  ;;  %v6318_v37 = vld [vmem:[%s8114_s3 + $0xd0] sm:$0xff] }
 0x434   : > { %4201 = vmatpush.bf16.msra.mxu3 %v6322_v19  ;;  %v6293_v15 = vld [vmem:[%s8114_s3 + $0x8] sm:$0xff]  ;;  %v3885_v39 = vld [vmem:[#allocation2] sm:$0xff] }
 0x435   : > { %4163 = vmatpush.bf16.msra.mxu0 %v6297_v20  ;;  %v6301_v38 = vld [vmem:[%s8114_s3 + $0x48] sm:$0xff]  ;;  %v3957_v42 = vunpack.c.l.b16 %v3885_v39  ;;  %v3958_v43 = vunpack.c.h.b16 %v3885_v39  ;;  %v6292_v44 = vld [vmem:[%s8114_s3] sm:$0xff] }
 0x436   : > { %4176 = vmatpush.bf16.msra.mxu1 %v6305_v23  ;;  %v6309_v40 = vld [vmem:[%s8114_s3 + $0x88] sm:$0xff]  ;;  %v6300_v47 = vld [vmem:[%s8114_s3 + $0x40] sm:$0xff] }
 0x437   : > { %4189 = vmatpush.bf16.msra.mxu2 %v6313_v24  ;;  %v6317_v41 = vld [vmem:[%s8114_s3 + $0xc8] sm:$0xff]  ;;  %v6308_v54 = vld [vmem:[%s8114_s3 + $0x80] sm:$0xff]  ;;  %v3961_v57 = vpack.c.b16 %v3957_v42, %v3957_v42  ;;  %v3962_v60 = vpack.c.b16 %v3958_v43, %v3958_v43 }
 0x438   : > { %4202 = vmatpush.bf16.msra.mxu3 %v6321_v25  ;;  %v3886_v61 = vld [vmem:[#allocation2 + $0x8] sm:$0xff]  ;;  %v6316_v55 = vld [vmem:[%s8114_s3 + $0xc0] sm:$0xff] }
 0x439   : > { %4164 = vmatpush.bf16.msra.mxu0 %v6296_v29  ;;  %v3959_v48 = vunpack.c.l.b16 %v3886_v61  ;;  %v3960_v49 = vunpack.c.h.b16 %v3886_v61  ;;  %v6421_v4 = vld [vmem:[%s8118_s7] ss:$0 sm:$0xff] }
 0x43a   : > { %4177 = vmatpush.bf16.msra.mxu1 %v6304_v58 }
 0x43b   : > { %4190 = vmatpush.bf16.msra.mxu2 %v6312_v45  ;;  %v3963_v52 = vpack.c.b16 %v3959_v48, %v3959_v48  ;;  %v3964_v26 = vpack.c.b16 %v3960_v49, %v3960_v49 }
 0x43c   : > { %4203 = vmatpush.bf16.msra.mxu3 %v6320_v32 }
 0x43d   : > { %4165 = vmatpush.bf16.msra.mxu0 %v6295_v53 }
 0x43e   : > { %4178 = vmatpush.bf16.msra.mxu1 %v6303_v35 }
 0x43f   : > { %4191 = vmatpush.bf16.msra.mxu2 %v6311_v30 }
 0x440   : > { %4204 = vmatpush.bf16.msra.mxu3 %v6319_v34 }
 0x441   : > { %4166 = vmatpush.bf16.msra.mxu0 %v6294_v7 }
 0x442   : > { %4179 = vmatpush.bf16.msra.mxu1 %v6302_v21 }
 0x443   : > { %4192 = vmatpush.bf16.msra.mxu2 %v6310_v36 }
 0x444   : > { %4205 = vmatpush.bf16.msra.mxu3 %v6318_v37 }
 0x445   : > { %4167 = vmatpush.bf16.msra.mxu0 %v6293_v15 }
 0x446   : > { %4180 = vmatpush.bf16.msra.mxu1 %v6301_v38 }
 0x447   : > { %4193 = vmatpush.bf16.msra.mxu2 %v6309_v40 }
 0x448   : > { %4206 = vmatpush.bf16.msra.mxu3 %v6317_v41 }
 0x449   : > { %4168 = vmatpush.bf16.msra.mxu0 %v6292_v44 }
 0x44a   : > { %4181 = vmatpush.bf16.msra.mxu1 %v6300_v47 }
 0x44b   : > { %4194 = vmatpush.bf16.msra.mxu2 %v6308_v54 }
 0x44c   : > { %4207 = vmatpush.bf16.msra.mxu3 %v6316_v55  ;;  %4169 = vmatmul.bf16.vlgmr.msra.gmra.mxu0 %v3961_v57 }
 0x44d   : > { %4182 = vmatmul.bf16.vlgmr.msra.gmra.mxu1 %v3962_v60 }
 0x44e   : > { %4195 = vmatmul.bf16.vlgmr.msra.gmra.mxu2 %v3963_v52 }
 0x44f   : > { %4208 = vmatmul.bf16.vlgmr.msra.gmra.mxu3 %v3964_v26 }
 0x4c9   : > { %v4170_v50 = vpop.f32.mrf.mxu0 }
 0x4ca   : > { %v4183_v56 = vpop.f32.mrf.mxu1  ;;  %v4171_v27 = vadd.f32 %v6421_v4, %v4170_v50 }
 0x4cc   : > { %v4184_v59 = vadd.f32 %v4183_v56, %v4171_v27 }
 0x4d1   : > { %v4196_v62 = vpop.f32.mrf.mxu2  ;;  %v4172_v1 = vpop.f32.mrf.mxu0 }
 0x4d2   : > { %v4209_v63 = vpop.f32.mrf.mxu3  ;;  %v4197_v0 = vadd.f32 %v4196_v62, %v4184_v59  ;;  %v4185_v2 = vpop.f32.mrf.mxu1 }
 0x4d4   : > { %v4210_v3 = vadd.f32 %v4209_v63, %v4197_v0 }
 0x4d6   : > { %4213 = vst [vmem:[#allocation7] sm:$0xff] %v4210_v3 }
 0x4d9   : > { %v4198_v33 = vpop.f32.mrf.mxu2 }
 0x4da   : > { %v4211_v22 = vpop.f32.mrf.mxu3 }
 0x4db PF: > { %s8127_s13 = sadd.s32 4294967295, %s6534_s10   ;;  %s4222_s17 = sshll.u32 %s8119_s8, 4  ;;  %s4223_s17 = int_to_ptr.hbm [resolvable:$true] %s4222_s17 }
 0x4dc   : > { %p6335_p8 = scmp.eq.s32.totalorder %s8127_s13, 3  ;;  %s6541_s16 = smov [#allocation7]  }
 0x4dd   : > { %s4220_s18 = sshll.u32 %s6541_s16, 4  ;;  %s4221_s18 = int_to_ptr.vmem [resolvable:$true] %s4220_s18 }
 0x4de   : > { %6327 = dma.vmem_to_hbm [thread:$0]  (%p6335_p8), %s4221_s18, 128, %s4223_s17, [#allocation6]  }
 0x4df   : > { %6509 = dma.done.wait (%p6335_p8), [#allocation6], 128  }
 0x4e0   : > { %6511 = vsyncadd (%p6335_p8), [#allocation6], 4294967168 }
 0x4e1 PF: > { %s22_s10 = sadd.s32 1, %s6534_s10   ;;  %s8128_s27 = smov %s6518_s28 }
 0x4e2   : > { %p19_p9 = scmp.ge.s32.totalorder %s22_s10, 6   ;;  %s8129_s28 = smov %s6522_s29 }
 0x4e3   : > { %s8130_s29 = smov %s6639_s21  ;;  %s8131_s30 = smov %s6530_s9 }
 0x4e4   : > { %s8132_s9 = smov %s8134_s12  ;;  %21 = sbr.rel (!%p19_p9) target bundleno = 7 (0x7), region = 120 }
 0x4e9   :  { %4236 = vsyncpa [#allocation5], 1 }
 0x4ea   :  { %4238 = vsyncpa [#allocation5 + $0x1], 1 }
 0x4eb   :  { %4239 = vsyncpa [#allocation6], 1 }
 0x4ec   :  { %4241 = vsyncpa [#allocation6 + $0x1], 1 }

</bundles_post_ra>
